<compile_context>
chip_gen: v5e
topology: v5e:2x2
jax: 0.10.0
libtpu: 0.0.40
codegen_flags: <defaults>
</compile_context>

<pallas_src>
import functools

import jax
import jax.numpy as jnp
from jax import lax
from jax.experimental import pallas as pl
from jax.experimental.pallas import tpu as pltpu


def _taskhead_kernel(S, Bb, T, H, eps,
                     x_ref, wt_ref, b_ref, g_ref, be_ref,
                     start_ref, end_ref, trans_ref, transT_ref, transf_ref,
                     tags_ref, mask_ref, last_ref,
                     llh_ref, path_ref,
                     em_ref, hist_ref):
    f32 = jnp.float32

    # ---------- Linear (tiny MXU matmul) + LayerNorm over the tag axis ----------
    # y[tag, t*Bb + b] = sum_h W^T[tag, h] * x[h, t*Bb + b] + bias[tag]
    y = jnp.dot(wt_ref[...], x_ref[...], preferred_element_type=f32) + b_ref[...]
    mu = jnp.mean(y, axis=0, keepdims=True)
    var = jnp.mean((y - mu) * (y - mu), axis=0, keepdims=True)
    em_ref[...] = (y - mu) * lax.rsqrt(var + eps) * g_ref[...] + be_ref[...]   # (T, S*Bb)

    start = start_ref[...]            # (T, 1)
    end = end_ref[...]                # (T, 1)
    trans = trans_ref[...]            # (T, T)   [prev, next]
    transT = transT_ref[...]          # (T, T)   [next, prev]
    transf = transf_ref[...]          # (T*T, 1) flat [prev*T + next]

    iota_t = lax.broadcasted_iota(jnp.int32, (T, Bb), 0)
    iota_tt = lax.broadcasted_iota(jnp.int32, (T * T, Bb), 0)

    def em_at(t):                                        # (T, Bb) lane-aligned slice
        off = pl.multiple_of(t * Bb, Bb)
        return em_ref[:, pl.ds(off, Bb)]

    def row(ref, t):                                     # (1, Bb)
        return ref[pl.ds(t, 1), :]

    unroll = S <= 16

    # ---------- t = 0: init CRF numerator and forward variable ----------
    em0 = em_at(0)
    tags0 = row(tags_ref, 0)
    oh0 = (iota_t == tags0).astype(f32)
    num0 = jnp.sum(oh0 * (start + em0), axis=0, keepdims=True)       # (1, Bb)
    last0 = oh0 * row(last_ref, 0)                                   # (T, Bb)
    alpha0 = start + em0                                             # (T, Bb)

    # ---------- t = 1..S-1: numerator (streamed) + masked forward recursion ----------
    def fwd_body(t, carry):
        alpha, num, last_oh, prev_tags = carry
        em_t = em_at(t)
        tags_t = row(tags_ref, t)
        m_t = row(mask_ref, t)                                       # (1, Bb) f32
        oh_t = (iota_t == tags_t).astype(f32)                        # (T, Bb)

        # numerator: emission[tags[t]] + trans[tags[t-1], tags[t]], masked
        emit = jnp.sum(oh_t * em_t, axis=0, keepdims=True)
        pair_oh = (iota_tt == (prev_tags * T + tags_t)).astype(f32)  # (T*T, Bb)
        tr = jnp.sum(pair_oh * transf, axis=0, keepdims=True)
        num = num + m_t * (emit + tr)
        last_oh = last_oh + oh_t * row(last_ref, t)

        # partition: logsumexp over previous tag (reduction over leading axis)
        z = alpha[:, None, :] + trans[:, :, None]                    # (Tp, Tc, Bb)
        zmax = jnp.max(z, axis=0)                                    # (Tc, Bb)
        nxt = jnp.log(jnp.sum(jnp.exp(z - zmax[None]), axis=0)) + zmax + em_t
        alpha = m_t * nxt + (1.0 - m_t) * alpha
        return alpha, num, last_oh, tags_t

    alpha, num, last_oh, _ = lax.fori_loop(
        1, S, fwd_body, (alpha0, num0, last0, tags0), unroll=unroll)

    num = num + jnp.sum(last_oh * end, axis=0, keepdims=True)        # end transition
    alpha = alpha + end
    amax = jnp.max(alpha, axis=0, keepdims=True)
    denom = jnp.log(jnp.sum(jnp.exp(alpha - amax), axis=0, keepdims=True)) + amax
    llh_ref[...] = num - denom                                       # per-example llh (1, Bb)

    # ---------- Viterbi forward (crf.decode(x): all-ones mask) ----------
    def vit_body(t, vscore):
        # fused max + argmax over previous tag: single pass, static unroll over T
        best = vscore[0:1, :] + transT[:, 0:1]                       # (Tc, Bb), prev = 0
        bidx = jnp.zeros((T, Bb), jnp.int32)
        for p in range(1, T):
            cand = vscore[p:p + 1, :] + transT[:, p:p + 1]
            upd = cand > best                                        # keep first argmax on ties
            best = jnp.where(upd, cand, best)
            bidx = jnp.where(upd, p, bidx)
        hist_ref[t - 1] = bidx                                       # VMEM history spill
        return best + em_at(t)

    vscore = lax.fori_loop(1, S, vit_body, alpha0, unroll=unroll)
    vscore = vscore + end

    # final fused max + argmax over the tag (sublane) axis
    best = vscore[0:1, :]
    cur = jnp.zeros((1, Bb), jnp.int32)
    for c in range(1, T):
        cand = vscore[c:c + 1, :]
        upd = cand > best
        best = jnp.where(upd, cand, best)
        cur = jnp.where(upd, c, cur)
    path_ref[pl.ds(S - 1, 1), :] = cur                               # lane-dense row store

    # ---------- backtrace ----------
    def back_body(i, cur):
        t = S - 2 - i
        oh = iota_t == cur                                           # (T, Bb)
        cur = jnp.sum(jnp.where(oh, hist_ref[t], 0), axis=0, keepdims=True)
        path_ref[pl.ds(t, 1), :] = cur
        return cur

    lax.fori_loop(0, S - 1, back_body, cur, unroll=unroll)


def task_head_forward(params, x, labels, attention_mask):
    """Mirrors TaskHead.forward: returns (loss, path)."""
    B, S, H = x.shape
    T = params["w"].shape[1]
    Bb = 128                                    # batch block on the lane axis
    nblk = max(1, (B + Bb - 1) // Bb)
    Bp = nblk * Bb
    pad_b = Bp - B

    # ---- plain-JAX glue: batch-on-lanes, block-major layouts ----
    xf = jnp.pad(x.astype(jnp.float32), ((0, pad_b), (0, 0), (0, 0)))
    # (nblk, Bb, S, H) -> (nblk, H, S, Bb) -> (nblk, H, S*Bb): column = t*Bb + b
    x_blk = jnp.transpose(xf.reshape(nblk, Bb, S, H), (0, 3, 2, 1)).reshape(nblk, H, S * Bb)

    tags = jnp.pad(labels.astype(jnp.int32), ((0, pad_b), (0, 0)))
    maskf = jnp.pad(attention_mask.astype(jnp.float32), ((0, pad_b), (0, 0)))
    tags_blk = jnp.transpose(tags.reshape(nblk, Bb, S), (0, 2, 1))     # (nblk, S, Bb)
    mask_blk = jnp.transpose(maskf.reshape(nblk, Bb, S), (0, 2, 1))
    # indicator of each sequence's last valid step (left-aligned mask, as torchcrf assumes)
    mnext = jnp.concatenate([mask_blk[:, 1:, :], jnp.zeros((nblk, 1, Bb), jnp.float32)], axis=1)
    last_blk = mask_blk * (1.0 - mnext)

    col = lambda v: v.reshape(T, 1).astype(jnp.float32)
    wt = params["w"].T.astype(jnp.float32)                 # (T, H)
    trans = params["trans"].astype(jnp.float32)            # (T, T) [prev, next]

    kernel = functools.partial(_taskhead_kernel, S, Bb, T, H, 1e-5)
    llh, path = pl.pallas_call(
        kernel,
        grid=(nblk,),
        in_specs=[
            pl.BlockSpec((None, H, S * Bb), lambda i: (i, 0, 0)),   # x  (H, S*Bb) per block
            pl.BlockSpec((T, H), lambda i: (0, 0)),                 # W^T
            pl.BlockSpec((T, 1), lambda i: (0, 0)),                 # bias
            pl.BlockSpec((T, 1), lambda i: (0, 0)),                 # gamma
            pl.BlockSpec((T, 1), lambda i: (0, 0)),                 # beta
            pl.BlockSpec((T, 1), lambda i: (0, 0)),                 # start
            pl.BlockSpec((T, 1), lambda i: (0, 0)),                 # end
            pl.BlockSpec((T, T), lambda i: (0, 0)),                 # trans [prev, next]
            pl.BlockSpec((T, T), lambda i: (0, 0)),                 # trans^T [next, prev]
            pl.BlockSpec((T * T, 1), lambda i: (0, 0)),             # trans flat
            pl.BlockSpec((None, S, Bb), lambda i: (i, 0, 0)),       # tags
            pl.BlockSpec((None, S, Bb), lambda i: (i, 0, 0)),       # mask
            pl.BlockSpec((None, S, Bb), lambda i: (i, 0, 0)),       # last-step indicator
        ],
        out_specs=[
            pl.BlockSpec((None, 1, Bb), lambda i: (i, 0, 0)),       # per-example llh
            pl.BlockSpec((None, S, Bb), lambda i: (i, 0, 0)),       # decoded path (time-major)
        ],
        out_shape=[
            jax.ShapeDtypeStruct((nblk, 1, Bb), jnp.float32),
            jax.ShapeDtypeStruct((nblk, S, Bb), jnp.int32),
        ],
        scratch_shapes=[
            pltpu.VMEM((T, S * Bb), jnp.float32),                   # emissions
            pltpu.VMEM((max(S - 1, 1), T, Bb), jnp.int32),          # Viterbi history
        ],
        compiler_params=pltpu.CompilerParams(
            dimension_semantics=("parallel",),                      # batch blocks -> 2 TCs on v7x
        ),
    )(x_blk, wt, col(params["b"]), col(params["gamma"]), col(params["beta"]),
      col(params["start"]), col(params["end"]),
      trans, trans.T, trans.reshape(T * T, 1),
      tags_blk, mask_blk, last_blk)

    loss = -jnp.sum(llh.reshape(Bp)[:B])                   # torchcrf default reduction='sum'
    path = jnp.transpose(path, (0, 2, 1)).reshape(Bp, S)[:B]
    # TODO(synk): PyTorch returns path as int64 (torch.long); we emit int32.
    return loss, path


def init_params(key, n_labels, hidden=32):
    T = n_labels + 1
    ks = jax.random.split(key, 5)
    return {
        "w": 0.1 * jax.random.normal(ks[0], (hidden, T), jnp.float32),
        "b": 0.1 * jax.random.normal(ks[1], (T,), jnp.float32),
        "gamma": jnp.ones((T,), jnp.float32),          # LayerNorm default init
        "beta": jnp.zeros((T,), jnp.float32),
        "start": jax.random.uniform(ks[2], (T,), jnp.float32, -0.1, 0.1),
        "end": jax.random.uniform(ks[3], (T,), jnp.float32, -0.1, 0.1),
        "trans": jax.random.uniform(ks[4], (T, T), jnp.float32, -0.1, 0.1),
    }


if __name__ == "__main__":
    B, S, H = 2, 8, 32
    n_labels = 4
    T = n_labels + 1

    key = jax.random.PRNGKey(0)
    k_x, k_l, k_p = jax.random.split(key, 3)

    x = jax.random.normal(k_x, (B, S, H), jnp.float32)
    labels = jax.random.randint(k_l, (B, S), 0, T, jnp.int32)
    # attention mask: first timestep must be valid (CRF requirement); ragged lengths
    lengths = jnp.array([S, S - 2], jnp.int32)
    attention_mask = (jnp.arange(S)[None, :] < lengths[:, None]).astype(jnp.int32)

    params = init_params(k_p, n_labels, H)

    loss, path = task_head_forward(params, x, labels, attention_mask)
    loss = jax.block_until_ready(loss)
    path = jax.block_until_ready(path)

    assert path.shape == (B, S)
    assert bool(jnp.isfinite(loss))
    print("KERNEL_OK")
</pallas_src>

<mosaic_0001>
module attributes {stable_mosaic.version = 11 : i64} {
  func.func @_taskhead_kernel(%arg0: i32, %arg1: memref<1x32x1024xf32, #tpu.memory_space<vmem>>, %arg2: memref<5x32xf32, #tpu.memory_space<vmem>>, %arg3: memref<5x1xf32, #tpu.memory_space<vmem>>, %arg4: memref<5x1xf32, #tpu.memory_space<vmem>>, %arg5: memref<5x1xf32, #tpu.memory_space<vmem>>, %arg6: memref<5x1xf32, #tpu.memory_space<vmem>>, %arg7: memref<5x1xf32, #tpu.memory_space<vmem>>, %arg8: memref<5x5xf32, #tpu.memory_space<vmem>>, %arg9: memref<5x5xf32, #tpu.memory_space<vmem>>, %arg10: memref<25x1xf32, #tpu.memory_space<vmem>>, %arg11: memref<1x8x128xi32, #tpu.memory_space<vmem>>, %arg12: memref<1x8x128xf32, #tpu.memory_space<vmem>>, %arg13: memref<1x8x128xf32, #tpu.memory_space<vmem>>, %arg14: memref<1x1x128xf32, #tpu.memory_space<vmem>>, %arg15: memref<1x8x128xi32, #tpu.memory_space<vmem>>, %arg16: memref<5x1024xf32, #tpu.memory_space<vmem>>, %arg17: memref<7x5x128xi32, #tpu.memory_space<vmem>>) attributes {dimension_semantics = [#tpu.dimension_semantics<parallel>], iteration_bounds = array<i64: 1>, scalar_prefetch = 0 : i64, scratch_operands = 2 : i64, tpu.core_type = #tpu.core_type<tc>, window_params = [{transform_indices = @transform_0, window_bounds = array<i64: 1, 32, 1024>}, {pipeline_mode = #tpu.pipeline_mode<synchronous>, transform_indices = @transform_1, window_bounds = array<i64: 5, 32>}, {pipeline_mode = #tpu.pipeline_mode<synchronous>, transform_indices = @transform_2, window_bounds = array<i64: 5, 1>}, {pipeline_mode = #tpu.pipeline_mode<synchronous>, transform_indices = @transform_3, window_bounds = array<i64: 5, 1>}, {pipeline_mode = #tpu.pipeline_mode<synchronous>, transform_indices = @transform_4, window_bounds = array<i64: 5, 1>}, {pipeline_mode = #tpu.pipeline_mode<synchronous>, transform_indices = @transform_5, window_bounds = array<i64: 5, 1>}, {pipeline_mode = #tpu.pipeline_mode<synchronous>, transform_indices = @transform_6, window_bounds = array<i64: 5, 1>}, {pipeline_mode = #tpu.pipeline_mode<synchronous>, transform_indices = @transform_7, window_bounds = array<i64: 5, 5>}, {pipeline_mode = #tpu.pipeline_mode<synchronous>, transform_indices = @transform_8, window_bounds = array<i64: 5, 5>}, {pipeline_mode = #tpu.pipeline_mode<synchronous>, transform_indices = @transform_9, window_bounds = array<i64: 25, 1>}, {transform_indices = @transform_10, window_bounds = array<i64: 1, 8, 128>}, {transform_indices = @transform_11, window_bounds = array<i64: 1, 8, 128>}, {transform_indices = @transform_12, window_bounds = array<i64: 1, 8, 128>}, {transform_indices = @transform_13, window_bounds = array<i64: 1, 1, 128>}, {transform_indices = @transform_14, window_bounds = array<i64: 1, 8, 128>}]} {
    %c0 = arith.constant 0 : index
    %c0_0 = arith.constant 0 : index
    %0 = vector.load %arg2[%c0, %c0_0] : memref<5x32xf32, #tpu.memory_space<vmem>>, vector<5x32xf32>
    %c0_1 = arith.constant 0 : index
    %c0_2 = arith.constant 0 : index
    %c0_3 = arith.constant 0 : index
    %1 = vector.load %arg1[%c0_1, %c0_2, %c0_3] : memref<1x32x1024xf32, #tpu.memory_space<vmem>>, vector<1x32x1024xf32>
    %2 = vector.shape_cast %1 : vector<1x32x1024xf32> to vector<32x1024xf32>
    %cst = arith.constant dense<0.000000e+00> : vector<5x1024xf32>
    %3 = tpu.matmul %0, %2, %cst {dimension_numbers = #tpu.dot_dimension_numbers<[1], [0], [0], [1], [0, 0, 1, 1], [], []>} : vector<5x32xf32>, vector<32x1024xf32>, vector<5x1024xf32> -> vector<5x1024xf32>
    %c0_4 = arith.constant 0 : index
    %c0_5 = arith.constant 0 : index
    %4 = vector.load %arg3[%c0_4, %c0_5] : memref<5x1xf32, #tpu.memory_space<vmem>>, vector<5x1xf32>
    %5 = vector.broadcast %4 : vector<5x1xf32> to vector<5x1024xf32>
    %6 = arith.addf %3, %5 : vector<5x1024xf32>
    %cst_6 = arith.constant dense<0.000000e+00> : vector<1024xf32>
    %7 = vector.multi_reduction <add>, %6, %cst_6 [0] : vector<5x1024xf32> to vector<1024xf32>
    %8 = vector.shape_cast %7 : vector<1024xf32> to vector<1x1024xf32>
    %cst_7 = arith.constant 5.000000e+00 : f32
    %9 = vector.broadcast %cst_7 : f32 to vector<1x1024xf32>
    %10 = arith.divf %8, %9 : vector<1x1024xf32>
    %11 = vector.broadcast %10 : vector<1x1024xf32> to vector<5x1024xf32>
    %12 = arith.subf %6, %11 : vector<5x1024xf32>
    %13 = vector.broadcast %10 : vector<1x1024xf32> to vector<5x1024xf32>
    %14 = arith.subf %6, %13 : vector<5x1024xf32>
    %15 = arith.mulf %12, %14 : vector<5x1024xf32>
    %cst_8 = arith.constant dense<0.000000e+00> : vector<1024xf32>
    %16 = vector.multi_reduction <add>, %15, %cst_8 [0] : vector<5x1024xf32> to vector<1024xf32>
    %17 = vector.shape_cast %16 : vector<1024xf32> to vector<1x1024xf32>
    %cst_9 = arith.constant 5.000000e+00 : f32
    %18 = vector.broadcast %cst_9 : f32 to vector<1x1024xf32>
    %19 = arith.divf %17, %18 : vector<1x1024xf32>
    %20 = vector.broadcast %10 : vector<1x1024xf32> to vector<5x1024xf32>
    %21 = arith.subf %6, %20 : vector<5x1024xf32>
    %cst_10 = arith.constant 9.99999974E-6 : f32
    %22 = vector.broadcast %cst_10 : f32 to vector<1x1024xf32>
    %23 = arith.addf %19, %22 : vector<1x1024xf32>
    %24 = math.rsqrt %23 : vector<1x1024xf32>
    %25 = vector.broadcast %24 : vector<1x1024xf32> to vector<5x1024xf32>
    %26 = arith.mulf %21, %25 : vector<5x1024xf32>
    %c0_11 = arith.constant 0 : index
    %c0_12 = arith.constant 0 : index
    %27 = vector.load %arg4[%c0_11, %c0_12] : memref<5x1xf32, #tpu.memory_space<vmem>>, vector<5x1xf32>
    %28 = vector.broadcast %27 : vector<5x1xf32> to vector<5x1024xf32>
    %29 = arith.mulf %26, %28 : vector<5x1024xf32>
    %c0_13 = arith.constant 0 : index
    %c0_14 = arith.constant 0 : index
    %30 = vector.load %arg5[%c0_13, %c0_14] : memref<5x1xf32, #tpu.memory_space<vmem>>, vector<5x1xf32>
    %31 = vector.broadcast %30 : vector<5x1xf32> to vector<5x1024xf32>
    %32 = arith.addf %29, %31 : vector<5x1024xf32>
    %c0_15 = arith.constant 0 : index
    %c0_16 = arith.constant 0 : index
    %33 = vector.load %arg16[%c0_15, %c0_16] : memref<5x1024xf32, #tpu.memory_space<vmem>>, vector<5x1024xf32>
    tpu.vector_store %arg16[%c0_15, %c0_16], %32 {strides = array<i32>} : memref<5x1024xf32, #tpu.memory_space<vmem>>, vector<5x1024xf32>,
    %c0_17 = arith.constant 0 : index
    %c0_18 = arith.constant 0 : index
    %34 = vector.load %arg6[%c0_17, %c0_18] : memref<5x1xf32, #tpu.memory_space<vmem>>, vector<5x1xf32>
    %c0_19 = arith.constant 0 : index
    %c0_20 = arith.constant 0 : index
    %35 = vector.load %arg7[%c0_19, %c0_20] : memref<5x1xf32, #tpu.memory_space<vmem>>, vector<5x1xf32>
    %c0_21 = arith.constant 0 : index
    %c0_22 = arith.constant 0 : index
    %36 = vector.load %arg8[%c0_21, %c0_22] : memref<5x5xf32, #tpu.memory_space<vmem>>, vector<5x5xf32>
    %c0_23 = arith.constant 0 : index
    %c0_24 = arith.constant 0 : index
    %37 = vector.load %arg9[%c0_23, %c0_24] : memref<5x5xf32, #tpu.memory_space<vmem>>, vector<5x5xf32>
    %c0_25 = arith.constant 0 : index
    %c0_26 = arith.constant 0 : index
    %38 = vector.load %arg10[%c0_25, %c0_26] : memref<25x1xf32, #tpu.memory_space<vmem>>, vector<25x1xf32>
    %39 = tpu.iota {dimensions = array<i32: 0>} : vector<5x128xi32>
    %40 = tpu.iota {dimensions = array<i32: 0>} : vector<25x128xi32>
    %c0_i32 = arith.constant 0 : i32
    %41 = tpu.assume_multiple %c0_i32, 128 : i32
    %c0_27 = arith.constant 0 : index
    %42 = arith.index_cast %41 : i32 to index
    %43 = vector.load %arg16[%c0_27, %42] : memref<5x1024xf32, #tpu.memory_space<vmem>>, vector<5x128xf32>
    %c0_28 = arith.constant 0 : index
    %c0_29 = arith.constant 0 : index
    %c0_30 = arith.constant 0 : index
    %44 = vector.load %arg11[%c0_28, %c0_29, %c0_30] : memref<1x8x128xi32, #tpu.memory_space<vmem>>, vector<1x1x128xi32>
    %45 = vector.shape_cast %44 : vector<1x1x128xi32> to vector<1x128xi32>
    %46 = vector.broadcast %45 : vector<1x128xi32> to vector<5x128xi32>
    %47 = arith.cmpi eq, %39, %46 : vector<5x128xi32>
    %48 = arith.extui %47 : vector<5x128xi1> to vector<5x128xi32>
    %49 = arith.sitofp %48 : vector<5x128xi32> to vector<5x128xf32>
    %50 = vector.broadcast %34 : vector<5x1xf32> to vector<5x128xf32>
    %51 = arith.addf %50, %43 : vector<5x128xf32>
    %52 = arith.mulf %49, %51 : vector<5x128xf32>
    %cst_31 = arith.constant dense<0.000000e+00> : vector<128xf32>
    %53 = vector.multi_reduction <add>, %52, %cst_31 [0] : vector<5x128xf32> to vector<128xf32>
    %54 = vector.shape_cast %53 : vector<128xf32> to vector<1x128xf32>
    %c0_32 = arith.constant 0 : index
    %c0_33 = arith.constant 0 : index
    %c0_34 = arith.constant 0 : index
    %55 = vector.load %arg13[%c0_32, %c0_33, %c0_34] : memref<1x8x128xf32, #tpu.memory_space<vmem>>, vector<1x1x128xf32>
    %56 = vector.shape_cast %55 : vector<1x1x128xf32> to vector<1x128xf32>
    %57 = vector.broadcast %56 : vector<1x128xf32> to vector<5x128xf32>
    %58 = arith.mulf %49, %57 : vector<5x128xf32>
    %59 = vector.broadcast %34 : vector<5x1xf32> to vector<5x128xf32>
    %60 = arith.addf %59, %43 : vector<5x128xf32>
    %c1_i32 = arith.constant 1 : i32
    %c128_i32 = arith.constant 128 : i32
    %61 = arith.muli %c1_i32, %c128_i32 : i32
    %62 = tpu.assume_multiple %61, 128 : i32
    %c0_35 = arith.constant 0 : index
    %63 = arith.index_cast %62 : i32 to index
    %64 = vector.load %arg16[%c0_35, %63] : memref<5x1024xf32, #tpu.memory_space<vmem>>, vector<5x128xf32>
    %c0_36 = arith.constant 0 : index
    %65 = arith.index_cast %c1_i32 : i32 to index
    %c0_37 = arith.constant 0 : index
    %66 = vector.load %arg11[%c0_36, %65, %c0_37] : memref<1x8x128xi32, #tpu.memory_space<vmem>>, vector<1x1x128xi32>
    %67 = vector.shape_cast %66 : vector<1x1x128xi32> to vector<1x128xi32>
    %c0_38 = arith.constant 0 : index
    %68 = arith.index_cast %c1_i32 : i32 to index
    %c0_39 = arith.constant 0 : index
    %69 = vector.load %arg12[%c0_38, %68, %c0_39] : memref<1x8x128xf32, #tpu.memory_space<vmem>>, vector<1x1x128xf32>
    %70 = vector.shape_cast %69 : vector<1x1x128xf32> to vector<1x128xf32>
    %71 = vector.broadcast %67 : vector<1x128xi32> to vector<5x128xi32>
    %72 = arith.cmpi eq, %39, %71 : vector<5x128xi32>
    %73 = arith.extui %72 : vector<5x128xi1> to vector<5x128xi32>
    %74 = arith.sitofp %73 : vector<5x128xi32> to vector<5x128xf32>
    %75 = arith.mulf %74, %64 : vector<5x128xf32>
    %cst_40 = arith.constant dense<0.000000e+00> : vector<128xf32>
    %76 = vector.multi_reduction <add>, %75, %cst_40 [0] : vector<5x128xf32> to vector<128xf32>
    %77 = vector.shape_cast %76 : vector<128xf32> to vector<1x128xf32>
    %c5_i32 = arith.constant 5 : i32
    %78 = vector.broadcast %c5_i32 : i32 to vector<1x128xi32>
    %79 = arith.muli %45, %78 : vector<1x128xi32>
    %80 = arith.addi %79, %67 : vector<1x128xi32>
    %81 = vector.broadcast %80 : vector<1x128xi32> to vector<25x128xi32>
    %82 = arith.cmpi eq, %40, %81 : vector<25x128xi32>
    %83 = arith.extui %82 : vector<25x128xi1> to vector<25x128xi32>
    %84 = arith.sitofp %83 : vector<25x128xi32> to vector<25x128xf32>
    %85 = vector.broadcast %38 : vector<25x1xf32> to vector<25x128xf32>
    %86 = arith.mulf %84, %85 : vector<25x128xf32>
    %cst_41 = arith.constant dense<0.000000e+00> : vector<128xf32>
    %87 = vector.multi_reduction <add>, %86, %cst_41 [0] : vector<25x128xf32> to vector<128xf32>
    %88 = vector.shape_cast %87 : vector<128xf32> to vector<1x128xf32>
    %89 = arith.addf %77, %88 : vector<1x128xf32>
    %90 = arith.mulf %70, %89 : vector<1x128xf32>
    %91 = arith.addf %54, %90 : vector<1x128xf32>
    %c0_42 = arith.constant 0 : index
    %92 = arith.index_cast %c1_i32 : i32 to index
    %c0_43 = arith.constant 0 : index
    %93 = vector.load %arg13[%c0_42, %92, %c0_43] : memref<1x8x128xf32, #tpu.memory_space<vmem>>, vector<1x1x128xf32>
    %94 = vector.shape_cast %93 : vector<1x1x128xf32> to vector<1x128xf32>
    %95 = vector.broadcast %94 : vector<1x128xf32> to vector<5x128xf32>
    %96 = arith.mulf %74, %95 : vector<5x128xf32>
    %97 = arith.addf %58, %96 : vector<5x128xf32>
    %98 = vector.shape_cast %60 : vector<5x128xf32> to vector<5x1x128xf32>
    %99 = vector.shape_cast %36 : vector<5x5xf32> to vector<5x5x1xf32>
    %100 = vector.broadcast %98 : vector<5x1x128xf32> to vector<5x5x128xf32>
    %101 = vector.broadcast %99 : vector<5x5x1xf32> to vector<5x5x128xf32>
    %102 = arith.addf %100, %101 : vector<5x5x128xf32>
    %cst_44 = arith.constant dense<0xFF800000> : vector<5x128xf32>
    %103 = vector.multi_reduction <maximumf>, %102, %cst_44 [0] : vector<5x5x128xf32> to vector<5x128xf32>
    %104 = vector.shape_cast %103 : vector<5x128xf32> to vector<1x5x128xf32>
    %105 = vector.broadcast %104 : vector<1x5x128xf32> to vector<5x5x128xf32>
    %106 = arith.subf %102, %105 : vector<5x5x128xf32>
    %107 = math.exp %106 : vector<5x5x128xf32>
    %cst_45 = arith.constant dense<0.000000e+00> : vector<5x128xf32>
    %108 = vector.multi_reduction <add>, %107, %cst_45 [0] : vector<5x5x128xf32> to vector<5x128xf32>
    %109 = math.log %108 : vector<5x128xf32>
    %110 = arith.addf %109, %103 : vector<5x128xf32>
    %111 = arith.addf %110, %64 : vector<5x128xf32>
    %112 = vector.broadcast %70 : vector<1x128xf32> to vector<5x128xf32>
    %113 = arith.mulf %112, %111 : vector<5x128xf32>
    %cst_46 = arith.constant 1.000000e+00 : f32
    %114 = vector.broadcast %cst_46 : f32 to vector<1x128xf32>
    %115 = arith.subf %114, %70 : vector<1x128xf32>
    %116 = vector.broadcast %115 : vector<1x128xf32> to vector<5x128xf32>
    %117 = arith.mulf %116, %60 : vector<5x128xf32>
    %118 = arith.addf %113, %117 : vector<5x128xf32>
    %c2_i32 = arith.constant 2 : i32
    %c128_i32_47 = arith.constant 128 : i32
    %119 = arith.muli %c2_i32, %c128_i32_47 : i32
    %120 = tpu.assume_multiple %119, 128 : i32
    %c0_48 = arith.constant 0 : index
    %121 = arith.index_cast %120 : i32 to index
    %122 = vector.load %arg16[%c0_48, %121] : memref<5x1024xf32, #tpu.memory_space<vmem>>, vector<5x128xf32>
    %c0_49 = arith.constant 0 : index
    %123 = arith.index_cast %c2_i32 : i32 to index
    %c0_50 = arith.constant 0 : index
    %124 = vector.load %arg11[%c0_49, %123, %c0_50] : memref<1x8x128xi32, #tpu.memory_space<vmem>>, vector<1x1x128xi32>
    %125 = vector.shape_cast %124 : vector<1x1x128xi32> to vector<1x128xi32>
    %c0_51 = arith.constant 0 : index
    %126 = arith.index_cast %c2_i32 : i32 to index
    %c0_52 = arith.constant 0 : index
    %127 = vector.load %arg12[%c0_51, %126, %c0_52] : memref<1x8x128xf32, #tpu.memory_space<vmem>>, vector<1x1x128xf32>
    %128 = vector.shape_cast %127 : vector<1x1x128xf32> to vector<1x128xf32>
    %129 = vector.broadcast %125 : vector<1x128xi32> to vector<5x128xi32>
    %130 = arith.cmpi eq, %39, %129 : vector<5x128xi32>
    %131 = arith.extui %130 : vector<5x128xi1> to vector<5x128xi32>
    %132 = arith.sitofp %131 : vector<5x128xi32> to vector<5x128xf32>
    %133 = arith.mulf %132, %122 : vector<5x128xf32>
    %cst_53 = arith.constant dense<0.000000e+00> : vector<128xf32>
    %134 = vector.multi_reduction <add>, %133, %cst_53 [0] : vector<5x128xf32> to vector<128xf32>
    %135 = vector.shape_cast %134 : vector<128xf32> to vector<1x128xf32>
    %c5_i32_54 = arith.constant 5 : i32
    %136 = vector.broadcast %c5_i32_54 : i32 to vector<1x128xi32>
    %137 = arith.muli %67, %136 : vector<1x128xi32>
    %138 = arith.addi %137, %125 : vector<1x128xi32>
    %139 = vector.broadcast %138 : vector<1x128xi32> to vector<25x128xi32>
    %140 = arith.cmpi eq, %40, %139 : vector<25x128xi32>
    %141 = arith.extui %140 : vector<25x128xi1> to vector<25x128xi32>
    %142 = arith.sitofp %141 : vector<25x128xi32> to vector<25x128xf32>
    %143 = vector.broadcast %38 : vector<25x1xf32> to vector<25x128xf32>
    %144 = arith.mulf %142, %143 : vector<25x128xf32>
    %cst_55 = arith.constant dense<0.000000e+00> : vector<128xf32>
    %145 = vector.multi_reduction <add>, %144, %cst_55 [0] : vector<25x128xf32> to vector<128xf32>
    %146 = vector.shape_cast %145 : vector<128xf32> to vector<1x128xf32>
    %147 = arith.addf %135, %146 : vector<1x128xf32>
    %148 = arith.mulf %128, %147 : vector<1x128xf32>
    %149 = arith.addf %91, %148 : vector<1x128xf32>
    %c0_56 = arith.constant 0 : index
    %150 = arith.index_cast %c2_i32 : i32 to index
    %c0_57 = arith.constant 0 : index
    %151 = vector.load %arg13[%c0_56, %150, %c0_57] : memref<1x8x128xf32, #tpu.memory_space<vmem>>, vector<1x1x128xf32>
    %152 = vector.shape_cast %151 : vector<1x1x128xf32> to vector<1x128xf32>
    %153 = vector.broadcast %152 : vector<1x128xf32> to vector<5x128xf32>
    %154 = arith.mulf %132, %153 : vector<5x128xf32>
    %155 = arith.addf %97, %154 : vector<5x128xf32>
    %156 = vector.shape_cast %118 : vector<5x128xf32> to vector<5x1x128xf32>
    %157 = vector.shape_cast %36 : vector<5x5xf32> to vector<5x5x1xf32>
    %158 = vector.broadcast %156 : vector<5x1x128xf32> to vector<5x5x128xf32>
    %159 = vector.broadcast %157 : vector<5x5x1xf32> to vector<5x5x128xf32>
    %160 = arith.addf %158, %159 : vector<5x5x128xf32>
    %cst_58 = arith.constant dense<0xFF800000> : vector<5x128xf32>
    %161 = vector.multi_reduction <maximumf>, %160, %cst_58 [0] : vector<5x5x128xf32> to vector<5x128xf32>
    %162 = vector.shape_cast %161 : vector<5x128xf32> to vector<1x5x128xf32>
    %163 = vector.broadcast %162 : vector<1x5x128xf32> to vector<5x5x128xf32>
    %164 = arith.subf %160, %163 : vector<5x5x128xf32>
    %165 = math.exp %164 : vector<5x5x128xf32>
    %cst_59 = arith.constant dense<0.000000e+00> : vector<5x128xf32>
    %166 = vector.multi_reduction <add>, %165, %cst_59 [0] : vector<5x5x128xf32> to vector<5x128xf32>
    %167 = math.log %166 : vector<5x128xf32>
    %168 = arith.addf %167, %161 : vector<5x128xf32>
    %169 = arith.addf %168, %122 : vector<5x128xf32>
    %170 = vector.broadcast %128 : vector<1x128xf32> to vector<5x128xf32>
    %171 = arith.mulf %170, %169 : vector<5x128xf32>
    %cst_60 = arith.constant 1.000000e+00 : f32
    %172 = vector.broadcast %cst_60 : f32 to vector<1x128xf32>
    %173 = arith.subf %172, %128 : vector<1x128xf32>
    %174 = vector.broadcast %173 : vector<1x128xf32> to vector<5x128xf32>
    %175 = arith.mulf %174, %118 : vector<5x128xf32>
    %176 = arith.addf %171, %175 : vector<5x128xf32>
    %c3_i32 = arith.constant 3 : i32
    %c128_i32_61 = arith.constant 128 : i32
    %177 = arith.muli %c3_i32, %c128_i32_61 : i32
    %178 = tpu.assume_multiple %177, 128 : i32
    %c0_62 = arith.constant 0 : index
    %179 = arith.index_cast %178 : i32 to index
    %180 = vector.load %arg16[%c0_62, %179] : memref<5x1024xf32, #tpu.memory_space<vmem>>, vector<5x128xf32>
    %c0_63 = arith.constant 0 : index
    %181 = arith.index_cast %c3_i32 : i32 to index
    %c0_64 = arith.constant 0 : index
    %182 = vector.load %arg11[%c0_63, %181, %c0_64] : memref<1x8x128xi32, #tpu.memory_space<vmem>>, vector<1x1x128xi32>
    %183 = vector.shape_cast %182 : vector<1x1x128xi32> to vector<1x128xi32>
    %c0_65 = arith.constant 0 : index
    %184 = arith.index_cast %c3_i32 : i32 to index
    %c0_66 = arith.constant 0 : index
    %185 = vector.load %arg12[%c0_65, %184, %c0_66] : memref<1x8x128xf32, #tpu.memory_space<vmem>>, vector<1x1x128xf32>
    %186 = vector.shape_cast %185 : vector<1x1x128xf32> to vector<1x128xf32>
    %187 = vector.broadcast %183 : vector<1x128xi32> to vector<5x128xi32>
    %188 = arith.cmpi eq, %39, %187 : vector<5x128xi32>
    %189 = arith.extui %188 : vector<5x128xi1> to vector<5x128xi32>
    %190 = arith.sitofp %189 : vector<5x128xi32> to vector<5x128xf32>
    %191 = arith.mulf %190, %180 : vector<5x128xf32>
    %cst_67 = arith.constant dense<0.000000e+00> : vector<128xf32>
    %192 = vector.multi_reduction <add>, %191, %cst_67 [0] : vector<5x128xf32> to vector<128xf32>
    %193 = vector.shape_cast %192 : vector<128xf32> to vector<1x128xf32>
    %c5_i32_68 = arith.constant 5 : i32
    %194 = vector.broadcast %c5_i32_68 : i32 to vector<1x128xi32>
    %195 = arith.muli %125, %194 : vector<1x128xi32>
    %196 = arith.addi %195, %183 : vector<1x128xi32>
    %197 = vector.broadcast %196 : vector<1x128xi32> to vector<25x128xi32>
    %198 = arith.cmpi eq, %40, %197 : vector<25x128xi32>
    %199 = arith.extui %198 : vector<25x128xi1> to vector<25x128xi32>
    %200 = arith.sitofp %199 : vector<25x128xi32> to vector<25x128xf32>
    %201 = vector.broadcast %38 : vector<25x1xf32> to vector<25x128xf32>
    %202 = arith.mulf %200, %201 : vector<25x128xf32>
    %cst_69 = arith.constant dense<0.000000e+00> : vector<128xf32>
    %203 = vector.multi_reduction <add>, %202, %cst_69 [0] : vector<25x128xf32> to vector<128xf32>
    %204 = vector.shape_cast %203 : vector<128xf32> to vector<1x128xf32>
    %205 = arith.addf %193, %204 : vector<1x128xf32>
    %206 = arith.mulf %186, %205 : vector<1x128xf32>
    %207 = arith.addf %149, %206 : vector<1x128xf32>
    %c0_70 = arith.constant 0 : index
    %208 = arith.index_cast %c3_i32 : i32 to index
    %c0_71 = arith.constant 0 : index
    %209 = vector.load %arg13[%c0_70, %208, %c0_71] : memref<1x8x128xf32, #tpu.memory_space<vmem>>, vector<1x1x128xf32>
    %210 = vector.shape_cast %209 : vector<1x1x128xf32> to vector<1x128xf32>
    %211 = vector.broadcast %210 : vector<1x128xf32> to vector<5x128xf32>
    %212 = arith.mulf %190, %211 : vector<5x128xf32>
    %213 = arith.addf %155, %212 : vector<5x128xf32>
    %214 = vector.shape_cast %176 : vector<5x128xf32> to vector<5x1x128xf32>
    %215 = vector.shape_cast %36 : vector<5x5xf32> to vector<5x5x1xf32>
    %216 = vector.broadcast %214 : vector<5x1x128xf32> to vector<5x5x128xf32>
    %217 = vector.broadcast %215 : vector<5x5x1xf32> to vector<5x5x128xf32>
    %218 = arith.addf %216, %217 : vector<5x5x128xf32>
    %cst_72 = arith.constant dense<0xFF800000> : vector<5x128xf32>
    %219 = vector.multi_reduction <maximumf>, %218, %cst_72 [0] : vector<5x5x128xf32> to vector<5x128xf32>
    %220 = vector.shape_cast %219 : vector<5x128xf32> to vector<1x5x128xf32>
    %221 = vector.broadcast %220 : vector<1x5x128xf32> to vector<5x5x128xf32>
    %222 = arith.subf %218, %221 : vector<5x5x128xf32>
    %223 = math.exp %222 : vector<5x5x128xf32>
    %cst_73 = arith.constant dense<0.000000e+00> : vector<5x128xf32>
    %224 = vector.multi_reduction <add>, %223, %cst_73 [0] : vector<5x5x128xf32> to vector<5x128xf32>
    %225 = math.log %224 : vector<5x128xf32>
    %226 = arith.addf %225, %219 : vector<5x128xf32>
    %227 = arith.addf %226, %180 : vector<5x128xf32>
    %228 = vector.broadcast %186 : vector<1x128xf32> to vector<5x128xf32>
    %229 = arith.mulf %228, %227 : vector<5x128xf32>
    %cst_74 = arith.constant 1.000000e+00 : f32
    %230 = vector.broadcast %cst_74 : f32 to vector<1x128xf32>
    %231 = arith.subf %230, %186 : vector<1x128xf32>
    %232 = vector.broadcast %231 : vector<1x128xf32> to vector<5x128xf32>
    %233 = arith.mulf %232, %176 : vector<5x128xf32>
    %234 = arith.addf %229, %233 : vector<5x128xf32>
    %c4_i32 = arith.constant 4 : i32
    %c128_i32_75 = arith.constant 128 : i32
    %235 = arith.muli %c4_i32, %c128_i32_75 : i32
    %236 = tpu.assume_multiple %235, 128 : i32
    %c0_76 = arith.constant 0 : index
    %237 = arith.index_cast %236 : i32 to index
    %238 = vector.load %arg16[%c0_76, %237] : memref<5x1024xf32, #tpu.memory_space<vmem>>, vector<5x128xf32>
    %c0_77 = arith.constant 0 : index
    %239 = arith.index_cast %c4_i32 : i32 to index
    %c0_78 = arith.constant 0 : index
    %240 = vector.load %arg11[%c0_77, %239, %c0_78] : memref<1x8x128xi32, #tpu.memory_space<vmem>>, vector<1x1x128xi32>
    %241 = vector.shape_cast %240 : vector<1x1x128xi32> to vector<1x128xi32>
    %c0_79 = arith.constant 0 : index
    %242 = arith.index_cast %c4_i32 : i32 to index
    %c0_80 = arith.constant 0 : index
    %243 = vector.load %arg12[%c0_79, %242, %c0_80] : memref<1x8x128xf32, #tpu.memory_space<vmem>>, vector<1x1x128xf32>
    %244 = vector.shape_cast %243 : vector<1x1x128xf32> to vector<1x128xf32>
    %245 = vector.broadcast %241 : vector<1x128xi32> to vector<5x128xi32>
    %246 = arith.cmpi eq, %39, %245 : vector<5x128xi32>
    %247 = arith.extui %246 : vector<5x128xi1> to vector<5x128xi32>
    %248 = arith.sitofp %247 : vector<5x128xi32> to vector<5x128xf32>
    %249 = arith.mulf %248, %238 : vector<5x128xf32>
    %cst_81 = arith.constant dense<0.000000e+00> : vector<128xf32>
    %250 = vector.multi_reduction <add>, %249, %cst_81 [0] : vector<5x128xf32> to vector<128xf32>
    %251 = vector.shape_cast %250 : vector<128xf32> to vector<1x128xf32>
    %c5_i32_82 = arith.constant 5 : i32
    %252 = vector.broadcast %c5_i32_82 : i32 to vector<1x128xi32>
    %253 = arith.muli %183, %252 : vector<1x128xi32>
    %254 = arith.addi %253, %241 : vector<1x128xi32>
    %255 = vector.broadcast %254 : vector<1x128xi32> to vector<25x128xi32>
    %256 = arith.cmpi eq, %40, %255 : vector<25x128xi32>
    %257 = arith.extui %256 : vector<25x128xi1> to vector<25x128xi32>
    %258 = arith.sitofp %257 : vector<25x128xi32> to vector<25x128xf32>
    %259 = vector.broadcast %38 : vector<25x1xf32> to vector<25x128xf32>
    %260 = arith.mulf %258, %259 : vector<25x128xf32>
    %cst_83 = arith.constant dense<0.000000e+00> : vector<128xf32>
    %261 = vector.multi_reduction <add>, %260, %cst_83 [0] : vector<25x128xf32> to vector<128xf32>
    %262 = vector.shape_cast %261 : vector<128xf32> to vector<1x128xf32>
    %263 = arith.addf %251, %262 : vector<1x128xf32>
    %264 = arith.mulf %244, %263 : vector<1x128xf32>
    %265 = arith.addf %207, %264 : vector<1x128xf32>
    %c0_84 = arith.constant 0 : index
    %266 = arith.index_cast %c4_i32 : i32 to index
    %c0_85 = arith.constant 0 : index
    %267 = vector.load %arg13[%c0_84, %266, %c0_85] : memref<1x8x128xf32, #tpu.memory_space<vmem>>, vector<1x1x128xf32>
    %268 = vector.shape_cast %267 : vector<1x1x128xf32> to vector<1x128xf32>
    %269 = vector.broadcast %268 : vector<1x128xf32> to vector<5x128xf32>
    %270 = arith.mulf %248, %269 : vector<5x128xf32>
    %271 = arith.addf %213, %270 : vector<5x128xf32>
    %272 = vector.shape_cast %234 : vector<5x128xf32> to vector<5x1x128xf32>
    %273 = vector.shape_cast %36 : vector<5x5xf32> to vector<5x5x1xf32>
    %274 = vector.broadcast %272 : vector<5x1x128xf32> to vector<5x5x128xf32>
    %275 = vector.broadcast %273 : vector<5x5x1xf32> to vector<5x5x128xf32>
    %276 = arith.addf %274, %275 : vector<5x5x128xf32>
    %cst_86 = arith.constant dense<0xFF800000> : vector<5x128xf32>
    %277 = vector.multi_reduction <maximumf>, %276, %cst_86 [0] : vector<5x5x128xf32> to vector<5x128xf32>
    %278 = vector.shape_cast %277 : vector<5x128xf32> to vector<1x5x128xf32>
    %279 = vector.broadcast %278 : vector<1x5x128xf32> to vector<5x5x128xf32>
    %280 = arith.subf %276, %279 : vector<5x5x128xf32>
    %281 = math.exp %280 : vector<5x5x128xf32>
    %cst_87 = arith.constant dense<0.000000e+00> : vector<5x128xf32>
    %282 = vector.multi_reduction <add>, %281, %cst_87 [0] : vector<5x5x128xf32> to vector<5x128xf32>
    %283 = math.log %282 : vector<5x128xf32>
    %284 = arith.addf %283, %277 : vector<5x128xf32>
    %285 = arith.addf %284, %238 : vector<5x128xf32>
    %286 = vector.broadcast %244 : vector<1x128xf32> to vector<5x128xf32>
    %287 = arith.mulf %286, %285 : vector<5x128xf32>
    %cst_88 = arith.constant 1.000000e+00 : f32
    %288 = vector.broadcast %cst_88 : f32 to vector<1x128xf32>
    %289 = arith.subf %288, %244 : vector<1x128xf32>
    %290 = vector.broadcast %289 : vector<1x128xf32> to vector<5x128xf32>
    %291 = arith.mulf %290, %234 : vector<5x128xf32>
    %292 = arith.addf %287, %291 : vector<5x128xf32>
    %c5_i32_89 = arith.constant 5 : i32
    %c128_i32_90 = arith.constant 128 : i32
    %293 = arith.muli %c5_i32_89, %c128_i32_90 : i32
    %294 = tpu.assume_multiple %293, 128 : i32
    %c0_91 = arith.constant 0 : index
    %295 = arith.index_cast %294 : i32 to index
    %296 = vector.load %arg16[%c0_91, %295] : memref<5x1024xf32, #tpu.memory_space<vmem>>, vector<5x128xf32>
    %c0_92 = arith.constant 0 : index
    %297 = arith.index_cast %c5_i32_89 : i32 to index
    %c0_93 = arith.constant 0 : index
    %298 = vector.load %arg11[%c0_92, %297, %c0_93] : memref<1x8x128xi32, #tpu.memory_space<vmem>>, vector<1x1x128xi32>
    %299 = vector.shape_cast %298 : vector<1x1x128xi32> to vector<1x128xi32>
    %c0_94 = arith.constant 0 : index
    %300 = arith.index_cast %c5_i32_89 : i32 to index
    %c0_95 = arith.constant 0 : index
    %301 = vector.load %arg12[%c0_94, %300, %c0_95] : memref<1x8x128xf32, #tpu.memory_space<vmem>>, vector<1x1x128xf32>
    %302 = vector.shape_cast %301 : vector<1x1x128xf32> to vector<1x128xf32>
    %303 = vector.broadcast %299 : vector<1x128xi32> to vector<5x128xi32>
    %304 = arith.cmpi eq, %39, %303 : vector<5x128xi32>
    %305 = arith.extui %304 : vector<5x128xi1> to vector<5x128xi32>
    %306 = arith.sitofp %305 : vector<5x128xi32> to vector<5x128xf32>
    %307 = arith.mulf %306, %296 : vector<5x128xf32>
    %cst_96 = arith.constant dense<0.000000e+00> : vector<128xf32>
    %308 = vector.multi_reduction <add>, %307, %cst_96 [0] : vector<5x128xf32> to vector<128xf32>
    %309 = vector.shape_cast %308 : vector<128xf32> to vector<1x128xf32>
    %c5_i32_97 = arith.constant 5 : i32
    %310 = vector.broadcast %c5_i32_97 : i32 to vector<1x128xi32>
    %311 = arith.muli %241, %310 : vector<1x128xi32>
    %312 = arith.addi %311, %299 : vector<1x128xi32>
    %313 = vector.broadcast %312 : vector<1x128xi32> to vector<25x128xi32>
    %314 = arith.cmpi eq, %40, %313 : vector<25x128xi32>
    %315 = arith.extui %314 : vector<25x128xi1> to vector<25x128xi32>
    %316 = arith.sitofp %315 : vector<25x128xi32> to vector<25x128xf32>
    %317 = vector.broadcast %38 : vector<25x1xf32> to vector<25x128xf32>
    %318 = arith.mulf %316, %317 : vector<25x128xf32>
    %cst_98 = arith.constant dense<0.000000e+00> : vector<128xf32>
    %319 = vector.multi_reduction <add>, %318, %cst_98 [0] : vector<25x128xf32> to vector<128xf32>
    %320 = vector.shape_cast %319 : vector<128xf32> to vector<1x128xf32>
    %321 = arith.addf %309, %320 : vector<1x128xf32>
    %322 = arith.mulf %302, %321 : vector<1x128xf32>
    %323 = arith.addf %265, %322 : vector<1x128xf32>
    %c0_99 = arith.constant 0 : index
    %324 = arith.index_cast %c5_i32_89 : i32 to index
    %c0_100 = arith.constant 0 : index
    %325 = vector.load %arg13[%c0_99, %324, %c0_100] : memref<1x8x128xf32, #tpu.memory_space<vmem>>, vector<1x1x128xf32>
    %326 = vector.shape_cast %325 : vector<1x1x128xf32> to vector<1x128xf32>
    %327 = vector.broadcast %326 : vector<1x128xf32> to vector<5x128xf32>
    %328 = arith.mulf %306, %327 : vector<5x128xf32>
    %329 = arith.addf %271, %328 : vector<5x128xf32>
    %330 = vector.shape_cast %292 : vector<5x128xf32> to vector<5x1x128xf32>
    %331 = vector.shape_cast %36 : vector<5x5xf32> to vector<5x5x1xf32>
    %332 = vector.broadcast %330 : vector<5x1x128xf32> to vector<5x5x128xf32>
    %333 = vector.broadcast %331 : vector<5x5x1xf32> to vector<5x5x128xf32>
    %334 = arith.addf %332, %333 : vector<5x5x128xf32>
    %cst_101 = arith.constant dense<0xFF800000> : vector<5x128xf32>
    %335 = vector.multi_reduction <maximumf>, %334, %cst_101 [0] : vector<5x5x128xf32> to vector<5x128xf32>
    %336 = vector.shape_cast %335 : vector<5x128xf32> to vector<1x5x128xf32>
    %337 = vector.broadcast %336 : vector<1x5x128xf32> to vector<5x5x128xf32>
    %338 = arith.subf %334, %337 : vector<5x5x128xf32>
    %339 = math.exp %338 : vector<5x5x128xf32>
    %cst_102 = arith.constant dense<0.000000e+00> : vector<5x128xf32>
    %340 = vector.multi_reduction <add>, %339, %cst_102 [0] : vector<5x5x128xf32> to vector<5x128xf32>
    %341 = math.log %340 : vector<5x128xf32>
    %342 = arith.addf %341, %335 : vector<5x128xf32>
    %343 = arith.addf %342, %296 : vector<5x128xf32>
    %344 = vector.broadcast %302 : vector<1x128xf32> to vector<5x128xf32>
    %345 = arith.mulf %344, %343 : vector<5x128xf32>
    %cst_103 = arith.constant 1.000000e+00 : f32
    %346 = vector.broadcast %cst_103 : f32 to vector<1x128xf32>
    %347 = arith.subf %346, %302 : vector<1x128xf32>
    %348 = vector.broadcast %347 : vector<1x128xf32> to vector<5x128xf32>
    %349 = arith.mulf %348, %292 : vector<5x128xf32>
    %350 = arith.addf %345, %349 : vector<5x128xf32>
    %c6_i32 = arith.constant 6 : i32
    %c128_i32_104 = arith.constant 128 : i32
    %351 = arith.muli %c6_i32, %c128_i32_104 : i32
    %352 = tpu.assume_multiple %351, 128 : i32
    %c0_105 = arith.constant 0 : index
    %353 = arith.index_cast %352 : i32 to index
    %354 = vector.load %arg16[%c0_105, %353] : memref<5x1024xf32, #tpu.memory_space<vmem>>, vector<5x128xf32>
    %c0_106 = arith.constant 0 : index
    %355 = arith.index_cast %c6_i32 : i32 to index
    %c0_107 = arith.constant 0 : index
    %356 = vector.load %arg11[%c0_106, %355, %c0_107] : memref<1x8x128xi32, #tpu.memory_space<vmem>>, vector<1x1x128xi32>
    %357 = vector.shape_cast %356 : vector<1x1x128xi32> to vector<1x128xi32>
    %c0_108 = arith.constant 0 : index
    %358 = arith.index_cast %c6_i32 : i32 to index
    %c0_109 = arith.constant 0 : index
    %359 = vector.load %arg12[%c0_108, %358, %c0_109] : memref<1x8x128xf32, #tpu.memory_space<vmem>>, vector<1x1x128xf32>
    %360 = vector.shape_cast %359 : vector<1x1x128xf32> to vector<1x128xf32>
    %361 = vector.broadcast %357 : vector<1x128xi32> to vector<5x128xi32>
    %362 = arith.cmpi eq, %39, %361 : vector<5x128xi32>
    %363 = arith.extui %362 : vector<5x128xi1> to vector<5x128xi32>
    %364 = arith.sitofp %363 : vector<5x128xi32> to vector<5x128xf32>
    %365 = arith.mulf %364, %354 : vector<5x128xf32>
    %cst_110 = arith.constant dense<0.000000e+00> : vector<128xf32>
    %366 = vector.multi_reduction <add>, %365, %cst_110 [0] : vector<5x128xf32> to vector<128xf32>
    %367 = vector.shape_cast %366 : vector<128xf32> to vector<1x128xf32>
    %c5_i32_111 = arith.constant 5 : i32
    %368 = vector.broadcast %c5_i32_111 : i32 to vector<1x128xi32>
    %369 = arith.muli %299, %368 : vector<1x128xi32>
    %370 = arith.addi %369, %357 : vector<1x128xi32>
    %371 = vector.broadcast %370 : vector<1x128xi32> to vector<25x128xi32>
    %372 = arith.cmpi eq, %40, %371 : vector<25x128xi32>
    %373 = arith.extui %372 : vector<25x128xi1> to vector<25x128xi32>
    %374 = arith.sitofp %373 : vector<25x128xi32> to vector<25x128xf32>
    %375 = vector.broadcast %38 : vector<25x1xf32> to vector<25x128xf32>
    %376 = arith.mulf %374, %375 : vector<25x128xf32>
    %cst_112 = arith.constant dense<0.000000e+00> : vector<128xf32>
    %377 = vector.multi_reduction <add>, %376, %cst_112 [0] : vector<25x128xf32> to vector<128xf32>
    %378 = vector.shape_cast %377 : vector<128xf32> to vector<1x128xf32>
    %379 = arith.addf %367, %378 : vector<1x128xf32>
    %380 = arith.mulf %360, %379 : vector<1x128xf32>
    %381 = arith.addf %323, %380 : vector<1x128xf32>
    %c0_113 = arith.constant 0 : index
    %382 = arith.index_cast %c6_i32 : i32 to index
    %c0_114 = arith.constant 0 : index
    %383 = vector.load %arg13[%c0_113, %382, %c0_114] : memref<1x8x128xf32, #tpu.memory_space<vmem>>, vector<1x1x128xf32>
    %384 = vector.shape_cast %383 : vector<1x1x128xf32> to vector<1x128xf32>
    %385 = vector.broadcast %384 : vector<1x128xf32> to vector<5x128xf32>
    %386 = arith.mulf %364, %385 : vector<5x128xf32>
    %387 = arith.addf %329, %386 : vector<5x128xf32>
    %388 = vector.shape_cast %350 : vector<5x128xf32> to vector<5x1x128xf32>
    %389 = vector.shape_cast %36 : vector<5x5xf32> to vector<5x5x1xf32>
    %390 = vector.broadcast %388 : vector<5x1x128xf32> to vector<5x5x128xf32>
    %391 = vector.broadcast %389 : vector<5x5x1xf32> to vector<5x5x128xf32>
    %392 = arith.addf %390, %391 : vector<5x5x128xf32>
    %cst_115 = arith.constant dense<0xFF800000> : vector<5x128xf32>
    %393 = vector.multi_reduction <maximumf>, %392, %cst_115 [0] : vector<5x5x128xf32> to vector<5x128xf32>
    %394 = vector.shape_cast %393 : vector<5x128xf32> to vector<1x5x128xf32>
    %395 = vector.broadcast %394 : vector<1x5x128xf32> to vector<5x5x128xf32>
    %396 = arith.subf %392, %395 : vector<5x5x128xf32>
    %397 = math.exp %396 : vector<5x5x128xf32>
    %cst_116 = arith.constant dense<0.000000e+00> : vector<5x128xf32>
    %398 = vector.multi_reduction <add>, %397, %cst_116 [0] : vector<5x5x128xf32> to vector<5x128xf32>
    %399 = math.log %398 : vector<5x128xf32>
    %400 = arith.addf %399, %393 : vector<5x128xf32>
    %401 = arith.addf %400, %354 : vector<5x128xf32>
    %402 = vector.broadcast %360 : vector<1x128xf32> to vector<5x128xf32>
    %403 = arith.mulf %402, %401 : vector<5x128xf32>
    %cst_117 = arith.constant 1.000000e+00 : f32
    %404 = vector.broadcast %cst_117 : f32 to vector<1x128xf32>
    %405 = arith.subf %404, %360 : vector<1x128xf32>
    %406 = vector.broadcast %405 : vector<1x128xf32> to vector<5x128xf32>
    %407 = arith.mulf %406, %350 : vector<5x128xf32>
    %408 = arith.addf %403, %407 : vector<5x128xf32>
    %c7_i32 = arith.constant 7 : i32
    %c128_i32_118 = arith.constant 128 : i32
    %409 = arith.muli %c7_i32, %c128_i32_118 : i32
    %410 = tpu.assume_multiple %409, 128 : i32
    %c0_119 = arith.constant 0 : index
    %411 = arith.index_cast %410 : i32 to index
    %412 = vector.load %arg16[%c0_119, %411] : memref<5x1024xf32, #tpu.memory_space<vmem>>, vector<5x128xf32>
    %c0_120 = arith.constant 0 : index
    %413 = arith.index_cast %c7_i32 : i32 to index
    %c0_121 = arith.constant 0 : index
    %414 = vector.load %arg11[%c0_120, %413, %c0_121] : memref<1x8x128xi32, #tpu.memory_space<vmem>>, vector<1x1x128xi32>
    %415 = vector.shape_cast %414 : vector<1x1x128xi32> to vector<1x128xi32>
    %c0_122 = arith.constant 0 : index
    %416 = arith.index_cast %c7_i32 : i32 to index
    %c0_123 = arith.constant 0 : index
    %417 = vector.load %arg12[%c0_122, %416, %c0_123] : memref<1x8x128xf32, #tpu.memory_space<vmem>>, vector<1x1x128xf32>
    %418 = vector.shape_cast %417 : vector<1x1x128xf32> to vector<1x128xf32>
    %419 = vector.broadcast %415 : vector<1x128xi32> to vector<5x128xi32>
    %420 = arith.cmpi eq, %39, %419 : vector<5x128xi32>
    %421 = arith.extui %420 : vector<5x128xi1> to vector<5x128xi32>
    %422 = arith.sitofp %421 : vector<5x128xi32> to vector<5x128xf32>
    %423 = arith.mulf %422, %412 : vector<5x128xf32>
    %cst_124 = arith.constant dense<0.000000e+00> : vector<128xf32>
    %424 = vector.multi_reduction <add>, %423, %cst_124 [0] : vector<5x128xf32> to vector<128xf32>
    %425 = vector.shape_cast %424 : vector<128xf32> to vector<1x128xf32>
    %c5_i32_125 = arith.constant 5 : i32
    %426 = vector.broadcast %c5_i32_125 : i32 to vector<1x128xi32>
    %427 = arith.muli %357, %426 : vector<1x128xi32>
    %428 = arith.addi %427, %415 : vector<1x128xi32>
    %429 = vector.broadcast %428 : vector<1x128xi32> to vector<25x128xi32>
    %430 = arith.cmpi eq, %40, %429 : vector<25x128xi32>
    %431 = arith.extui %430 : vector<25x128xi1> to vector<25x128xi32>
    %432 = arith.sitofp %431 : vector<25x128xi32> to vector<25x128xf32>
    %433 = vector.broadcast %38 : vector<25x1xf32> to vector<25x128xf32>
    %434 = arith.mulf %432, %433 : vector<25x128xf32>
    %cst_126 = arith.constant dense<0.000000e+00> : vector<128xf32>
    %435 = vector.multi_reduction <add>, %434, %cst_126 [0] : vector<25x128xf32> to vector<128xf32>
    %436 = vector.shape_cast %435 : vector<128xf32> to vector<1x128xf32>
    %437 = arith.addf %425, %436 : vector<1x128xf32>
    %438 = arith.mulf %418, %437 : vector<1x128xf32>
    %439 = arith.addf %381, %438 : vector<1x128xf32>
    %c0_127 = arith.constant 0 : index
    %440 = arith.index_cast %c7_i32 : i32 to index
    %c0_128 = arith.constant 0 : index
    %441 = vector.load %arg13[%c0_127, %440, %c0_128] : memref<1x8x128xf32, #tpu.memory_space<vmem>>, vector<1x1x128xf32>
    %442 = vector.shape_cast %441 : vector<1x1x128xf32> to vector<1x128xf32>
    %443 = vector.broadcast %442 : vector<1x128xf32> to vector<5x128xf32>
    %444 = arith.mulf %422, %443 : vector<5x128xf32>
    %445 = arith.addf %387, %444 : vector<5x128xf32>
    %446 = vector.shape_cast %408 : vector<5x128xf32> to vector<5x1x128xf32>
    %447 = vector.shape_cast %36 : vector<5x5xf32> to vector<5x5x1xf32>
    %448 = vector.broadcast %446 : vector<5x1x128xf32> to vector<5x5x128xf32>
    %449 = vector.broadcast %447 : vector<5x5x1xf32> to vector<5x5x128xf32>
    %450 = arith.addf %448, %449 : vector<5x5x128xf32>
    %cst_129 = arith.constant dense<0xFF800000> : vector<5x128xf32>
    %451 = vector.multi_reduction <maximumf>, %450, %cst_129 [0] : vector<5x5x128xf32> to vector<5x128xf32>
    %452 = vector.shape_cast %451 : vector<5x128xf32> to vector<1x5x128xf32>
    %453 = vector.broadcast %452 : vector<1x5x128xf32> to vector<5x5x128xf32>
    %454 = arith.subf %450, %453 : vector<5x5x128xf32>
    %455 = math.exp %454 : vector<5x5x128xf32>
    %cst_130 = arith.constant dense<0.000000e+00> : vector<5x128xf32>
    %456 = vector.multi_reduction <add>, %455, %cst_130 [0] : vector<5x5x128xf32> to vector<5x128xf32>
    %457 = math.log %456 : vector<5x128xf32>
    %458 = arith.addf %457, %451 : vector<5x128xf32>
    %459 = arith.addf %458, %412 : vector<5x128xf32>
    %460 = vector.broadcast %418 : vector<1x128xf32> to vector<5x128xf32>
    %461 = arith.mulf %460, %459 : vector<5x128xf32>
    %cst_131 = arith.constant 1.000000e+00 : f32
    %462 = vector.broadcast %cst_131 : f32 to vector<1x128xf32>
    %463 = arith.subf %462, %418 : vector<1x128xf32>
    %464 = vector.broadcast %463 : vector<1x128xf32> to vector<5x128xf32>
    %465 = arith.mulf %464, %408 : vector<5x128xf32>
    %466 = arith.addf %461, %465 : vector<5x128xf32>
    %c7_i32_132 = arith.constant 7 : i32
    %467 = vector.broadcast %35 : vector<5x1xf32> to vector<5x128xf32>
    %468 = arith.mulf %445, %467 : vector<5x128xf32>
    %cst_133 = arith.constant dense<0.000000e+00> : vector<128xf32>
    %469 = vector.multi_reduction <add>, %468, %cst_133 [0] : vector<5x128xf32> to vector<128xf32>
    %470 = vector.shape_cast %469 : vector<128xf32> to vector<1x128xf32>
    %471 = arith.addf %439, %470 : vector<1x128xf32>
    %472 = vector.broadcast %35 : vector<5x1xf32> to vector<5x128xf32>
    %473 = arith.addf %466, %472 : vector<5x128xf32>
    %cst_134 = arith.constant dense<0xFF800000> : vector<128xf32>
    %474 = vector.multi_reduction <maximumf>, %473, %cst_134 [0] : vector<5x128xf32> to vector<128xf32>
    %475 = vector.shape_cast %474 : vector<128xf32> to vector<1x128xf32>
    %476 = vector.broadcast %475 : vector<1x128xf32> to vector<5x128xf32>
    %477 = arith.subf %473, %476 : vector<5x128xf32>
    %478 = math.exp %477 : vector<5x128xf32>
    %cst_135 = arith.constant dense<0.000000e+00> : vector<128xf32>
    %479 = vector.multi_reduction <add>, %478, %cst_135 [0] : vector<5x128xf32> to vector<128xf32>
    %480 = vector.shape_cast %479 : vector<128xf32> to vector<1x128xf32>
    %481 = math.log %480 : vector<1x128xf32>
    %482 = arith.addf %481, %475 : vector<1x128xf32>
    %483 = arith.subf %471, %482 : vector<1x128xf32>
    %c0_136 = arith.constant 0 : index
    %c0_137 = arith.constant 0 : index
    %c0_138 = arith.constant 0 : index
    %484 = vector.load %arg14[%c0_136, %c0_137, %c0_138] : memref<1x1x128xf32, #tpu.memory_space<vmem>>, vector<1x1x128xf32>
    %485 = vector.shape_cast %484 : vector<1x1x128xf32> to vector<1x128xf32>
    %486 = vector.shape_cast %483 : vector<1x128xf32> to vector<1x1x128xf32>
    tpu.vector_store %arg14[%c0_136, %c0_137, %c0_138], %486 {strides = array<i32>} : memref<1x1x128xf32, #tpu.memory_space<vmem>>, vector<1x1x128xf32>,
    %c1_i32_139 = arith.constant 1 : i32
    %487 = vector.extract_strided_slice %60 {offsets = [0, 0], sizes = [1, 128], strides = [1, 1]} : vector<5x128xf32> to vector<1x128xf32>
    %488 = vector.extract_strided_slice %37 {offsets = [0, 0], sizes = [5, 1], strides = [1, 1]} : vector<5x5xf32> to vector<5x1xf32>
    %489 = vector.broadcast %487 : vector<1x128xf32> to vector<5x128xf32>
    %490 = vector.broadcast %488 : vector<5x1xf32> to vector<5x128xf32>
    %491 = arith.addf %489, %490 : vector<5x128xf32>
    %c0_i32_140 = arith.constant 0 : i32
    %492 = vector.broadcast %c0_i32_140 : i32 to vector<5x128xi32>
    %493 = vector.extract_strided_slice %60 {offsets = [1, 0], sizes = [1, 128], strides = [1, 1]} : vector<5x128xf32> to vector<1x128xf32>
    %494 = vector.extract_strided_slice %37 {offsets = [0, 1], sizes = [5, 1], strides = [1, 1]} : vector<5x5xf32> to vector<5x1xf32>
    %495 = vector.broadcast %493 : vector<1x128xf32> to vector<5x128xf32>
    %496 = vector.broadcast %494 : vector<5x1xf32> to vector<5x128xf32>
    %497 = arith.addf %495, %496 : vector<5x128xf32>
    %498 = arith.cmpf ogt, %497, %491 : vector<5x128xf32>
    %499 = arith.select %498, %497, %491 : vector<5x128xi1>, vector<5x128xf32>
    %c1_i32_141 = arith.constant 1 : i32
    %500 = vector.broadcast %c1_i32_141 : i32 to vector<5x128xi32>
    %501 = arith.select %498, %500, %492 : vector<5x128xi1>, vector<5x128xi32>
    %502 = vector.extract_strided_slice %60 {offsets = [2, 0], sizes = [1, 128], strides = [1, 1]} : vector<5x128xf32> to vector<1x128xf32>
    %503 = vector.extract_strided_slice %37 {offsets = [0, 2], sizes = [5, 1], strides = [1, 1]} : vector<5x5xf32> to vector<5x1xf32>
    %504 = vector.broadcast %502 : vector<1x128xf32> to vector<5x128xf32>
    %505 = vector.broadcast %503 : vector<5x1xf32> to vector<5x128xf32>
    %506 = arith.addf %504, %505 : vector<5x128xf32>
    %507 = arith.cmpf ogt, %506, %499 : vector<5x128xf32>
    %508 = arith.select %507, %506, %499 : vector<5x128xi1>, vector<5x128xf32>
    %c2_i32_142 = arith.constant 2 : i32
    %509 = vector.broadcast %c2_i32_142 : i32 to vector<5x128xi32>
    %510 = arith.select %507, %509, %501 : vector<5x128xi1>, vector<5x128xi32>
    %511 = vector.extract_strided_slice %60 {offsets = [3, 0], sizes = [1, 128], strides = [1, 1]} : vector<5x128xf32> to vector<1x128xf32>
    %512 = vector.extract_strided_slice %37 {offsets = [0, 3], sizes = [5, 1], strides = [1, 1]} : vector<5x5xf32> to vector<5x1xf32>
    %513 = vector.broadcast %511 : vector<1x128xf32> to vector<5x128xf32>
    %514 = vector.broadcast %512 : vector<5x1xf32> to vector<5x128xf32>
    %515 = arith.addf %513, %514 : vector<5x128xf32>
    %516 = arith.cmpf ogt, %515, %508 : vector<5x128xf32>
    %517 = arith.select %516, %515, %508 : vector<5x128xi1>, vector<5x128xf32>
    %c3_i32_143 = arith.constant 3 : i32
    %518 = vector.broadcast %c3_i32_143 : i32 to vector<5x128xi32>
    %519 = arith.select %516, %518, %510 : vector<5x128xi1>, vector<5x128xi32>
    %520 = vector.extract_strided_slice %60 {offsets = [4, 0], sizes = [1, 128], strides = [1, 1]} : vector<5x128xf32> to vector<1x128xf32>
    %521 = vector.extract_strided_slice %37 {offsets = [0, 4], sizes = [5, 1], strides = [1, 1]} : vector<5x5xf32> to vector<5x1xf32>
    %522 = vector.broadcast %520 : vector<1x128xf32> to vector<5x128xf32>
    %523 = vector.broadcast %521 : vector<5x1xf32> to vector<5x128xf32>
    %524 = arith.addf %522, %523 : vector<5x128xf32>
    %525 = arith.cmpf ogt, %524, %517 : vector<5x128xf32>
    %526 = arith.select %525, %524, %517 : vector<5x128xi1>, vector<5x128xf32>
    %c4_i32_144 = arith.constant 4 : i32
    %527 = vector.broadcast %c4_i32_144 : i32 to vector<5x128xi32>
    %528 = arith.select %525, %527, %519 : vector<5x128xi1>, vector<5x128xi32>
    %c1_i32_145 = arith.constant 1 : i32
    %529 = arith.subi %c1_i32_139, %c1_i32_145 : i32
    %530 = arith.index_cast %529 : i32 to index
    %c0_146 = arith.constant 0 : index
    %c0_147 = arith.constant 0 : index
    %531 = vector.load %arg17[%530, %c0_146, %c0_147] : memref<7x5x128xi32, #tpu.memory_space<vmem>>, vector<1x5x128xi32>
    %532 = vector.shape_cast %531 : vector<1x5x128xi32> to vector<5x128xi32>
    %533 = vector.shape_cast %528 : vector<5x128xi32> to vector<1x5x128xi32>
    tpu.vector_store %arg17[%530, %c0_146, %c0_147], %533 {strides = array<i32>} : memref<7x5x128xi32, #tpu.memory_space<vmem>>, vector<1x5x128xi32>,
    %c128_i32_148 = arith.constant 128 : i32
    %534 = arith.muli %c1_i32_139, %c128_i32_148 : i32
    %535 = tpu.assume_multiple %534, 128 : i32
    %c0_149 = arith.constant 0 : index
    %536 = arith.index_cast %535 : i32 to index
    %537 = vector.load %arg16[%c0_149, %536] : memref<5x1024xf32, #tpu.memory_space<vmem>>, vector<5x128xf32>
    %538 = arith.addf %526, %537 : vector<5x128xf32>
    %c2_i32_150 = arith.constant 2 : i32
    %539 = vector.extract_strided_slice %538 {offsets = [0, 0], sizes = [1, 128], strides = [1, 1]} : vector<5x128xf32> to vector<1x128xf32>
    %540 = vector.extract_strided_slice %37 {offsets = [0, 0], sizes = [5, 1], strides = [1, 1]} : vector<5x5xf32> to vector<5x1xf32>
    %541 = vector.broadcast %539 : vector<1x128xf32> to vector<5x128xf32>
    %542 = vector.broadcast %540 : vector<5x1xf32> to vector<5x128xf32>
    %543 = arith.addf %541, %542 : vector<5x128xf32>
    %c0_i32_151 = arith.constant 0 : i32
    %544 = vector.broadcast %c0_i32_151 : i32 to vector<5x128xi32>
    %545 = vector.extract_strided_slice %538 {offsets = [1, 0], sizes = [1, 128], strides = [1, 1]} : vector<5x128xf32> to vector<1x128xf32>
    %546 = vector.extract_strided_slice %37 {offsets = [0, 1], sizes = [5, 1], strides = [1, 1]} : vector<5x5xf32> to vector<5x1xf32>
    %547 = vector.broadcast %545 : vector<1x128xf32> to vector<5x128xf32>
    %548 = vector.broadcast %546 : vector<5x1xf32> to vector<5x128xf32>
    %549 = arith.addf %547, %548 : vector<5x128xf32>
    %550 = arith.cmpf ogt, %549, %543 : vector<5x128xf32>
    %551 = arith.select %550, %549, %543 : vector<5x128xi1>, vector<5x128xf32>
    %c1_i32_152 = arith.constant 1 : i32
    %552 = vector.broadcast %c1_i32_152 : i32 to vector<5x128xi32>
    %553 = arith.select %550, %552, %544 : vector<5x128xi1>, vector<5x128xi32>
    %554 = vector.extract_strided_slice %538 {offsets = [2, 0], sizes = [1, 128], strides = [1, 1]} : vector<5x128xf32> to vector<1x128xf32>
    %555 = vector.extract_strided_slice %37 {offsets = [0, 2], sizes = [5, 1], strides = [1, 1]} : vector<5x5xf32> to vector<5x1xf32>
    %556 = vector.broadcast %554 : vector<1x128xf32> to vector<5x128xf32>
    %557 = vector.broadcast %555 : vector<5x1xf32> to vector<5x128xf32>
    %558 = arith.addf %556, %557 : vector<5x128xf32>
    %559 = arith.cmpf ogt, %558, %551 : vector<5x128xf32>
    %560 = arith.select %559, %558, %551 : vector<5x128xi1>, vector<5x128xf32>
    %c2_i32_153 = arith.constant 2 : i32
    %561 = vector.broadcast %c2_i32_153 : i32 to vector<5x128xi32>
    %562 = arith.select %559, %561, %553 : vector<5x128xi1>, vector<5x128xi32>
    %563 = vector.extract_strided_slice %538 {offsets = [3, 0], sizes = [1, 128], strides = [1, 1]} : vector<5x128xf32> to vector<1x128xf32>
    %564 = vector.extract_strided_slice %37 {offsets = [0, 3], sizes = [5, 1], strides = [1, 1]} : vector<5x5xf32> to vector<5x1xf32>
    %565 = vector.broadcast %563 : vector<1x128xf32> to vector<5x128xf32>
    %566 = vector.broadcast %564 : vector<5x1xf32> to vector<5x128xf32>
    %567 = arith.addf %565, %566 : vector<5x128xf32>
    %568 = arith.cmpf ogt, %567, %560 : vector<5x128xf32>
    %569 = arith.select %568, %567, %560 : vector<5x128xi1>, vector<5x128xf32>
    %c3_i32_154 = arith.constant 3 : i32
    %570 = vector.broadcast %c3_i32_154 : i32 to vector<5x128xi32>
    %571 = arith.select %568, %570, %562 : vector<5x128xi1>, vector<5x128xi32>
    %572 = vector.extract_strided_slice %538 {offsets = [4, 0], sizes = [1, 128], strides = [1, 1]} : vector<5x128xf32> to vector<1x128xf32>
    %573 = vector.extract_strided_slice %37 {offsets = [0, 4], sizes = [5, 1], strides = [1, 1]} : vector<5x5xf32> to vector<5x1xf32>
    %574 = vector.broadcast %572 : vector<1x128xf32> to vector<5x128xf32>
    %575 = vector.broadcast %573 : vector<5x1xf32> to vector<5x128xf32>
    %576 = arith.addf %574, %575 : vector<5x128xf32>
    %577 = arith.cmpf ogt, %576, %569 : vector<5x128xf32>
    %578 = arith.select %577, %576, %569 : vector<5x128xi1>, vector<5x128xf32>
    %c4_i32_155 = arith.constant 4 : i32
    %579 = vector.broadcast %c4_i32_155 : i32 to vector<5x128xi32>
    %580 = arith.select %577, %579, %571 : vector<5x128xi1>, vector<5x128xi32>
    %c1_i32_156 = arith.constant 1 : i32
    %581 = arith.subi %c2_i32_150, %c1_i32_156 : i32
    %582 = arith.index_cast %581 : i32 to index
    %c0_157 = arith.constant 0 : index
    %c0_158 = arith.constant 0 : index
    %583 = vector.load %arg17[%582, %c0_157, %c0_158] : memref<7x5x128xi32, #tpu.memory_space<vmem>>, vector<1x5x128xi32>
    %584 = vector.shape_cast %583 : vector<1x5x128xi32> to vector<5x128xi32>
    %585 = vector.shape_cast %580 : vector<5x128xi32> to vector<1x5x128xi32>
    tpu.vector_store %arg17[%582, %c0_157, %c0_158], %585 {strides = array<i32>} : memref<7x5x128xi32, #tpu.memory_space<vmem>>, vector<1x5x128xi32>,
    %c128_i32_159 = arith.constant 128 : i32
    %586 = arith.muli %c2_i32_150, %c128_i32_159 : i32
    %587 = tpu.assume_multiple %586, 128 : i32
    %c0_160 = arith.constant 0 : index
    %588 = arith.index_cast %587 : i32 to index
    %589 = vector.load %arg16[%c0_160, %588] : memref<5x1024xf32, #tpu.memory_space<vmem>>, vector<5x128xf32>
    %590 = arith.addf %578, %589 : vector<5x128xf32>
    %c3_i32_161 = arith.constant 3 : i32
    %591 = vector.extract_strided_slice %590 {offsets = [0, 0], sizes = [1, 128], strides = [1, 1]} : vector<5x128xf32> to vector<1x128xf32>
    %592 = vector.extract_strided_slice %37 {offsets = [0, 0], sizes = [5, 1], strides = [1, 1]} : vector<5x5xf32> to vector<5x1xf32>
    %593 = vector.broadcast %591 : vector<1x128xf32> to vector<5x128xf32>
    %594 = vector.broadcast %592 : vector<5x1xf32> to vector<5x128xf32>
    %595 = arith.addf %593, %594 : vector<5x128xf32>
    %c0_i32_162 = arith.constant 0 : i32
    %596 = vector.broadcast %c0_i32_162 : i32 to vector<5x128xi32>
    %597 = vector.extract_strided_slice %590 {offsets = [1, 0], sizes = [1, 128], strides = [1, 1]} : vector<5x128xf32> to vector<1x128xf32>
    %598 = vector.extract_strided_slice %37 {offsets = [0, 1], sizes = [5, 1], strides = [1, 1]} : vector<5x5xf32> to vector<5x1xf32>
    %599 = vector.broadcast %597 : vector<1x128xf32> to vector<5x128xf32>
    %600 = vector.broadcast %598 : vector<5x1xf32> to vector<5x128xf32>
    %601 = arith.addf %599, %600 : vector<5x128xf32>
    %602 = arith.cmpf ogt, %601, %595 : vector<5x128xf32>
    %603 = arith.select %602, %601, %595 : vector<5x128xi1>, vector<5x128xf32>
    %c1_i32_163 = arith.constant 1 : i32
    %604 = vector.broadcast %c1_i32_163 : i32 to vector<5x128xi32>
    %605 = arith.select %602, %604, %596 : vector<5x128xi1>, vector<5x128xi32>
    %606 = vector.extract_strided_slice %590 {offsets = [2, 0], sizes = [1, 128], strides = [1, 1]} : vector<5x128xf32> to vector<1x128xf32>
    %607 = vector.extract_strided_slice %37 {offsets = [0, 2], sizes = [5, 1], strides = [1, 1]} : vector<5x5xf32> to vector<5x1xf32>
    %608 = vector.broadcast %606 : vector<1x128xf32> to vector<5x128xf32>
    %609 = vector.broadcast %607 : vector<5x1xf32> to vector<5x128xf32>
    %610 = arith.addf %608, %609 : vector<5x128xf32>
    %611 = arith.cmpf ogt, %610, %603 : vector<5x128xf32>
    %612 = arith.select %611, %610, %603 : vector<5x128xi1>, vector<5x128xf32>
    %c2_i32_164 = arith.constant 2 : i32
    %613 = vector.broadcast %c2_i32_164 : i32 to vector<5x128xi32>
    %614 = arith.select %611, %613, %605 : vector<5x128xi1>, vector<5x128xi32>
    %615 = vector.extract_strided_slice %590 {offsets = [3, 0], sizes = [1, 128], strides = [1, 1]} : vector<5x128xf32> to vector<1x128xf32>
    %616 = vector.extract_strided_slice %37 {offsets = [0, 3], sizes = [5, 1], strides = [1, 1]} : vector<5x5xf32> to vector<5x1xf32>
    %617 = vector.broadcast %615 : vector<1x128xf32> to vector<5x128xf32>
    %618 = vector.broadcast %616 : vector<5x1xf32> to vector<5x128xf32>
    %619 = arith.addf %617, %618 : vector<5x128xf32>
    %620 = arith.cmpf ogt, %619, %612 : vector<5x128xf32>
    %621 = arith.select %620, %619, %612 : vector<5x128xi1>, vector<5x128xf32>
    %c3_i32_165 = arith.constant 3 : i32
    %622 = vector.broadcast %c3_i32_165 : i32 to vector<5x128xi32>
    %623 = arith.select %620, %622, %614 : vector<5x128xi1>, vector<5x128xi32>
    %624 = vector.extract_strided_slice %590 {offsets = [4, 0], sizes = [1, 128], strides = [1, 1]} : vector<5x128xf32> to vector<1x128xf32>
    %625 = vector.extract_strided_slice %37 {offsets = [0, 4], sizes = [5, 1], strides = [1, 1]} : vector<5x5xf32> to vector<5x1xf32>
    %626 = vector.broadcast %624 : vector<1x128xf32> to vector<5x128xf32>
    %627 = vector.broadcast %625 : vector<5x1xf32> to vector<5x128xf32>
    %628 = arith.addf %626, %627 : vector<5x128xf32>
    %629 = arith.cmpf ogt, %628, %621 : vector<5x128xf32>
    %630 = arith.select %629, %628, %621 : vector<5x128xi1>, vector<5x128xf32>
    %c4_i32_166 = arith.constant 4 : i32
    %631 = vector.broadcast %c4_i32_166 : i32 to vector<5x128xi32>
    %632 = arith.select %629, %631, %623 : vector<5x128xi1>, vector<5x128xi32>
    %c1_i32_167 = arith.constant 1 : i32
    %633 = arith.subi %c3_i32_161, %c1_i32_167 : i32
    %634 = arith.index_cast %633 : i32 to index
    %c0_168 = arith.constant 0 : index
    %c0_169 = arith.constant 0 : index
    %635 = vector.load %arg17[%634, %c0_168, %c0_169] : memref<7x5x128xi32, #tpu.memory_space<vmem>>, vector<1x5x128xi32>
    %636 = vector.shape_cast %635 : vector<1x5x128xi32> to vector<5x128xi32>
    %637 = vector.shape_cast %632 : vector<5x128xi32> to vector<1x5x128xi32>
    tpu.vector_store %arg17[%634, %c0_168, %c0_169], %637 {strides = array<i32>} : memref<7x5x128xi32, #tpu.memory_space<vmem>>, vector<1x5x128xi32>,
    %c128_i32_170 = arith.constant 128 : i32
    %638 = arith.muli %c3_i32_161, %c128_i32_170 : i32
    %639 = tpu.assume_multiple %638, 128 : i32
    %c0_171 = arith.constant 0 : index
    %640 = arith.index_cast %639 : i32 to index
    %641 = vector.load %arg16[%c0_171, %640] : memref<5x1024xf32, #tpu.memory_space<vmem>>, vector<5x128xf32>
    %642 = arith.addf %630, %641 : vector<5x128xf32>
    %c4_i32_172 = arith.constant 4 : i32
    %643 = vector.extract_strided_slice %642 {offsets = [0, 0], sizes = [1, 128], strides = [1, 1]} : vector<5x128xf32> to vector<1x128xf32>
    %644 = vector.extract_strided_slice %37 {offsets = [0, 0], sizes = [5, 1], strides = [1, 1]} : vector<5x5xf32> to vector<5x1xf32>
    %645 = vector.broadcast %643 : vector<1x128xf32> to vector<5x128xf32>
    %646 = vector.broadcast %644 : vector<5x1xf32> to vector<5x128xf32>
    %647 = arith.addf %645, %646 : vector<5x128xf32>
    %c0_i32_173 = arith.constant 0 : i32
    %648 = vector.broadcast %c0_i32_173 : i32 to vector<5x128xi32>
    %649 = vector.extract_strided_slice %642 {offsets = [1, 0], sizes = [1, 128], strides = [1, 1]} : vector<5x128xf32> to vector<1x128xf32>
    %650 = vector.extract_strided_slice %37 {offsets = [0, 1], sizes = [5, 1], strides = [1, 1]} : vector<5x5xf32> to vector<5x1xf32>
    %651 = vector.broadcast %649 : vector<1x128xf32> to vector<5x128xf32>
    %652 = vector.broadcast %650 : vector<5x1xf32> to vector<5x128xf32>
    %653 = arith.addf %651, %652 : vector<5x128xf32>
    %654 = arith.cmpf ogt, %653, %647 : vector<5x128xf32>
    %655 = arith.select %654, %653, %647 : vector<5x128xi1>, vector<5x128xf32>
    %c1_i32_174 = arith.constant 1 : i32
    %656 = vector.broadcast %c1_i32_174 : i32 to vector<5x128xi32>
    %657 = arith.select %654, %656, %648 : vector<5x128xi1>, vector<5x128xi32>
    %658 = vector.extract_strided_slice %642 {offsets = [2, 0], sizes = [1, 128], strides = [1, 1]} : vector<5x128xf32> to vector<1x128xf32>
    %659 = vector.extract_strided_slice %37 {offsets = [0, 2], sizes = [5, 1], strides = [1, 1]} : vector<5x5xf32> to vector<5x1xf32>
    %660 = vector.broadcast %658 : vector<1x128xf32> to vector<5x128xf32>
    %661 = vector.broadcast %659 : vector<5x1xf32> to vector<5x128xf32>
    %662 = arith.addf %660, %661 : vector<5x128xf32>
    %663 = arith.cmpf ogt, %662, %655 : vector<5x128xf32>
    %664 = arith.select %663, %662, %655 : vector<5x128xi1>, vector<5x128xf32>
    %c2_i32_175 = arith.constant 2 : i32
    %665 = vector.broadcast %c2_i32_175 : i32 to vector<5x128xi32>
    %666 = arith.select %663, %665, %657 : vector<5x128xi1>, vector<5x128xi32>
    %667 = vector.extract_strided_slice %642 {offsets = [3, 0], sizes = [1, 128], strides = [1, 1]} : vector<5x128xf32> to vector<1x128xf32>
    %668 = vector.extract_strided_slice %37 {offsets = [0, 3], sizes = [5, 1], strides = [1, 1]} : vector<5x5xf32> to vector<5x1xf32>
    %669 = vector.broadcast %667 : vector<1x128xf32> to vector<5x128xf32>
    %670 = vector.broadcast %668 : vector<5x1xf32> to vector<5x128xf32>
    %671 = arith.addf %669, %670 : vector<5x128xf32>
    %672 = arith.cmpf ogt, %671, %664 : vector<5x128xf32>
    %673 = arith.select %672, %671, %664 : vector<5x128xi1>, vector<5x128xf32>
    %c3_i32_176 = arith.constant 3 : i32
    %674 = vector.broadcast %c3_i32_176 : i32 to vector<5x128xi32>
    %675 = arith.select %672, %674, %666 : vector<5x128xi1>, vector<5x128xi32>
    %676 = vector.extract_strided_slice %642 {offsets = [4, 0], sizes = [1, 128], strides = [1, 1]} : vector<5x128xf32> to vector<1x128xf32>
    %677 = vector.extract_strided_slice %37 {offsets = [0, 4], sizes = [5, 1], strides = [1, 1]} : vector<5x5xf32> to vector<5x1xf32>
    %678 = vector.broadcast %676 : vector<1x128xf32> to vector<5x128xf32>
    %679 = vector.broadcast %677 : vector<5x1xf32> to vector<5x128xf32>
    %680 = arith.addf %678, %679 : vector<5x128xf32>
    %681 = arith.cmpf ogt, %680, %673 : vector<5x128xf32>
    %682 = arith.select %681, %680, %673 : vector<5x128xi1>, vector<5x128xf32>
    %c4_i32_177 = arith.constant 4 : i32
    %683 = vector.broadcast %c4_i32_177 : i32 to vector<5x128xi32>
    %684 = arith.select %681, %683, %675 : vector<5x128xi1>, vector<5x128xi32>
    %c1_i32_178 = arith.constant 1 : i32
    %685 = arith.subi %c4_i32_172, %c1_i32_178 : i32
    %686 = arith.index_cast %685 : i32 to index
    %c0_179 = arith.constant 0 : index
    %c0_180 = arith.constant 0 : index
    %687 = vector.load %arg17[%686, %c0_179, %c0_180] : memref<7x5x128xi32, #tpu.memory_space<vmem>>, vector<1x5x128xi32>
    %688 = vector.shape_cast %687 : vector<1x5x128xi32> to vector<5x128xi32>
    %689 = vector.shape_cast %684 : vector<5x128xi32> to vector<1x5x128xi32>
    tpu.vector_store %arg17[%686, %c0_179, %c0_180], %689 {strides = array<i32>} : memref<7x5x128xi32, #tpu.memory_space<vmem>>, vector<1x5x128xi32>,
    %c128_i32_181 = arith.constant 128 : i32
    %690 = arith.muli %c4_i32_172, %c128_i32_181 : i32
    %691 = tpu.assume_multiple %690, 128 : i32
    %c0_182 = arith.constant 0 : index
    %692 = arith.index_cast %691 : i32 to index
    %693 = vector.load %arg16[%c0_182, %692] : memref<5x1024xf32, #tpu.memory_space<vmem>>, vector<5x128xf32>
    %694 = arith.addf %682, %693 : vector<5x128xf32>
    %c5_i32_183 = arith.constant 5 : i32
    %695 = vector.extract_strided_slice %694 {offsets = [0, 0], sizes = [1, 128], strides = [1, 1]} : vector<5x128xf32> to vector<1x128xf32>
    %696 = vector.extract_strided_slice %37 {offsets = [0, 0], sizes = [5, 1], strides = [1, 1]} : vector<5x5xf32> to vector<5x1xf32>
    %697 = vector.broadcast %695 : vector<1x128xf32> to vector<5x128xf32>
    %698 = vector.broadcast %696 : vector<5x1xf32> to vector<5x128xf32>
    %699 = arith.addf %697, %698 : vector<5x128xf32>
    %c0_i32_184 = arith.constant 0 : i32
    %700 = vector.broadcast %c0_i32_184 : i32 to vector<5x128xi32>
    %701 = vector.extract_strided_slice %694 {offsets = [1, 0], sizes = [1, 128], strides = [1, 1]} : vector<5x128xf32> to vector<1x128xf32>
    %702 = vector.extract_strided_slice %37 {offsets = [0, 1], sizes = [5, 1], strides = [1, 1]} : vector<5x5xf32> to vector<5x1xf32>
    %703 = vector.broadcast %701 : vector<1x128xf32> to vector<5x128xf32>
    %704 = vector.broadcast %702 : vector<5x1xf32> to vector<5x128xf32>
    %705 = arith.addf %703, %704 : vector<5x128xf32>
    %706 = arith.cmpf ogt, %705, %699 : vector<5x128xf32>
    %707 = arith.select %706, %705, %699 : vector<5x128xi1>, vector<5x128xf32>
    %c1_i32_185 = arith.constant 1 : i32
    %708 = vector.broadcast %c1_i32_185 : i32 to vector<5x128xi32>
    %709 = arith.select %706, %708, %700 : vector<5x128xi1>, vector<5x128xi32>
    %710 = vector.extract_strided_slice %694 {offsets = [2, 0], sizes = [1, 128], strides = [1, 1]} : vector<5x128xf32> to vector<1x128xf32>
    %711 = vector.extract_strided_slice %37 {offsets = [0, 2], sizes = [5, 1], strides = [1, 1]} : vector<5x5xf32> to vector<5x1xf32>
    %712 = vector.broadcast %710 : vector<1x128xf32> to vector<5x128xf32>
    %713 = vector.broadcast %711 : vector<5x1xf32> to vector<5x128xf32>
    %714 = arith.addf %712, %713 : vector<5x128xf32>
    %715 = arith.cmpf ogt, %714, %707 : vector<5x128xf32>
    %716 = arith.select %715, %714, %707 : vector<5x128xi1>, vector<5x128xf32>
    %c2_i32_186 = arith.constant 2 : i32
    %717 = vector.broadcast %c2_i32_186 : i32 to vector<5x128xi32>
    %718 = arith.select %715, %717, %709 : vector<5x128xi1>, vector<5x128xi32>
    %719 = vector.extract_strided_slice %694 {offsets = [3, 0], sizes = [1, 128], strides = [1, 1]} : vector<5x128xf32> to vector<1x128xf32>
    %720 = vector.extract_strided_slice %37 {offsets = [0, 3], sizes = [5, 1], strides = [1, 1]} : vector<5x5xf32> to vector<5x1xf32>
    %721 = vector.broadcast %719 : vector<1x128xf32> to vector<5x128xf32>
    %722 = vector.broadcast %720 : vector<5x1xf32> to vector<5x128xf32>
    %723 = arith.addf %721, %722 : vector<5x128xf32>
    %724 = arith.cmpf ogt, %723, %716 : vector<5x128xf32>
    %725 = arith.select %724, %723, %716 : vector<5x128xi1>, vector<5x128xf32>
    %c3_i32_187 = arith.constant 3 : i32
    %726 = vector.broadcast %c3_i32_187 : i32 to vector<5x128xi32>
    %727 = arith.select %724, %726, %718 : vector<5x128xi1>, vector<5x128xi32>
    %728 = vector.extract_strided_slice %694 {offsets = [4, 0], sizes = [1, 128], strides = [1, 1]} : vector<5x128xf32> to vector<1x128xf32>
    %729 = vector.extract_strided_slice %37 {offsets = [0, 4], sizes = [5, 1], strides = [1, 1]} : vector<5x5xf32> to vector<5x1xf32>
    %730 = vector.broadcast %728 : vector<1x128xf32> to vector<5x128xf32>
    %731 = vector.broadcast %729 : vector<5x1xf32> to vector<5x128xf32>
    %732 = arith.addf %730, %731 : vector<5x128xf32>
    %733 = arith.cmpf ogt, %732, %725 : vector<5x128xf32>
    %734 = arith.select %733, %732, %725 : vector<5x128xi1>, vector<5x128xf32>
    %c4_i32_188 = arith.constant 4 : i32
    %735 = vector.broadcast %c4_i32_188 : i32 to vector<5x128xi32>
    %736 = arith.select %733, %735, %727 : vector<5x128xi1>, vector<5x128xi32>
    %c1_i32_189 = arith.constant 1 : i32
    %737 = arith.subi %c5_i32_183, %c1_i32_189 : i32
    %738 = arith.index_cast %737 : i32 to index
    %c0_190 = arith.constant 0 : index
    %c0_191 = arith.constant 0 : index
    %739 = vector.load %arg17[%738, %c0_190, %c0_191] : memref<7x5x128xi32, #tpu.memory_space<vmem>>, vector<1x5x128xi32>
    %740 = vector.shape_cast %739 : vector<1x5x128xi32> to vector<5x128xi32>
    %741 = vector.shape_cast %736 : vector<5x128xi32> to vector<1x5x128xi32>
    tpu.vector_store %arg17[%738, %c0_190, %c0_191], %741 {strides = array<i32>} : memref<7x5x128xi32, #tpu.memory_space<vmem>>, vector<1x5x128xi32>,
    %c128_i32_192 = arith.constant 128 : i32
    %742 = arith.muli %c5_i32_183, %c128_i32_192 : i32
    %743 = tpu.assume_multiple %742, 128 : i32
    %c0_193 = arith.constant 0 : index
    %744 = arith.index_cast %743 : i32 to index
    %745 = vector.load %arg16[%c0_193, %744] : memref<5x1024xf32, #tpu.memory_space<vmem>>, vector<5x128xf32>
    %746 = arith.addf %734, %745 : vector<5x128xf32>
    %c6_i32_194 = arith.constant 6 : i32
    %747 = vector.extract_strided_slice %746 {offsets = [0, 0], sizes = [1, 128], strides = [1, 1]} : vector<5x128xf32> to vector<1x128xf32>
    %748 = vector.extract_strided_slice %37 {offsets = [0, 0], sizes = [5, 1], strides = [1, 1]} : vector<5x5xf32> to vector<5x1xf32>
    %749 = vector.broadcast %747 : vector<1x128xf32> to vector<5x128xf32>
    %750 = vector.broadcast %748 : vector<5x1xf32> to vector<5x128xf32>
    %751 = arith.addf %749, %750 : vector<5x128xf32>
    %c0_i32_195 = arith.constant 0 : i32
    %752 = vector.broadcast %c0_i32_195 : i32 to vector<5x128xi32>
    %753 = vector.extract_strided_slice %746 {offsets = [1, 0], sizes = [1, 128], strides = [1, 1]} : vector<5x128xf32> to vector<1x128xf32>
    %754 = vector.extract_strided_slice %37 {offsets = [0, 1], sizes = [5, 1], strides = [1, 1]} : vector<5x5xf32> to vector<5x1xf32>
    %755 = vector.broadcast %753 : vector<1x128xf32> to vector<5x128xf32>
    %756 = vector.broadcast %754 : vector<5x1xf32> to vector<5x128xf32>
    %757 = arith.addf %755, %756 : vector<5x128xf32>
    %758 = arith.cmpf ogt, %757, %751 : vector<5x128xf32>
    %759 = arith.select %758, %757, %751 : vector<5x128xi1>, vector<5x128xf32>
    %c1_i32_196 = arith.constant 1 : i32
    %760 = vector.broadcast %c1_i32_196 : i32 to vector<5x128xi32>
    %761 = arith.select %758, %760, %752 : vector<5x128xi1>, vector<5x128xi32>
    %762 = vector.extract_strided_slice %746 {offsets = [2, 0], sizes = [1, 128], strides = [1, 1]} : vector<5x128xf32> to vector<1x128xf32>
    %763 = vector.extract_strided_slice %37 {offsets = [0, 2], sizes = [5, 1], strides = [1, 1]} : vector<5x5xf32> to vector<5x1xf32>
    %764 = vector.broadcast %762 : vector<1x128xf32> to vector<5x128xf32>
    %765 = vector.broadcast %763 : vector<5x1xf32> to vector<5x128xf32>
    %766 = arith.addf %764, %765 : vector<5x128xf32>
    %767 = arith.cmpf ogt, %766, %759 : vector<5x128xf32>
    %768 = arith.select %767, %766, %759 : vector<5x128xi1>, vector<5x128xf32>
    %c2_i32_197 = arith.constant 2 : i32
    %769 = vector.broadcast %c2_i32_197 : i32 to vector<5x128xi32>
    %770 = arith.select %767, %769, %761 : vector<5x128xi1>, vector<5x128xi32>
    %771 = vector.extract_strided_slice %746 {offsets = [3, 0], sizes = [1, 128], strides = [1, 1]} : vector<5x128xf32> to vector<1x128xf32>
    %772 = vector.extract_strided_slice %37 {offsets = [0, 3], sizes = [5, 1], strides = [1, 1]} : vector<5x5xf32> to vector<5x1xf32>
    %773 = vector.broadcast %771 : vector<1x128xf32> to vector<5x128xf32>
    %774 = vector.broadcast %772 : vector<5x1xf32> to vector<5x128xf32>
    %775 = arith.addf %773, %774 : vector<5x128xf32>
    %776 = arith.cmpf ogt, %775, %768 : vector<5x128xf32>
    %777 = arith.select %776, %775, %768 : vector<5x128xi1>, vector<5x128xf32>
    %c3_i32_198 = arith.constant 3 : i32
    %778 = vector.broadcast %c3_i32_198 : i32 to vector<5x128xi32>
    %779 = arith.select %776, %778, %770 : vector<5x128xi1>, vector<5x128xi32>
    %780 = vector.extract_strided_slice %746 {offsets = [4, 0], sizes = [1, 128], strides = [1, 1]} : vector<5x128xf32> to vector<1x128xf32>
    %781 = vector.extract_strided_slice %37 {offsets = [0, 4], sizes = [5, 1], strides = [1, 1]} : vector<5x5xf32> to vector<5x1xf32>
    %782 = vector.broadcast %780 : vector<1x128xf32> to vector<5x128xf32>
    %783 = vector.broadcast %781 : vector<5x1xf32> to vector<5x128xf32>
    %784 = arith.addf %782, %783 : vector<5x128xf32>
    %785 = arith.cmpf ogt, %784, %777 : vector<5x128xf32>
    %786 = arith.select %785, %784, %777 : vector<5x128xi1>, vector<5x128xf32>
    %c4_i32_199 = arith.constant 4 : i32
    %787 = vector.broadcast %c4_i32_199 : i32 to vector<5x128xi32>
    %788 = arith.select %785, %787, %779 : vector<5x128xi1>, vector<5x128xi32>
    %c1_i32_200 = arith.constant 1 : i32
    %789 = arith.subi %c6_i32_194, %c1_i32_200 : i32
    %790 = arith.index_cast %789 : i32 to index
    %c0_201 = arith.constant 0 : index
    %c0_202 = arith.constant 0 : index
    %791 = vector.load %arg17[%790, %c0_201, %c0_202] : memref<7x5x128xi32, #tpu.memory_space<vmem>>, vector<1x5x128xi32>
    %792 = vector.shape_cast %791 : vector<1x5x128xi32> to vector<5x128xi32>
    %793 = vector.shape_cast %788 : vector<5x128xi32> to vector<1x5x128xi32>
    tpu.vector_store %arg17[%790, %c0_201, %c0_202], %793 {strides = array<i32>} : memref<7x5x128xi32, #tpu.memory_space<vmem>>, vector<1x5x128xi32>,
    %c128_i32_203 = arith.constant 128 : i32
    %794 = arith.muli %c6_i32_194, %c128_i32_203 : i32
    %795 = tpu.assume_multiple %794, 128 : i32
    %c0_204 = arith.constant 0 : index
    %796 = arith.index_cast %795 : i32 to index
    %797 = vector.load %arg16[%c0_204, %796] : memref<5x1024xf32, #tpu.memory_space<vmem>>, vector<5x128xf32>
    %798 = arith.addf %786, %797 : vector<5x128xf32>
    %c7_i32_205 = arith.constant 7 : i32
    %799 = vector.extract_strided_slice %798 {offsets = [0, 0], sizes = [1, 128], strides = [1, 1]} : vector<5x128xf32> to vector<1x128xf32>
    %800 = vector.extract_strided_slice %37 {offsets = [0, 0], sizes = [5, 1], strides = [1, 1]} : vector<5x5xf32> to vector<5x1xf32>
    %801 = vector.broadcast %799 : vector<1x128xf32> to vector<5x128xf32>
    %802 = vector.broadcast %800 : vector<5x1xf32> to vector<5x128xf32>
    %803 = arith.addf %801, %802 : vector<5x128xf32>
    %c0_i32_206 = arith.constant 0 : i32
    %804 = vector.broadcast %c0_i32_206 : i32 to vector<5x128xi32>
    %805 = vector.extract_strided_slice %798 {offsets = [1, 0], sizes = [1, 128], strides = [1, 1]} : vector<5x128xf32> to vector<1x128xf32>
    %806 = vector.extract_strided_slice %37 {offsets = [0, 1], sizes = [5, 1], strides = [1, 1]} : vector<5x5xf32> to vector<5x1xf32>
    %807 = vector.broadcast %805 : vector<1x128xf32> to vector<5x128xf32>
    %808 = vector.broadcast %806 : vector<5x1xf32> to vector<5x128xf32>
    %809 = arith.addf %807, %808 : vector<5x128xf32>
    %810 = arith.cmpf ogt, %809, %803 : vector<5x128xf32>
    %811 = arith.select %810, %809, %803 : vector<5x128xi1>, vector<5x128xf32>
    %c1_i32_207 = arith.constant 1 : i32
    %812 = vector.broadcast %c1_i32_207 : i32 to vector<5x128xi32>
    %813 = arith.select %810, %812, %804 : vector<5x128xi1>, vector<5x128xi32>
    %814 = vector.extract_strided_slice %798 {offsets = [2, 0], sizes = [1, 128], strides = [1, 1]} : vector<5x128xf32> to vector<1x128xf32>
    %815 = vector.extract_strided_slice %37 {offsets = [0, 2], sizes = [5, 1], strides = [1, 1]} : vector<5x5xf32> to vector<5x1xf32>
    %816 = vector.broadcast %814 : vector<1x128xf32> to vector<5x128xf32>
    %817 = vector.broadcast %815 : vector<5x1xf32> to vector<5x128xf32>
    %818 = arith.addf %816, %817 : vector<5x128xf32>
    %819 = arith.cmpf ogt, %818, %811 : vector<5x128xf32>
    %820 = arith.select %819, %818, %811 : vector<5x128xi1>, vector<5x128xf32>
    %c2_i32_208 = arith.constant 2 : i32
    %821 = vector.broadcast %c2_i32_208 : i32 to vector<5x128xi32>
    %822 = arith.select %819, %821, %813 : vector<5x128xi1>, vector<5x128xi32>
    %823 = vector.extract_strided_slice %798 {offsets = [3, 0], sizes = [1, 128], strides = [1, 1]} : vector<5x128xf32> to vector<1x128xf32>
    %824 = vector.extract_strided_slice %37 {offsets = [0, 3], sizes = [5, 1], strides = [1, 1]} : vector<5x5xf32> to vector<5x1xf32>
    %825 = vector.broadcast %823 : vector<1x128xf32> to vector<5x128xf32>
    %826 = vector.broadcast %824 : vector<5x1xf32> to vector<5x128xf32>
    %827 = arith.addf %825, %826 : vector<5x128xf32>
    %828 = arith.cmpf ogt, %827, %820 : vector<5x128xf32>
    %829 = arith.select %828, %827, %820 : vector<5x128xi1>, vector<5x128xf32>
    %c3_i32_209 = arith.constant 3 : i32
    %830 = vector.broadcast %c3_i32_209 : i32 to vector<5x128xi32>
    %831 = arith.select %828, %830, %822 : vector<5x128xi1>, vector<5x128xi32>
    %832 = vector.extract_strided_slice %798 {offsets = [4, 0], sizes = [1, 128], strides = [1, 1]} : vector<5x128xf32> to vector<1x128xf32>
    %833 = vector.extract_strided_slice %37 {offsets = [0, 4], sizes = [5, 1], strides = [1, 1]} : vector<5x5xf32> to vector<5x1xf32>
    %834 = vector.broadcast %832 : vector<1x128xf32> to vector<5x128xf32>
    %835 = vector.broadcast %833 : vector<5x1xf32> to vector<5x128xf32>
    %836 = arith.addf %834, %835 : vector<5x128xf32>
    %837 = arith.cmpf ogt, %836, %829 : vector<5x128xf32>
    %838 = arith.select %837, %836, %829 : vector<5x128xi1>, vector<5x128xf32>
    %c4_i32_210 = arith.constant 4 : i32
    %839 = vector.broadcast %c4_i32_210 : i32 to vector<5x128xi32>
    %840 = arith.select %837, %839, %831 : vector<5x128xi1>, vector<5x128xi32>
    %c1_i32_211 = arith.constant 1 : i32
    %841 = arith.subi %c7_i32_205, %c1_i32_211 : i32
    %842 = arith.index_cast %841 : i32 to index
    %c0_212 = arith.constant 0 : index
    %c0_213 = arith.constant 0 : index
    %843 = vector.load %arg17[%842, %c0_212, %c0_213] : memref<7x5x128xi32, #tpu.memory_space<vmem>>, vector<1x5x128xi32>
    %844 = vector.shape_cast %843 : vector<1x5x128xi32> to vector<5x128xi32>
    %845 = vector.shape_cast %840 : vector<5x128xi32> to vector<1x5x128xi32>
    tpu.vector_store %arg17[%842, %c0_212, %c0_213], %845 {strides = array<i32>} : memref<7x5x128xi32, #tpu.memory_space<vmem>>, vector<1x5x128xi32>,
    %c128_i32_214 = arith.constant 128 : i32
    %846 = arith.muli %c7_i32_205, %c128_i32_214 : i32
    %847 = tpu.assume_multiple %846, 128 : i32
    %c0_215 = arith.constant 0 : index
    %848 = arith.index_cast %847 : i32 to index
    %849 = vector.load %arg16[%c0_215, %848] : memref<5x1024xf32, #tpu.memory_space<vmem>>, vector<5x128xf32>
    %850 = arith.addf %838, %849 : vector<5x128xf32>
    %c7_i32_216 = arith.constant 7 : i32
    %851 = vector.broadcast %35 : vector<5x1xf32> to vector<5x128xf32>
    %852 = arith.addf %850, %851 : vector<5x128xf32>
    %853 = vector.extract_strided_slice %852 {offsets = [0, 0], sizes = [1, 128], strides = [1, 1]} : vector<5x128xf32> to vector<1x128xf32>
    %c0_i32_217 = arith.constant 0 : i32
    %854 = vector.broadcast %c0_i32_217 : i32 to vector<1x128xi32>
    %855 = vector.extract_strided_slice %852 {offsets = [1, 0], sizes = [1, 128], strides = [1, 1]} : vector<5x128xf32> to vector<1x128xf32>
    %856 = arith.cmpf ogt, %855, %853 : vector<1x128xf32>
    %857 = arith.select %856, %855, %853 : vector<1x128xi1>, vector<1x128xf32>
    %c1_i32_218 = arith.constant 1 : i32
    %858 = vector.broadcast %c1_i32_218 : i32 to vector<1x128xi32>
    %859 = arith.select %856, %858, %854 : vector<1x128xi1>, vector<1x128xi32>
    %860 = vector.extract_strided_slice %852 {offsets = [2, 0], sizes = [1, 128], strides = [1, 1]} : vector<5x128xf32> to vector<1x128xf32>
    %861 = arith.cmpf ogt, %860, %857 : vector<1x128xf32>
    %862 = arith.select %861, %860, %857 : vector<1x128xi1>, vector<1x128xf32>
    %c2_i32_219 = arith.constant 2 : i32
    %863 = vector.broadcast %c2_i32_219 : i32 to vector<1x128xi32>
    %864 = arith.select %861, %863, %859 : vector<1x128xi1>, vector<1x128xi32>
    %865 = vector.extract_strided_slice %852 {offsets = [3, 0], sizes = [1, 128], strides = [1, 1]} : vector<5x128xf32> to vector<1x128xf32>
    %866 = arith.cmpf ogt, %865, %862 : vector<1x128xf32>
    %867 = arith.select %866, %865, %862 : vector<1x128xi1>, vector<1x128xf32>
    %c3_i32_220 = arith.constant 3 : i32
    %868 = vector.broadcast %c3_i32_220 : i32 to vector<1x128xi32>
    %869 = arith.select %866, %868, %864 : vector<1x128xi1>, vector<1x128xi32>
    %870 = vector.extract_strided_slice %852 {offsets = [4, 0], sizes = [1, 128], strides = [1, 1]} : vector<5x128xf32> to vector<1x128xf32>
    %871 = arith.cmpf ogt, %870, %867 : vector<1x128xf32>
    %c4_i32_221 = arith.constant 4 : i32
    %872 = vector.broadcast %c4_i32_221 : i32 to vector<1x128xi32>
    %873 = arith.select %871, %872, %869 : vector<1x128xi1>, vector<1x128xi32>
    %c0_222 = arith.constant 0 : index
    %c7 = arith.constant 7 : index
    %c0_223 = arith.constant 0 : index
    %874 = vector.load %arg15[%c0_222, %c7, %c0_223] : memref<1x8x128xi32, #tpu.memory_space<vmem>>, vector<1x1x128xi32>
    %875 = vector.shape_cast %874 : vector<1x1x128xi32> to vector<1x128xi32>
    %876 = vector.shape_cast %873 : vector<1x128xi32> to vector<1x1x128xi32>
    tpu.vector_store %arg15[%c0_222, %c7, %c0_223], %876 {strides = array<i32>} : memref<1x8x128xi32, #tpu.memory_space<vmem>>, vector<1x1x128xi32>,
    %c0_i32_224 = arith.constant 0 : i32
    %c6_i32_225 = arith.constant 6 : i32
    %877 = arith.subi %c6_i32_225, %c0_i32_224 : i32
    %878 = vector.broadcast %873 : vector<1x128xi32> to vector<5x128xi32>
    %879 = arith.cmpi eq, %39, %878 : vector<5x128xi32>
    %880 = arith.index_cast %877 : i32 to index
    %c0_226 = arith.constant 0 : index
    %c0_227 = arith.constant 0 : index
    %881 = vector.load %arg17[%880, %c0_226, %c0_227] : memref<7x5x128xi32, #tpu.memory_space<vmem>>, vector<1x5x128xi32>
    %882 = vector.shape_cast %881 : vector<1x5x128xi32> to vector<5x128xi32>
    %c0_i32_228 = arith.constant 0 : i32
    %883 = vector.broadcast %c0_i32_228 : i32 to vector<5x128xi32>
    %884 = arith.select %879, %882, %883 : vector<5x128xi1>, vector<5x128xi32>
    %cst_229 = arith.constant dense<0> : vector<128xi32>
    %885 = vector.multi_reduction <add>, %884, %cst_229 [0] : vector<5x128xi32> to vector<128xi32>
    %886 = vector.shape_cast %885 : vector<128xi32> to vector<1x128xi32>
    %c0_230 = arith.constant 0 : index
    %887 = arith.index_cast %877 : i32 to index
    %c0_231 = arith.constant 0 : index
    %888 = vector.load %arg15[%c0_230, %887, %c0_231] : memref<1x8x128xi32, #tpu.memory_space<vmem>>, vector<1x1x128xi32>
    %889 = vector.shape_cast %888 : vector<1x1x128xi32> to vector<1x128xi32>
    %890 = vector.shape_cast %886 : vector<1x128xi32> to vector<1x1x128xi32>
    tpu.vector_store %arg15[%c0_230, %887, %c0_231], %890 {strides = array<i32>} : memref<1x8x128xi32, #tpu.memory_space<vmem>>, vector<1x1x128xi32>,
    %c1_i32_232 = arith.constant 1 : i32
    %c6_i32_233 = arith.constant 6 : i32
    %891 = arith.subi %c6_i32_233, %c1_i32_232 : i32
    %892 = vector.broadcast %886 : vector<1x128xi32> to vector<5x128xi32>
    %893 = arith.cmpi eq, %39, %892 : vector<5x128xi32>
    %894 = arith.index_cast %891 : i32 to index
    %c0_234 = arith.constant 0 : index
    %c0_235 = arith.constant 0 : index
    %895 = vector.load %arg17[%894, %c0_234, %c0_235] : memref<7x5x128xi32, #tpu.memory_space<vmem>>, vector<1x5x128xi32>
    %896 = vector.shape_cast %895 : vector<1x5x128xi32> to vector<5x128xi32>
    %c0_i32_236 = arith.constant 0 : i32
    %897 = vector.broadcast %c0_i32_236 : i32 to vector<5x128xi32>
    %898 = arith.select %893, %896, %897 : vector<5x128xi1>, vector<5x128xi32>
    %cst_237 = arith.constant dense<0> : vector<128xi32>
    %899 = vector.multi_reduction <add>, %898, %cst_237 [0] : vector<5x128xi32> to vector<128xi32>
    %900 = vector.shape_cast %899 : vector<128xi32> to vector<1x128xi32>
    %c0_238 = arith.constant 0 : index
    %901 = arith.index_cast %891 : i32 to index
    %c0_239 = arith.constant 0 : index
    %902 = vector.load %arg15[%c0_238, %901, %c0_239] : memref<1x8x128xi32, #tpu.memory_space<vmem>>, vector<1x1x128xi32>
    %903 = vector.shape_cast %902 : vector<1x1x128xi32> to vector<1x128xi32>
    %904 = vector.shape_cast %900 : vector<1x128xi32> to vector<1x1x128xi32>
    tpu.vector_store %arg15[%c0_238, %901, %c0_239], %904 {strides = array<i32>} : memref<1x8x128xi32, #tpu.memory_space<vmem>>, vector<1x1x128xi32>,
    %c2_i32_240 = arith.constant 2 : i32
    %c6_i32_241 = arith.constant 6 : i32
    %905 = arith.subi %c6_i32_241, %c2_i32_240 : i32
    %906 = vector.broadcast %900 : vector<1x128xi32> to vector<5x128xi32>
    %907 = arith.cmpi eq, %39, %906 : vector<5x128xi32>
    %908 = arith.index_cast %905 : i32 to index
    %c0_242 = arith.constant 0 : index
    %c0_243 = arith.constant 0 : index
    %909 = vector.load %arg17[%908, %c0_242, %c0_243] : memref<7x5x128xi32, #tpu.memory_space<vmem>>, vector<1x5x128xi32>
    %910 = vector.shape_cast %909 : vector<1x5x128xi32> to vector<5x128xi32>
    %c0_i32_244 = arith.constant 0 : i32
    %911 = vector.broadcast %c0_i32_244 : i32 to vector<5x128xi32>
    %912 = arith.select %907, %910, %911 : vector<5x128xi1>, vector<5x128xi32>
    %cst_245 = arith.constant dense<0> : vector<128xi32>
    %913 = vector.multi_reduction <add>, %912, %cst_245 [0] : vector<5x128xi32> to vector<128xi32>
    %914 = vector.shape_cast %913 : vector<128xi32> to vector<1x128xi32>
    %c0_246 = arith.constant 0 : index
    %915 = arith.index_cast %905 : i32 to index
    %c0_247 = arith.constant 0 : index
    %916 = vector.load %arg15[%c0_246, %915, %c0_247] : memref<1x8x128xi32, #tpu.memory_space<vmem>>, vector<1x1x128xi32>
    %917 = vector.shape_cast %916 : vector<1x1x128xi32> to vector<1x128xi32>
    %918 = vector.shape_cast %914 : vector<1x128xi32> to vector<1x1x128xi32>
    tpu.vector_store %arg15[%c0_246, %915, %c0_247], %918 {strides = array<i32>} : memref<1x8x128xi32, #tpu.memory_space<vmem>>, vector<1x1x128xi32>,
    %c3_i32_248 = arith.constant 3 : i32
    %c6_i32_249 = arith.constant 6 : i32
    %919 = arith.subi %c6_i32_249, %c3_i32_248 : i32
    %920 = vector.broadcast %914 : vector<1x128xi32> to vector<5x128xi32>
    %921 = arith.cmpi eq, %39, %920 : vector<5x128xi32>
    %922 = arith.index_cast %919 : i32 to index
    %c0_250 = arith.constant 0 : index
    %c0_251 = arith.constant 0 : index
    %923 = vector.load %arg17[%922, %c0_250, %c0_251] : memref<7x5x128xi32, #tpu.memory_space<vmem>>, vector<1x5x128xi32>
    %924 = vector.shape_cast %923 : vector<1x5x128xi32> to vector<5x128xi32>
    %c0_i32_252 = arith.constant 0 : i32
    %925 = vector.broadcast %c0_i32_252 : i32 to vector<5x128xi32>
    %926 = arith.select %921, %924, %925 : vector<5x128xi1>, vector<5x128xi32>
    %cst_253 = arith.constant dense<0> : vector<128xi32>
    %927 = vector.multi_reduction <add>, %926, %cst_253 [0] : vector<5x128xi32> to vector<128xi32>
    %928 = vector.shape_cast %927 : vector<128xi32> to vector<1x128xi32>
    %c0_254 = arith.constant 0 : index
    %929 = arith.index_cast %919 : i32 to index
    %c0_255 = arith.constant 0 : index
    %930 = vector.load %arg15[%c0_254, %929, %c0_255] : memref<1x8x128xi32, #tpu.memory_space<vmem>>, vector<1x1x128xi32>
    %931 = vector.shape_cast %930 : vector<1x1x128xi32> to vector<1x128xi32>
    %932 = vector.shape_cast %928 : vector<1x128xi32> to vector<1x1x128xi32>
    tpu.vector_store %arg15[%c0_254, %929, %c0_255], %932 {strides = array<i32>} : memref<1x8x128xi32, #tpu.memory_space<vmem>>, vector<1x1x128xi32>,
    %c4_i32_256 = arith.constant 4 : i32
    %c6_i32_257 = arith.constant 6 : i32
    %933 = arith.subi %c6_i32_257, %c4_i32_256 : i32
    %934 = vector.broadcast %928 : vector<1x128xi32> to vector<5x128xi32>
    %935 = arith.cmpi eq, %39, %934 : vector<5x128xi32>
    %936 = arith.index_cast %933 : i32 to index
    %c0_258 = arith.constant 0 : index
    %c0_259 = arith.constant 0 : index
    %937 = vector.load %arg17[%936, %c0_258, %c0_259] : memref<7x5x128xi32, #tpu.memory_space<vmem>>, vector<1x5x128xi32>
    %938 = vector.shape_cast %937 : vector<1x5x128xi32> to vector<5x128xi32>
    %c0_i32_260 = arith.constant 0 : i32
    %939 = vector.broadcast %c0_i32_260 : i32 to vector<5x128xi32>
    %940 = arith.select %935, %938, %939 : vector<5x128xi1>, vector<5x128xi32>
    %cst_261 = arith.constant dense<0> : vector<128xi32>
    %941 = vector.multi_reduction <add>, %940, %cst_261 [0] : vector<5x128xi32> to vector<128xi32>
    %942 = vector.shape_cast %941 : vector<128xi32> to vector<1x128xi32>
    %c0_262 = arith.constant 0 : index
    %943 = arith.index_cast %933 : i32 to index
    %c0_263 = arith.constant 0 : index
    %944 = vector.load %arg15[%c0_262, %943, %c0_263] : memref<1x8x128xi32, #tpu.memory_space<vmem>>, vector<1x1x128xi32>
    %945 = vector.shape_cast %944 : vector<1x1x128xi32> to vector<1x128xi32>
    %946 = vector.shape_cast %942 : vector<1x128xi32> to vector<1x1x128xi32>
    tpu.vector_store %arg15[%c0_262, %943, %c0_263], %946 {strides = array<i32>} : memref<1x8x128xi32, #tpu.memory_space<vmem>>, vector<1x1x128xi32>,
    %c5_i32_264 = arith.constant 5 : i32
    %c6_i32_265 = arith.constant 6 : i32
    %947 = arith.subi %c6_i32_265, %c5_i32_264 : i32
    %948 = vector.broadcast %942 : vector<1x128xi32> to vector<5x128xi32>
    %949 = arith.cmpi eq, %39, %948 : vector<5x128xi32>
    %950 = arith.index_cast %947 : i32 to index
    %c0_266 = arith.constant 0 : index
    %c0_267 = arith.constant 0 : index
    %951 = vector.load %arg17[%950, %c0_266, %c0_267] : memref<7x5x128xi32, #tpu.memory_space<vmem>>, vector<1x5x128xi32>
    %952 = vector.shape_cast %951 : vector<1x5x128xi32> to vector<5x128xi32>
    %c0_i32_268 = arith.constant 0 : i32
    %953 = vector.broadcast %c0_i32_268 : i32 to vector<5x128xi32>
    %954 = arith.select %949, %952, %953 : vector<5x128xi1>, vector<5x128xi32>
    %cst_269 = arith.constant dense<0> : vector<128xi32>
    %955 = vector.multi_reduction <add>, %954, %cst_269 [0] : vector<5x128xi32> to vector<128xi32>
    %956 = vector.shape_cast %955 : vector<128xi32> to vector<1x128xi32>
    %c0_270 = arith.constant 0 : index
    %957 = arith.index_cast %947 : i32 to index
    %c0_271 = arith.constant 0 : index
    %958 = vector.load %arg15[%c0_270, %957, %c0_271] : memref<1x8x128xi32, #tpu.memory_space<vmem>>, vector<1x1x128xi32>
    %959 = vector.shape_cast %958 : vector<1x1x128xi32> to vector<1x128xi32>
    %960 = vector.shape_cast %956 : vector<1x128xi32> to vector<1x1x128xi32>
    tpu.vector_store %arg15[%c0_270, %957, %c0_271], %960 {strides = array<i32>} : memref<1x8x128xi32, #tpu.memory_space<vmem>>, vector<1x1x128xi32>,
    %c6_i32_272 = arith.constant 6 : i32
    %c6_i32_273 = arith.constant 6 : i32
    %961 = arith.subi %c6_i32_273, %c6_i32_272 : i32
    %962 = vector.broadcast %956 : vector<1x128xi32> to vector<5x128xi32>
    %963 = arith.cmpi eq, %39, %962 : vector<5x128xi32>
    %964 = arith.index_cast %961 : i32 to index
    %c0_274 = arith.constant 0 : index
    %c0_275 = arith.constant 0 : index
    %965 = vector.load %arg17[%964, %c0_274, %c0_275] : memref<7x5x128xi32, #tpu.memory_space<vmem>>, vector<1x5x128xi32>
    %966 = vector.shape_cast %965 : vector<1x5x128xi32> to vector<5x128xi32>
    %c0_i32_276 = arith.constant 0 : i32
    %967 = vector.broadcast %c0_i32_276 : i32 to vector<5x128xi32>
    %968 = arith.select %963, %966, %967 : vector<5x128xi1>, vector<5x128xi32>
    %cst_277 = arith.constant dense<0> : vector<128xi32>
    %969 = vector.multi_reduction <add>, %968, %cst_277 [0] : vector<5x128xi32> to vector<128xi32>
    %970 = vector.shape_cast %969 : vector<128xi32> to vector<1x128xi32>
    %c0_278 = arith.constant 0 : index
    %971 = arith.index_cast %961 : i32 to index
    %c0_279 = arith.constant 0 : index
    %972 = vector.load %arg15[%c0_278, %971, %c0_279] : memref<1x8x128xi32, #tpu.memory_space<vmem>>, vector<1x1x128xi32>
    %973 = vector.shape_cast %972 : vector<1x1x128xi32> to vector<1x128xi32>
    %974 = vector.shape_cast %970 : vector<1x128xi32> to vector<1x1x128xi32>
    tpu.vector_store %arg15[%c0_278, %971, %c0_279], %974 {strides = array<i32>} : memref<1x8x128xi32, #tpu.memory_space<vmem>>, vector<1x1x128xi32>,
    %c7_i32_280 = arith.constant 7 : i32
    return
  }
  func.func @transform_0(%arg0: i32) -> (i32, i32, i32) {
    %c0_i32 = arith.constant 0 : i32
    %c0_i32_0 = arith.constant 0 : i32
    %c0_i32_1 = arith.constant 0 : i32
    return %arg0, %c0_i32, %c0_i32_0 : i32, i32, i32
  }
  func.func @transform_1(%arg0: i32) -> (i32, i32) {
    %c0_i32 = arith.constant 0 : i32
    %c0_i32_0 = arith.constant 0 : i32
    %c0_i32_1 = arith.constant 0 : i32
    return %c0_i32, %c0_i32_0 : i32, i32
  }
  func.func @transform_2(%arg0: i32) -> (i32, i32) {
    %c0_i32 = arith.constant 0 : i32
    %c0_i32_0 = arith.constant 0 : i32
    %c0_i32_1 = arith.constant 0 : i32
    return %c0_i32, %c0_i32_0 : i32, i32
  }
  func.func @transform_3(%arg0: i32) -> (i32, i32) {
    %c0_i32 = arith.constant 0 : i32
    %c0_i32_0 = arith.constant 0 : i32
    %c0_i32_1 = arith.constant 0 : i32
    return %c0_i32, %c0_i32_0 : i32, i32
  }
  func.func @transform_4(%arg0: i32) -> (i32, i32) {
    %c0_i32 = arith.constant 0 : i32
    %c0_i32_0 = arith.constant 0 : i32
    %c0_i32_1 = arith.constant 0 : i32
    return %c0_i32, %c0_i32_0 : i32, i32
  }
  func.func @transform_5(%arg0: i32) -> (i32, i32) {
    %c0_i32 = arith.constant 0 : i32
    %c0_i32_0 = arith.constant 0 : i32
    %c0_i32_1 = arith.constant 0 : i32
    return %c0_i32, %c0_i32_0 : i32, i32
  }
  func.func @transform_6(%arg0: i32) -> (i32, i32) {
    %c0_i32 = arith.constant 0 : i32
    %c0_i32_0 = arith.constant 0 : i32
    %c0_i32_1 = arith.constant 0 : i32
    return %c0_i32, %c0_i32_0 : i32, i32
  }
  func.func @transform_7(%arg0: i32) -> (i32, i32) {
    %c0_i32 = arith.constant 0 : i32
    %c0_i32_0 = arith.constant 0 : i32
    %c0_i32_1 = arith.constant 0 : i32
    return %c0_i32, %c0_i32_0 : i32, i32
  }
  func.func @transform_8(%arg0: i32) -> (i32, i32) {
    %c0_i32 = arith.constant 0 : i32
    %c0_i32_0 = arith.constant 0 : i32
    %c0_i32_1 = arith.constant 0 : i32
    return %c0_i32, %c0_i32_0 : i32, i32
  }
  func.func @transform_9(%arg0: i32) -> (i32, i32) {
    %c0_i32 = arith.constant 0 : i32
    %c0_i32_0 = arith.constant 0 : i32
    %c0_i32_1 = arith.constant 0 : i32
    return %c0_i32, %c0_i32_0 : i32, i32
  }
  func.func @transform_10(%arg0: i32) -> (i32, i32, i32) {
    %c0_i32 = arith.constant 0 : i32
    %c0_i32_0 = arith.constant 0 : i32
    %c0_i32_1 = arith.constant 0 : i32
    return %arg0, %c0_i32, %c0_i32_0 : i32, i32, i32
  }
  func.func @transform_11(%arg0: i32) -> (i32, i32, i32) {
    %c0_i32 = arith.constant 0 : i32
    %c0_i32_0 = arith.constant 0 : i32
    %c0_i32_1 = arith.constant 0 : i32
    return %arg0, %c0_i32, %c0_i32_0 : i32, i32, i32
  }
  func.func @transform_12(%arg0: i32) -> (i32, i32, i32) {
    %c0_i32 = arith.constant 0 : i32
    %c0_i32_0 = arith.constant 0 : i32
    %c0_i32_1 = arith.constant 0 : i32
    return %arg0, %c0_i32, %c0_i32_0 : i32, i32, i32
  }
  func.func @transform_13(%arg0: i32) -> (i32, i32, i32) {
    %c0_i32 = arith.constant 0 : i32
    %c0_i32_0 = arith.constant 0 : i32
    %c0_i32_1 = arith.constant 0 : i32
    return %arg0, %c0_i32, %c0_i32_0 : i32, i32, i32
  }
  func.func @transform_14(%arg0: i32) -> (i32, i32, i32) {
    %c0_i32 = arith.constant 0 : i32
    %c0_i32_0 = arith.constant 0 : i32
    %c0_i32_1 = arith.constant 0 : i32
    return %arg0, %c0_i32, %c0_i32_0 : i32, i32, i32
  }
}

</mosaic_0001>

<bundles_post_ra>
// kernel: tpu_custom_call.1
= control target key start
LH: loop header
LB: loop body
LE: loop exit
PB: predicated region body
PF: predicated region fallthrough
CT: control target
= control target key end

     0   :  { %20 = vsyncpa [#allocation5], 0  ;;  %s3234_s0 = inlined_call_operand.hbm [shape: f32[1,32,1024], index: 0, kind: input, shape index: {}]   ;;  %s3235_s1 = inlined_call_operand.vmem [shape: f32[5,32], index: 1, kind: input, shape index: {}]   ;;  %s3236_s2 = inlined_call_operand.vmem [shape: f32[5,1], index: 2, kind: input, shape index: {}]   ;;  %s3237_s3 = inlined_call_operand.vmem [shape: f32[5,1], index: 3, kind: input, shape index: {}]   ;;  %s3238_s4 = inlined_call_operand.vmem [shape: f32[5,1], index: 4, kind: input, shape index: {}]   ;;  %s3239_s5 = inlined_call_operand.vmem [shape: f32[5,1], index: 5, kind: input, shape index: {}]   ;;  %s3240_s6 = inlined_call_operand.vmem [shape: f32[5,1], index: 6, kind: input, shape index: {}]   ;;  %s3241_s7 = inlined_call_operand.vmem [shape: f32[5,5], index: 7, kind: input, shape index: {}]   ;;  %s3242_s8 = inlined_call_operand.vmem [shape: f32[5,5], index: 8, kind: input, shape index: {}]   ;;  %s3243_s9 = inlined_call_operand.vmem [shape: f32[25,1], index: 9, kind: input, shape index: {}]   ;;  %s3244_s10 = inlined_call_operand.vmem [shape: s32[1,8,128], index: 10, kind: input, shape index: {}]   ;;  %s3245_s11 = inlined_call_operand.vmem [shape: f32[1,8,128], index: 11, kind: input, shape index: {}]   ;;  %s3246_s12 = inlined_call_operand.vmem [shape: f32[1,8,128], index: 12, kind: input, shape index: {}]   ;;  %s3247_s13 = inlined_call_operand.hbm [shape: f32[1,1,128], index: 13, kind: output, shape index: {0}]   ;;  %s3248_s14 = inlined_call_operand.hbm [shape: s32[1,8,128], index: 14, kind: output, shape index: {1}]  }
   0x1   :  { %21 = vsyncpa [#allocation6], 0 }
   0x2   :  { %22 = vsyncpa [#allocation9], 0  ;;  %s27_s15 = sshll.u32 %s3234_s0, 4  ;;  %s2107_s16 = smov [#allocation4]   ;;  %s28_s15 = int_to_ptr.hbm [resolvable:$true] %s27_s15 }
   0x3   :  { %s29_s17 = sshll.u32 %s2107_s16, 4  ;;  %s2108_s18 = smov 1024   ;;  %s30_s17 = int_to_ptr.vmem [resolvable:$true] %s29_s17 }
   0x4   :  { %s2109_s19 = smov 64  }
   0x5   :  { %35 = dma.hbm_to_vmem [thread:$0]  %s28_s15, 4096, %s30_s17, [#allocation5], %s2108_s18, %s2108_s18, %s2109_s19  }
   0x6   :  { %2101 = dma.done.wait [#allocation5], 4096  }
   0x7   :  { %2102 = vsyncadd [#allocation5], 4294963200  ;;  %v3251_v0 = vmov 0   ;;  %v89_v1 = vld [vmem:[#allocation4 + $0xc0] sm:$0xff]  ;;  %v90_v2 = vld [vmem:[#allocation4 + $0xc8] sm:$0xff]  ;;  %vm103_vm0 = vcmask 261120   ;;  %v559_v35 = vlaneseq }
   0x8   :  { %1882 = vset.pattern.permute.xlu0 %v3251_v0  ;;  %1883 = vset.pattern.permute.xlu1 %v3251_v0  ;;  %v91_v3 = vld [vmem:[#allocation4 + $0xd0] sm:$0xff]  ;;  %v92_v4 = vld [vmem:[#allocation4 + $0xd8] sm:$0xff]  ;;  %v81_v5 = vld [vmem:[#allocation4 + $0x80] sm:$0xff]  ;;  %v2111_v47 = vmov 2   ;;  %v2112_v49 = vmov 1   ;;  %v2113_v50 = vmov 3  }
   0x9   :  { %119 = vmatpush.msra.mxu0 %v89_v1  ;;  %139 = vmatpush.msra.mxu1 %v90_v2  ;;  %v82_v6 = vld [vmem:[#allocation4 + $0x88] sm:$0xff]  ;;  %v83_v7 = vld [vmem:[#allocation4 + $0x90] sm:$0xff]  ;;  %v84_v8 = vld [vmem:[#allocation4 + $0x98] sm:$0xff]  ;;  %v2218_v38 = vshrl.u32 %v559_v35, 7  ;;  %v2114_v51 = vmov 4   ;;  %v2115_v56 = vmov 5.0  }
   0xa   :  { %159 = vmatpush.msra.mxu2 %v91_v3  ;;  %179 = vmatpush.msra.mxu3 %v92_v4  ;;  %v73_v9 = vld [vmem:[#allocation4 + $0x40] sm:$0xff]  ;;  %v74_v10 = vld [vmem:[#allocation4 + $0x48] sm:$0xff]  ;;  %v75_v11 = vld [vmem:[#allocation4 + $0x50] sm:$0xff]  ;;  %1919 = vrcp.f32 %v2115_v56  ;;  %vm267_vm1 = vcmask 1044480   ;;  %s2117_s0 = smov [#allocation8]  }
   0xb   :  { %120 = vmatpush.msra.mxu0 %v81_v5  ;;  %140 = vmatpush.msra.mxu1 %v82_v6  ;;  %v76_v12 = vld [vmem:[#allocation4 + $0x58] sm:$0xff]  ;;  %v65_v13 = vld [vmem:[#allocation4] sm:$0xff]  ;;  %v66_v14 = vld [vmem:[#allocation4 + $0x8] sm:$0xff]  ;;  %s1809_s20 = sshll.u32 %s2117_s0, 4  ;;  %s1810_s20 = int_to_ptr.vmem [resolvable:$true] %s1809_s20 }
   0xc   :  { %160 = vmatpush.msra.mxu2 %v83_v7  ;;  %180 = vmatpush.msra.mxu3 %v84_v8  ;;  %v67_v15 = vld [vmem:[#allocation4 + $0x10] sm:$0xff]  ;;  %v68_v16 = vld [vmem:[#allocation4 + $0x18] sm:$0xff]  ;;  %v64_v17 = vld [vmem:[%s3235_s1] sm:$0x1f]  ;;  %s1811_s1 = sshll.u32 %s3248_s14, 4  ;;  %s1812_s1 = int_to_ptr.hbm [resolvable:$true] %s1811_s1 }
   0xd   :  { %121 = vmatpush.msra.mxu0 %v73_v9  ;;  %141 = vmatpush.msra.mxu1 %v74_v10  ;;  %v93_v18 = vld [vmem:[#allocation4 + $0xe0] sm:$0xff]  ;;  %v94_v19 = vld [vmem:[#allocation4 + $0xe8] sm:$0xff]  ;;  %v95_v20 = vld [vmem:[#allocation4 + $0xf0] sm:$0xff] }
   0xe   :  { %161 = vmatpush.msra.mxu2 %v75_v11  ;;  %181 = vmatpush.msra.mxu3 %v76_v12  ;;  %v96_v21 = vld [vmem:[#allocation4 + $0xf8] sm:$0xff]  ;;  %v97_v22 = vld [vmem:[%s3236_s2] sm:$0x1f]  ;;  %v85_v23 = vld [vmem:[#allocation4 + $0xa0] sm:$0xff]  ;;  %s1800_s2 = sshll.u32 %s3247_s13, 4  ;;  %s1801_s2 = int_to_ptr.hbm [resolvable:$true] %s1800_s2 }
   0xf   :  { %122 = vmatpush.msra.mxu0 %v65_v13  ;;  %142 = vmatpush.msra.mxu1 %v66_v14  ;;  %v86_v24 = vld [vmem:[#allocation4 + $0xa8] sm:$0xff]  ;;  %v87_v25 = vld [vmem:[#allocation4 + $0xb0] sm:$0xff]  ;;  %v88_v26 = vld [vmem:[#allocation4 + $0xb8] sm:$0xff] }
  0x10   :  { %162 = vmatpush.msra.mxu2 %v67_v15  ;;  %182 = vmatpush.msra.mxu3 %v68_v16  ;;  %v77_v27 = vld [vmem:[#allocation4 + $0x60] sm:$0xff]  ;;  %v78_v28 = vld [vmem:[#allocation4 + $0x68] sm:$0xff]  ;;  %v79_v29 = vld [vmem:[#allocation4 + $0x70] sm:$0xff]  ;;  %v1920_v57 = vpop.eup %1919 }
  0x11   :  { %1826 = vmatmul.msk.f32.vlgmr.msra.gmra.mxu0 %vm103_vm0, %v64_v17  ;;  %1827 = vmatmul.msk.f32.vlgmr.msra.gmra.mxu1 %vm103_vm0, %v64_v17  ;;  %v80_v30 = vld [vmem:[#allocation4 + $0x78] sm:$0xff]  ;;  %v69_v31 = vld [vmem:[#allocation4 + $0x20] sm:$0xff]  ;;  %v70_v32 = vld [vmem:[#allocation4 + $0x28] sm:$0xff]  ;;  %v325_v58 = vmul.f32 5.0, %v1920_v57  ;;  %vm329_vm2 = vweird.f32 %v1920_v57 }
  0x12   :  { %1828 = vmatmul.msk.f32.vlgmr.msra.gmra.mxu2 %vm103_vm0, %v64_v17  ;;  %1829 = vmatmul.msk.f32.vlgmr.msra.gmra.mxu3 %vm103_vm0, %v64_v17  ;;  %v71_v33 = vld [vmem:[#allocation4 + $0x30] sm:$0xff]  ;;  %v72_v34 = vld [vmem:[#allocation4 + $0x38] sm:$0xff]  ;;  %v515_v36 = vld [vmem:[%s3237_s3] sm:$0x1f] }
  0x13   :  { %199 = vmatpush.msrb.mxu0 %v93_v18  ;;  %219 = vmatpush.msrb.mxu1 %v94_v19  ;;  %v529_v37 = vld [vmem:[%s3238_s4] sm:$0x1f]  ;;  %v556_v48 = vld [vmem:[%s3243_s9 + $0x8] sm:$0xff]  ;;  %v557_v54 = vld [vmem:[%s3243_s9 + $0x10] sm:$0xff]  ;;  %v326_v63 = vsub.f32 1.0, %v325_v58 }
  0x14   :  { %239 = vmatpush.msrb.mxu2 %v95_v20  ;;  %259 = vmatpush.msrb.mxu3 %v96_v21  ;;  %v553_v39 = vld [vmem:[%s3241_s7] sm:$0x1f]  ;;  %v558_v55 = vld [vmem:[%s3243_s9 + $0x18] sm:$0x1] }
  0x15   :  { %100 = vperm.xlu0 %1882, %v97_v22   ;;  %200 = vmatpush.msrb.mxu0 %v85_v23  ;;  %v665_v40 = vperm.slane %v553_v39, 0  ;;  %v551_v41 = vld [vmem:[%s3239_s5] sm:$0x1f]  ;;  %v672_v42 = vperm.slane %v553_v39, 1  ;;  %v693_v43 = vperm.slane %v553_v39, 4  ;;  %v679_v44 = vperm.slane %v553_v39, 2 }
  0x16   :  { %220 = vmatpush.msrb.mxu1 %v86_v24  ;;  %240 = vmatpush.msrb.mxu2 %v87_v25  ;;  %v686_v45 = vperm.slane %v553_v39, 3  ;;  %v554_v46 = vld [vmem:[%s3242_s8] sm:$0x1f]  ;;  %v327_v6 = vmul.f32 %v1920_v57, %v326_v63 }
  0x17   :  { %260 = vmatpush.msrb.mxu3 %v88_v26  ;;  %201 = vmatpush.msrb.mxu0 %v77_v27  ;;  %v552_v52 = vld [vmem:[%s3240_s6] sm:$0x1f] }
  0x18   :  { %221 = vmatpush.msrb.mxu1 %v78_v28  ;;  %241 = vmatpush.msrb.mxu2 %v79_v29  ;;  %v555_v53 = vld [vmem:[%s3243_s9] sm:$0xff]  ;;  %v328_v15 = vadd.f32 %v1920_v57, %v327_v6 }
  0x19   :  { %261 = vmatpush.msrb.mxu3 %v80_v30  ;;  %202 = vmatpush.msrb.mxu0 %v69_v31 }
  0x1a   :  { %222 = vmatpush.msrb.mxu1 %v70_v32  ;;  %242 = vmatpush.msrb.mxu2 %v71_v33  ;;  %v2266_v28 = vsel %vm329_vm2, %v1920_v57, %v328_v15 }
  0x1b   :  { %262 = vmatpush.msrb.mxu3 %v72_v34  ;;  %1830 = vmatmul.msk.f32.vlgmr.msrb.gmra.mxu0 %vm103_vm0, %v64_v17 }
  0x1c   :  { %1831 = vmatmul.msk.f32.vlgmr.msrb.gmra.mxu1 %vm103_vm0, %v64_v17  ;;  %1832 = vmatmul.msk.f32.vlgmr.msrb.gmra.mxu2 %vm103_vm0, %v64_v17 }
  0x1d   :  { %1833 = vmatmul.msk.f32.vlgmr.msrb.gmra.mxu3 %vm103_vm0, %v64_v17  ;;  %518 = vperm.xlu0 %1882, %v515_v36  }
  0x1e   :  { %532 = vperm.xlu1 %1883, %v529_v37   ;;  %1884 = vset.pattern.permute.xlu2 %v2218_v38 }
  0x25   :  { %1885 = vset.pattern.permute.xlu0 %v2218_v38 }
  0x26   :  { %572 = vperm.xlu1 %1883, %v551_v41   ;;  %670 = vperm.xlu2 %1884, %v665_v40  }
  0x2d   :  { %677 = vperm.xlu0 %1885, %v672_v42  }
  0x2e   :  { %1886 = vset.pattern.permute.xlu1 %v2218_v38  ;;  %698 = vperm.xlu2 %1884, %v693_v43  }
  0x35   :  { %1889 = vset.pattern.permute.xlu0 %v2111_v47 }
  0x36   :  { %684 = vperm.xlu1 %1886, %v679_v44   ;;  %1503 = vperm.xlu0 %1889, %v554_v46  }
  0x37   :  { %691 = vperm.xlu2 %1884, %v686_v45  }
  0x3e   :  { %1887 = vset.pattern.permute.xlu1 %v3251_v0  ;;  %1894 = vset.pattern.permute.xlu0 %v3251_v0 }
  0x3f   :  { %1488 = vperm.xlu1 %1887, %v554_v46   ;;  %1888 = vset.pattern.permute.xlu2 %v2112_v49 }
  0x40   :  { %625 = vperm.xlu0 %1894, %v556_v48   ;;  %1494 = vperm.xlu2 %1888, %v554_v46  }
  0x47   :  { %1890 = vset.pattern.permute.xlu1 %v2113_v50 }
  0x48   :  { %1512 = vperm.xlu1 %1890, %v554_v46   ;;  %1891 = vset.pattern.permute.xlu2 %v2114_v51 }
  0x49   :  { %1521 = vperm.xlu2 %1891, %v554_v46   ;;  %1895 = vset.pattern.permute.xlu0 %v2114_v51 }
  0x50   :  { %1892 = vset.pattern.permute.xlu1 %v3251_v0 }
  0x51   :  { %1450 = vperm.xlu1 %1892, %v552_v52   ;;  %1893 = vset.pattern.permute.xlu2 %v3251_v0 }
  0x52   :  { %620 = vperm.xlu2 %1893, %v555_v53  }
  0x59   :  { %630 = vperm.xlu1 %1892, %v557_v54  }
  0x5a   :  { %635 = vperm.xlu2 %1893, %v558_v55  }
  0x87   :  { %v101_v59 = vpop.permute.xlu0 %100 }
  0x8e   :  { %v124_v60 = vpop.f32.mrf.mxu0  ;;  %v144_v61 = vpop.f32.mrf.mxu1 }
  0x8f   :  { %v125_v62 = vadd.f32 %v124_v60, %v101_v59  ;;  %v145_v1 = vadd.f32 %v144_v61, %v101_v59 }
  0x91   :  { %v268_v2 = vsel %vm267_vm1, %v125_v62, 0.0  ;;  %v275_v3 = vsel %vm267_vm1, %v145_v1, 0.0 }
  0x92   :  { %v269_v4 = vrot.slane %v268_v2, 4  ;;  %v276_v5 = vrot.slane %v275_v3, 4 }
  0x94   :  { %v270_v7 = vadd.f32 %v269_v4, %v268_v2  ;;  %v277_v8 = vadd.f32 %v276_v5, %v275_v3 }
  0x95   :  { %v164_v9 = vpop.f32.mrf.mxu2  ;;  %v184_v10 = vpop.f32.mrf.mxu3 }
  0x96   :  { %v271_v11 = vrot.slane %v270_v7, 2  ;;  %v278_v12 = vrot.slane %v277_v8, 2  ;;  %v2254_v13 = vadd.f32 %v164_v9, %v101_v59  ;;  %v2256_v14 = vadd.f32 %v184_v10, %v101_v59 }
  0x98   :  { %v272_v16 = vadd.f32 %v271_v11, %v270_v7  ;;  %v279_v17 = vadd.f32 %v278_v12, %v277_v8  ;;  %v282_v18 = vsel %vm267_vm1, %v2254_v13, 0.0  ;;  %v289_v19 = vsel %vm267_vm1, %v2256_v14, 0.0  ;;  %v204_v20 = vpop.f32.mrf.mxu0 }
  0x99   :  { %v283_v21 = vrot.slane %v282_v18, 4  ;;  %v290_v22 = vrot.slane %v289_v19, 4  ;;  %v2262_v23 = vadd.f32 %v204_v20, %v101_v59  ;;  %v224_v24 = vpop.f32.mrf.mxu1 }
  0x9a   :  { %v273_v25 = vrot.slane %v272_v16, 1  ;;  %v280_v26 = vrot.slane %v279_v17, 1  ;;  %v2264_v27 = vadd.f32 %v224_v24, %v101_v59 }
  0x9b   :  { %v284_v29 = vadd.f32 %v283_v21, %v282_v18  ;;  %v291_v30 = vadd.f32 %v290_v22, %v289_v19  ;;  %v296_v31 = vsel %vm267_vm1, %v2262_v23, 0.0 }
  0x9c   :  { %v274_v32 = vadd.f32 %v273_v25, %v272_v16  ;;  %v281_v33 = vadd.f32 %v280_v26, %v279_v17  ;;  %v297_v34 = vrot.slane %v296_v31, 4  ;;  %v303_v35 = vsel %vm267_vm1, %v2264_v27, 0.0 }
  0x9d   :  { %v285_v36 = vrot.slane %v284_v29, 2  ;;  %v292_v37 = vrot.slane %v291_v30, 2  ;;  %v304_v39 = vrot.slane %v303_v35, 4 }
  0x9e   :  { %v331_v40 = vmul.f32 %v2266_v28, %v274_v32  ;;  %v332_v41 = vmul.f32 %v2266_v28, %v281_v33  ;;  %v298_v42 = vadd.f32 %v297_v34, %v296_v31 }
  0x9f   :  { %v286_v43 = vadd.f32 %v285_v36, %v284_v29  ;;  %v293_v44 = vadd.f32 %v292_v37, %v291_v30  ;;  %v305_v45 = vadd.f32 %v304_v39, %v303_v35  ;;  %v244_v46 = vpop.f32.mrf.mxu2 }
  0xa0   :  { %v2274_v47 = vsub.f32 %v125_v62, %v331_v40  ;;  %v2276_v48 = vsub.f32 %v145_v1, %v332_v41  ;;  %v299_v49 = vrot.slane %v298_v42, 2  ;;  %v2278_v50 = vadd.f32 %v244_v46, %v101_v59  ;;  %v264_v51 = vpop.f32.mrf.mxu3 }
  0xa1   :  { %v287_v52 = vrot.slane %v286_v43, 1  ;;  %v294_v53 = vrot.slane %v293_v44, 1  ;;  %v306_v54 = vrot.slane %v305_v45, 2  ;;  %v2280_v55 = vadd.f32 %v264_v51, %v101_v59 }
  0xa2   :  { %v347_v56 = vmul.f32 %v2274_v47, %v2274_v47  ;;  %v348_v57 = vmul.f32 %v2276_v48, %v2276_v48  ;;  %v300_v58 = vadd.f32 %v299_v49, %v298_v42  ;;  %v310_v60 = vsel %vm267_vm1, %v2278_v50, 0.0 }
  0xa3   :  { %v288_v61 = vadd.f32 %v287_v52, %v286_v43  ;;  %v295_v62 = vadd.f32 %v294_v53, %v293_v44  ;;  %v307_v63 = vadd.f32 %v306_v54, %v305_v45  ;;  %v311_v1 = vrot.slane %v310_v60, 4 }
  0xa4   :  { %v355_v2 = vsel %vm267_vm1, %v347_v56, 0.0  ;;  %v362_v3 = vsel %vm267_vm1, %v348_v57, 0.0  ;;  %v301_v59 = vrot.slane %v300_v58, 1  ;;  %v317_v4 = vsel %vm267_vm1, %v2280_v55, 0.0 }
  0xa5   :  { %v356_v5 = vrot.slane %v355_v2, 4  ;;  %v363_v6 = vrot.slane %v362_v3, 4  ;;  %v333_v7 = vmul.f32 %v2266_v28, %v288_v61  ;;  %v334_v8 = vmul.f32 %v2266_v28, %v295_v62 }
  0xa6   :  { %v302_v9 = vadd.f32 %v301_v59, %v300_v58  ;;  %v308_v10 = vrot.slane %v307_v63, 1  ;;  %v312_v11 = vadd.f32 %v311_v1, %v310_v60  ;;  %v318_v12 = vrot.slane %v317_v4, 4 }
  0xa7   :  { %v357_v15 = vadd.f32 %v356_v5, %v355_v2  ;;  %v364_v16 = vadd.f32 %v363_v6, %v362_v3  ;;  %v2295_v17 = vsub.f32 %v2254_v13, %v333_v7  ;;  %v2298_v18 = vsub.f32 %v2256_v14, %v334_v8 }
  0xa8   :  { %v335_v19 = vmul.f32 %v2266_v28, %v302_v9  ;;  %v309_v20 = vadd.f32 %v308_v10, %v307_v63  ;;  %v313_v21 = vrot.slane %v312_v11, 2  ;;  %v319_v22 = vadd.f32 %v318_v12, %v317_v4 }
  0xa9   :  { %v358_v24 = vrot.slane %v357_v15, 2  ;;  %v365_v25 = vrot.slane %v364_v16, 2  ;;  %v349_v26 = vmul.f32 %v2295_v17, %v2295_v17  ;;  %v350_v29 = vmul.f32 %v2298_v18, %v2298_v18 }
  0xaa   :  { %v2306_v30 = vsub.f32 %v2262_v23, %v335_v19  ;;  %v336_v13 = vmul.f32 %v2266_v28, %v309_v20  ;;  %v314_v14 = vadd.f32 %v313_v21, %v312_v11  ;;  %v320_v31 = vrot.slane %v319_v22, 2 }
  0xab   :  { %v359_v32 = vadd.f32 %v358_v24, %v357_v15  ;;  %v366_v33 = vadd.f32 %v365_v25, %v364_v16  ;;  %v369_v34 = vsel %vm267_vm1, %v349_v26, 0.0  ;;  %v376_v35 = vsel %vm267_vm1, %v350_v29, 0.0 }
  0xac   :  { %v370_v36 = vrot.slane %v369_v34, 4  ;;  %v377_v37 = vrot.slane %v376_v35, 4  ;;  %v351_v39 = vmul.f32 %v2306_v30, %v2306_v30  ;;  %v2314_v40 = vsub.f32 %v2264_v27, %v336_v13 }
  0xad   :  { %v360_v23 = vrot.slane %v359_v32, 1  ;;  %v367_v41 = vrot.slane %v366_v33, 1  ;;  %v315_v42 = vrot.slane %v314_v14, 1  ;;  %v321_v43 = vadd.f32 %v320_v31, %v319_v22 }
  0xae   :  { %v371_v44 = vadd.f32 %v370_v36, %v369_v34  ;;  %v378_v45 = vadd.f32 %v377_v37, %v376_v35  ;;  %v383_v46 = vsel %vm267_vm1, %v351_v39, 0.0  ;;  %v352_v49 = vmul.f32 %v2314_v40, %v2314_v40  ;;  %v2351_v39 = vpop.permute.xlu1 %532 }
  0xaf   :  { %v361_v51 = vadd.f32 %v360_v23, %v359_v32  ;;  %v368_v52 = vadd.f32 %v367_v41, %v366_v33  ;;  %v384_v53 = vrot.slane %v383_v46, 4  ;;  %v316_v54 = vadd.f32 %v315_v42, %v314_v14 }
  0xb0   :  { %v372_v56 = vrot.slane %v371_v44, 2  ;;  %v379_v57 = vrot.slane %v378_v45, 2  ;;  %v390_v27 = vsel %vm267_vm1, %v352_v49, 0.0  ;;  %v322_v58 = vrot.slane %v321_v43, 1 }
  0xb1   :  { %v411_v60 = vmul.f32 %v361_v51, %v2266_v28  ;;  %v412_v61 = vmul.f32 %v368_v52, %v2266_v28  ;;  %v385_v62 = vadd.f32 %v384_v53, %v383_v46  ;;  %v391_v63 = vrot.slane %v390_v27, 4 }
  0xb2   :  { %v373_v1 = vadd.f32 %v372_v56, %v371_v44  ;;  %v380_v2 = vadd.f32 %v379_v57, %v378_v45  ;;  %v337_v3 = vmul.f32 %v2266_v28, %v316_v54  ;;  %v323_v59 = vadd.f32 %v322_v58, %v321_v43  ;;  %v2357_v45 = vpop.permute.xlu2 %670 }
  0xb3   :  { %v2323_v4 = vadd.f32 1e-05, %v411_v60  ;;  %v2325_v5 = vadd.f32 1e-05, %v412_v61  ;;  %v386_v6 = vrot.slane %v385_v62, 2  ;;  %v392_v7 = vadd.f32 %v391_v63, %v390_v27 }
  0xb4   :  { %v374_v8 = vrot.slane %v373_v1, 1  ;;  %v381_v9 = vrot.slane %v380_v2, 1  ;;  %v2328_v10 = vsub.f32 %v2278_v50, %v337_v3  ;;  %v338_v11 = vmul.f32 %v2266_v28, %v323_v59 }
  0xb5   :  { %1921 = vrsqrt.f32 %v2323_v4  ;;  %v387_v12 = vadd.f32 %v386_v6, %v385_v62  ;;  %v393_v19 = vrot.slane %v392_v7, 2  ;;  %vm433_vm3 = vweird.f32 %v2323_v4 }
  0xb6   :  { %1923 = vrsqrt.f32 %v2325_v5  ;;  %v375_v15 = vadd.f32 %v374_v8, %v373_v1  ;;  %v382_v16 = vadd.f32 %v381_v9, %v380_v2  ;;  %v353_v21 = vmul.f32 %v2328_v10, %v2328_v10 }
  0xb7   :  { %v388_v20 = vrot.slane %v387_v12, 1  ;;  %v2336_v22 = vsub.f32 %v2280_v55, %v338_v11  ;;  %v394_v25 = vadd.f32 %v393_v19, %v392_v7  ;;  %vm443_vm6 = vweird.f32 %v2325_v5  ;;  %v2376_v19 = vpop.permute.xlu0 %518 }
  0xb8   :  { %v413_v50 = vmul.f32 %v375_v15, %v2266_v28  ;;  %v414_v24 = vmul.f32 %v382_v16, %v2266_v28  ;;  %v397_v29 = vsel %vm267_vm1, %v353_v21, 0.0 }
  0xb9   :  { %v389_v26 = vadd.f32 %v388_v20, %v387_v12  ;;  %v354_v13 = vmul.f32 %v2336_v22, %v2336_v22  ;;  %v395_v32 = vrot.slane %v394_v25, 1  ;;  %v398_v33 = vrot.slane %v397_v29, 4 }
  0xba   :  { %v2343_v14 = vadd.f32 1e-05, %v413_v50  ;;  %v2345_v31 = vadd.f32 1e-05, %v414_v24  ;;  %v2379_v24 = vpop.permute.xlu2 %698 }
  0xbb   :  { %v1922_v34 = vpop.eup %1921  ;;  %v415_v55 = vmul.f32 %v389_v26, %v2266_v28  ;;  %v404_v37 = vsel %vm267_vm1, %v354_v13, 0.0  ;;  %v396_v43 = vadd.f32 %v395_v32, %v394_v25  ;;  %v399_v44 = vadd.f32 %v398_v33, %v397_v29 }
  0xbc   :  { %v1924_v35 = vpop.eup %1923  ;;  %v428_v36 = vmul.f32 %v1922_v34, %v2323_v4  ;;  %1925 = vrsqrt.f32 %v2343_v14  ;;  %v405_v49 = vrot.slane %v404_v37, 4  ;;  %vm434_vm4 = vweird.f32 %v1922_v34 }
  0xbd   :  { %v438_v23 = vmul.f32 %v1924_v35, %v2325_v5  ;;  %1927 = vrsqrt.f32 %v2345_v31  ;;  %v2355_v42 = vadd.f32 1e-05, %v415_v55  ;;  %v416_v52 = vmul.f32 %v396_v43, %v2266_v28  ;;  %vm435_vm7 = vmor %vm433_vm3, %vm434_vm4  ;;  %v2372_v5 = vpop.permute.xlu1 %572 }
  0xbe   :  { %v429_v41 = vmul.f32 %v1922_v34, %v428_v36  ;;  %v400_v54 = vrot.slane %v399_v44, 2  ;;  %v406_v58 = vadd.f32 %v405_v49, %v404_v37  ;;  %vm444_vm5 = vweird.f32 %v1924_v35 }
  0xbf   :  { %v439_v46 = vmul.f32 %v1924_v35, %v438_v23  ;;  %1929 = vrsqrt.f32 %v2355_v42  ;;  %v2362_v27 = vadd.f32 1e-05, %v416_v52  ;;  %vm453_vm8 = vweird.f32 %v2343_v14  ;;  %vm445_vm9 = vmor %vm443_vm6, %vm444_vm5 }
  0xc0   :  { %v430_v51 = vmul.f32 0.5, %v429_v41  ;;  %v401_v63 = vadd.f32 %v400_v54, %v399_v44  ;;  %vm463_vm10 = vweird.f32 %v2345_v31  ;;  %v407_v11 = vrot.slane %v406_v58, 2 }
  0xc1   :  { %v440_v53 = vmul.f32 0.5, %v439_v46  ;;  %1931 = vrsqrt.f32 %v2362_v27  ;;  %vm473_vm0 = vweird.f32 %v2355_v42  ;;  %vm483_vm4 = vweird.f32 %v2362_v27 }
  0xc2   :  { %v1926_v56 = vpop.eup %1925  ;;  %v431_v57 = vsub.f32 1.5, %v430_v51  ;;  %v402_v6 = vrot.slane %v401_v63, 1  ;;  %v408_v13 = vadd.f32 %v407_v11, %v406_v58 }
  0xc3   :  { %v1928_v60 = vpop.eup %1927  ;;  %v441_v61 = vsub.f32 1.5, %v440_v53  ;;  %v448_v62 = vmul.f32 %v1926_v56, %v2343_v14  ;;  %vm454_vm11 = vweird.f32 %v1926_v56 }
  0xc4   :  { %v432_v1 = vmul.f32 %v1922_v34, %v431_v57  ;;  %v458_v2 = vmul.f32 %v1928_v60, %v2345_v31  ;;  %v403_v50 = vadd.f32 %v402_v6, %v401_v63  ;;  %vm464_vm12 = vweird.f32 %v1928_v60  ;;  %vm455_vm14 = vmor %vm453_vm8, %vm454_vm11 }
  0xc5   :  { %v442_v3 = vmul.f32 %v1924_v35, %v441_v61  ;;  %v449_v59 = vmul.f32 %v1926_v56, %v448_v62  ;;  %v1930_v7 = vpop.eup %1929  ;;  %v409_v23 = vrot.slane %v408_v13, 1  ;;  %vm465_vm15 = vmor %vm463_vm10, %vm464_vm12  ;;  %v2400_v57 = vpop.permute.xlu1 %684 }
  0xc6   :  { %v436_v8 = vsel %vm435_vm7, %v1922_v34, %v432_v1  ;;  %v459_v9 = vmul.f32 %v1928_v60, %v458_v2  ;;  %v468_v4 = vmul.f32 %v1930_v7, %v2355_v42  ;;  %v417_v34 = vmul.f32 %v403_v50, %v2266_v28  ;;  %v2406_v62 = vpop.permute.xlu2 %691 }
  0xc7   :  { %v507_v12 = vmul.f32 %v436_v8, %v2274_v47  ;;  %v446_v15 = vsel %vm445_vm9, %v1924_v35, %v442_v3  ;;  %v450_v16 = vmul.f32 0.5, %v449_v59  ;;  %v1932_v32 = vpop.eup %1931  ;;  %vm474_vm13 = vweird.f32 %v1930_v7 }
  0xc8   :  { %v508_v20 = vmul.f32 %v446_v15, %v2276_v48  ;;  %v460_v21 = vmul.f32 0.5, %v459_v9  ;;  %v469_v29 = vmul.f32 %v1930_v7, %v468_v4  ;;  %v478_v48 = vmul.f32 %v1932_v32, %v2362_v27  ;;  %vm475_vm2 = vmor %vm473_vm0, %vm474_vm13 }
  0xc9   :  { %v521_v25 = vmul.f32 %v2376_v19, %v507_v12  ;;  %v451_v26 = vsub.f32 1.5, %v450_v16  ;;  %v2388_v37 = vadd.f32 1e-05, %v417_v34  ;;  %vm484_vm3 = vweird.f32 %v1932_v32 }
  0xca   :  { %v522_v47 = vmul.f32 %v2376_v19, %v508_v20  ;;  %v461_v33 = vsub.f32 1.5, %v460_v21  ;;  %v470_v35 = vmul.f32 0.5, %v469_v29  ;;  %v479_v46 = vmul.f32 %v1932_v32, %v478_v48  ;;  %vm485_vm5 = vmor %vm483_vm4, %vm484_vm3 }
  0xcb   :  { %v452_v55 = vmul.f32 %v1926_v56, %v451_v26  ;;  %v535_v41 = vadd.f32 %v2351_v39, %v521_v25  ;;  %1933 = vrsqrt.f32 %v2388_v37  ;;  %vm493_vm6 = vweird.f32 %v2388_v37 }
  0xcc   :  { %v462_v36 = vmul.f32 %v1928_v60, %v461_v33  ;;  %v471_v44 = vsub.f32 1.5, %v470_v35  ;;  %v536_v49 = vadd.f32 %v2351_v39, %v522_v47  ;;  %v480_v54 = vmul.f32 0.5, %v479_v46 }
  0xcd   :  { %v456_v43 = vsel %vm455_vm14, %v1926_v56, %v452_v55  ;;  %543 = vst [vmem:[#allocation2 + $0x30] sm:$0x1f] %v535_v41  ;;  %v410_v56 = vadd.f32 %v409_v23, %v408_v13  ;;  %v2429_v29 = vpop.permute.xlu1 %1488  ;;  %v2431_v13 = vpop.permute.xlu0 %677 }
  0xce   :  { %v509_v51 = vmul.f32 %v456_v43, %v2295_v17  ;;  %v466_v52 = vsel %vm465_vm15, %v1928_v60, %v462_v36  ;;  %v472_v53 = vmul.f32 %v1930_v7, %v471_v44  ;;  %544 = vst [vmem:[#allocation2] sm:$0x1f] %v536_v49  ;;  %v481_v42 = vsub.f32 1.5, %v480_v54  ;;  %v2439_v36 = vpop.permute.xlu2 %1494 }
  0xcf   :  { %v510_v14 = vmul.f32 %v466_v52, %v2298_v18  ;;  %v418_v60 = vmul.f32 %v410_v56, %v2266_v28 }
  0xd0   :  { %v523_v31 = vmul.f32 %v2376_v19, %v509_v51  ;;  %v476_v58 = vsel %vm475_vm2, %v1930_v7, %v472_v53  ;;  %v482_v63 = vmul.f32 %v1932_v32, %v481_v42 }
  0xd1   :  { %v524_v17 = vmul.f32 %v2376_v19, %v510_v14  ;;  %v511_v61 = vmul.f32 %v476_v58, %v2306_v30  ;;  %v2409_v1 = vadd.f32 1e-05, %v418_v60  ;;  %v1934_v3 = vpop.eup %1933 }
  0xd2   :  { %v537_v18 = vadd.f32 %v2351_v39, %v523_v31  ;;  %v486_v28 = vsel %vm485_vm5, %v1932_v32, %v482_v63  ;;  %v488_v30 = vmul.f32 %v1934_v3, %v2388_v37  ;;  %vm494_vm7 = vweird.f32 %v1934_v3 }
  0xd3   :  { %v538_v2 = vadd.f32 %v2351_v39, %v524_v17  ;;  %v525_v59 = vmul.f32 %v2376_v19, %v511_v61  ;;  %1935 = vrsqrt.f32 %v2409_v1  ;;  %v512_v7 = vmul.f32 %v486_v28, %v2314_v40  ;;  %vm495_vm8 = vmor %vm493_vm6, %vm494_vm7 }
  0xd4   :  { %545 = vst [vmem:[#allocation2 + $0x18] sm:$0x1f] %v537_v18  ;;  %v564_v6 = vld [vmem:[#allocation2 + $0x30] sm:$0x1f]  ;;  %v489_v9 = vmul.f32 %v1934_v3, %v488_v30  ;;  %vm503_vm11 = vweird.f32 %v2409_v1 }
  0xd5   :  { %546 = vst [vmem:[#allocation2 + $0x10] sm:$0x1f] %v538_v2  ;;  %v539_v27 = vadd.f32 %v2351_v39, %v525_v59  ;;  %v2419_v8 = vadd.f32 %v2372_v5, %v564_v6  ;;  %v526_v11 = vmul.f32 %v2376_v19, %v512_v7  ;;  %v2457_v59 = vpop.permute.xlu1 %1512  ;;  %v2459_v28 = vpop.permute.xlu0 %1503 }
  0xd6   :  { %v490_v4 = vmul.f32 0.5, %v489_v9 }
  0xd7   :  { %547 = vst [vmem:[#allocation2 + $0x8] sm:$0x1f] %v539_v27  ;;  %v664_v12 = vrot.slane %v2419_v8, 4  ;;  %v662_v15 = vrot.slane %v2419_v8, 2  ;;  %v663_v16 = vrot.slane %v2419_v8, 3  ;;  %v700_v20 = vperm.slane %v2419_v8, 0 }
  0xd8   :  { %v1492_v40 = vperm.slane %v2419_v8, 1  ;;  %v661_v21 = vrot.slane %v2419_v8, 1  ;;  %v540_v5 = vadd.f32 %v2351_v39, %v526_v11  ;;  %v491_v47 = vsub.f32 1.5, %v490_v4 }
  0xd9   :  { %v704_v50 = vperm.slane %v664_v12, 0  ;;  %v702_v25 = vperm.slane %v662_v15, 0  ;;  %v703_v26 = vperm.slane %v663_v16, 0  ;;  %v1936_v32 = vpop.eup %1935  ;;  %v710_v33 = vadd.f32 %v700_v20, %v2357_v45 }
  0xda   :  { %v498_v34 = vmul.f32 %v1936_v32, %v2409_v1  ;;  %548 = vst [vmem:[#allocation2 + $0x20] sm:$0x1f] %v540_v5  ;;  %v1491_v48 = vadd.f32 %v2429_v29, %v700_v20  ;;  %v492_v23 = vmul.f32 %v1934_v3, %v491_v47  ;;  %v1497_v43 = vadd.f32 %v2439_v36, %v1492_v40 }
  0xdb   :  { %v714_v55 = vadd.f32 %v704_v50, %v2379_v24  ;;  %v712_v35 = vadd.f32 %v702_v25, %v2400_v57  ;;  %v713_v41 = vadd.f32 %v703_v26, %v2406_v62  ;;  %v701_v37 = vperm.slane %v661_v21, 0 }
  0xdc   :  { %v499_v44 = vmul.f32 %v1936_v32, %v498_v34  ;;  %v496_v51 = vsel %vm495_vm8, %v1934_v3, %v492_v23  ;;  %v715_v53 = vsel %vm267_vm1, %v710_v33, -inf  ;;  %vm504_vm9 = vweird.f32 %v1936_v32  ;;  %v1529_v23 = vld [vmem:[#allocation2] sm:$0x1f] }
  0xdd   :  { %v719_v46 = vsel %vm267_vm1, %v714_v55, -inf  ;;  %v717_v49 = vsel %vm267_vm1, %v712_v35, -inf  ;;  %v718_v52 = vsel %vm267_vm1, %v713_v41, -inf  ;;  %v711_v14 = vadd.f32 %v701_v37, %v2431_v13  ;;  %vm505_vm12 = vmor %vm503_vm11, %vm504_vm9 }
  0xde   :  { %v513_v54 = vmul.f32 %v496_v51, %v2328_v10  ;;  %v500_v56 = vmul.f32 0.5, %v499_v44  ;;  %v720_v31 = vmax.f32 %v715_v53, %v719_v46  ;;  %vm1498_vm10 = vcmp.gt.f32.partialorder %v1497_v43, %v1491_v48 }
  0xdf   :  { %v716_v17 = vsel %vm267_vm1, %v711_v14, -inf  ;;  %v1510_v58 = vperm.slane %v2419_v8, 3  ;;  %v722_v61 = vmax.f32 %v717_v49, %v718_v52  ;;  %v1501_v63 = vperm.slane %v2419_v8, 2 }
  0xe0   :  { %v527_v42 = vmul.f32 %v2376_v19, %v513_v54  ;;  %v501_v60 = vsub.f32 1.5, %v500_v56  ;;  %v721_v18 = vmax.f32 %v720_v31, %v716_v17  ;;  %v1499_v30 = vsel %vm1498_vm10, %v1497_v43, %v1491_v48 }
  0xe1   :  { %v1500_v6 = vsel %vm1498_vm10, 1, %v3251_v0  ;;  %v1515_v1 = vadd.f32 %v2457_v59, %v1510_v58  ;;  %v1519_v7 = vperm.slane %v2419_v8, 4  ;;  %v1506_v27 = vadd.f32 %v2459_v28, %v1501_v63 }
  0xe2   :  { %v502_v2 = vmul.f32 %v1936_v32, %v501_v60  ;;  %v541_v10 = vadd.f32 %v2351_v39, %v527_v42  ;;  %v2455_v3 = vmax.f32 %v721_v18, %v722_v61 }
  0xe3   :  { %vm1507_vm13 = vcmp.gt.f32.partialorder %v1506_v27, %v1499_v30 }
  0xe4   :  { %v506_v9 = vsel %vm505_vm12, %v1936_v32, %v502_v2  ;;  %549 = vst [vmem:[#allocation2 + $0x28] sm:$0x1f] %v541_v10  ;;  %v724_v11 = vsub.f32 %v710_v33, %v2455_v3  ;;  %v725_v12 = vsub.f32 %v711_v14, %v2455_v3  ;;  %v726_v15 = vsub.f32 %v712_v35, %v2455_v3  ;;  %v2475_v32 = vpop.permute.xlu2 %1521 }
  0xe5   :  { %v514_v16 = vmul.f32 %v506_v9, %v2336_v22  ;;  %v727_v4 = vsub.f32 %v713_v41, %v2455_v3  ;;  %v728_v20 = vsub.f32 %v714_v55, %v2455_v3  ;;  %v1508_v50 = vsel %vm1507_vm13, %v1506_v27, %v1499_v30 }
  0xe6   :  { %v729_v40 = vmul.f32 1.442695, %v724_v11  ;;  %v731_v21 = vmul.f32 1.442695, %v725_v12  ;;  %v733_v5 = vmul.f32 1.442695, %v726_v15  ;;  %v1524_v34 = vadd.f32 %v2475_v32, %v1519_v7 }
  0xe7   :  { %v528_v25 = vmul.f32 %v2376_v19, %v514_v16  ;;  %v735_v26 = vmul.f32 1.442695, %v727_v4  ;;  %v1509_v47 = vsel %vm1507_vm13, 2, %v1500_v6  ;;  %v737_v33 = vmul.f32 1.442695, %v728_v20 }
  0xe8   :  { %1937 = vpow2.f32 %v729_v40  ;;  %vm1516_vm14 = vcmp.gt.f32.partialorder %v1515_v1, %v1508_v50  ;;  %v1555_v4 = vld [vmem:[#allocation2 + $0x18] sm:$0x1f]  ;;  %v590_v20 = vld [vmem:[%s3245_s11 + $0x1] sm:$0x1] }
  0xe9   :  { %v542_v22 = vadd.f32 %v2351_v39, %v528_v25  ;;  %1939 = vpow2.f32 %v731_v21  ;;  %v1517_v55 = vsel %vm1516_vm14, %v1515_v1, %v1508_v50  ;;  %v1518_v35 = vsel %vm1516_vm14, 3, %v1509_v47 }
  0xea   :  { %1941 = vpow2.f32 %v733_v5  ;;  %vm1525_vm15 = vcmp.gt.f32.partialorder %v1524_v34, %v1517_v55  ;;  %v754_v25 = vsub.f32 1.0, %v590_v20 }
  0xeb   :  { %550 = vst [vmem:[#allocation2 + $0x38] sm:$0x1f] %v542_v22  ;;  %1943 = vpow2.f32 %v735_v26  ;;  %v1526_v48 = vsel %vm1525_vm15, %v1524_v34, %v1517_v55  ;;  %v1527_v19 = vsel %vm1525_vm15, 4, %v1518_v35 }
  0xec   :  { %1528 = vst [vmem:[#allocation3] sm:$0x1f] %v1527_v19  ;;  %v1530_v41 = vadd.f32 %v1529_v23, %v1526_v48  ;;  %1945 = vpow2.f32 %v737_v33  ;;  %v755_v48 = vperm.slane %v754_v25, 0 }
  0xee   :  { %v1938_v43 = vpop.eup %1937  ;;  %v1531_v37 = vperm.slane %v1530_v41, 0  ;;  %v1533_v44 = vperm.slane %v1530_v41, 1  ;;  %v1538_v46 = vperm.slane %v1530_v41, 2  ;;  %v1543_v54 = vperm.slane %v1530_v41, 3 }
  0xef   :  { %v1940_v49 = vpop.eup %1939  ;;  %v739_v39 = vsel %vm267_vm1, %v1938_v43, 0.0  ;;  %v1548_v42 = vperm.slane %v1530_v41, 4  ;;  %v1900_v41 = vld [vmem:[%s3244_s10] ss:$0 sm:$0xff]  ;;  %v1902_v43 = vld [vmem:[%s3244_s10 + $0x1] ss:$0 sm:$0xff] }
  0xf0   :  { %v1942_v51 = vpop.eup %1941  ;;  %v740_v52 = vsel %vm267_vm1, %v1940_v49, 0.0  ;;  %v1532_v14 = vadd.f32 %v1531_v37, %v2429_v29  ;;  %v1534_v53 = vadd.f32 %v1533_v44, %v2439_v36  ;;  %v1539_v58 = vadd.f32 %v1538_v46, %v2459_v28  ;;  %v1896_v37 = vld [vmem:[%s3245_s11 + $0x1] ss:$0 sm:$0xff]  ;;  %v2509_v44 = vld [vmem:[%s3245_s11 + $0x2] sm:$0x1] }
  0xf1   :  { %v1944_v56 = vpop.eup %1943  ;;  %v741_v31 = vadd.f32 %v740_v52, %v739_v39  ;;  %v742_v17 = vsel %vm267_vm1, %v1942_v51, 0.0  ;;  %v1544_v10 = vadd.f32 %v1543_v54, %v2457_v59  ;;  %v1549_v27 = vadd.f32 %v1548_v42, %v2475_v32  ;;  %v1904_v39 = vld [vmem:[%s3244_s10 + $0x2] ss:$0 sm:$0xff] }
  0xf2   :  { %vm1535_vm0 = vcmp.gt.f32.partialorder %v1534_v53, %v1532_v14  ;;  %v1946_v60 = vpop.eup %1945  ;;  %v744_v2 = vsel %vm267_vm1, %v1944_v56, 0.0  ;;  %v2516_v51 = vld [vmem:[#allocation2] sm:$0x1f]  ;;  %v869_v52 = vsub.f32 1.0, %v2509_v44  ;;  %vm567_vm8 = vcmp.eq.s32.totalorder %v2218_v38, %v1900_v41 }
  0xf3   :  { %v743_v61 = vadd.f32 %v742_v17, %v741_v31  ;;  %v1536_v18 = vsel %vm1535_vm0, %v1534_v53, %v1532_v14  ;;  %v1537_v63 = vsel %vm1535_vm0, 1, %v3251_v0  ;;  %v746_v7 = vsel %vm267_vm1, %v1946_v60, 0.0  ;;  %v2522_v14 = vld [vmem:[%s3245_s11 + $0x3] sm:$0x1]  ;;  %v2530_v17 = vld [vmem:[%s3244_s10 + $0x2] sm:$0x1] }
  0xf4   :  { %vm1540_vm2 = vcmp.gt.f32.partialorder %v1539_v58, %v1536_v18  ;;  %3267 = vst [vmem:[#allocation13_spill] sm:$0xff] %v2522_v14  ;;  %vm592_vm9 = vcmp.eq.s32.totalorder %v2218_v38, %v1902_v43  ;;  %v2537_v60 = vld [vmem:[%s3244_s10 + $0x3] ss:$0 sm:$0xff]  ;;  %vm763_vm11 = vcmp.eq.s32.totalorder %v2218_v38, %v1904_v39 }
  0xf5   :  { %v745_v30 = vadd.f32 %v744_v2, %v743_v61  ;;  %v1541_v6 = vsel %vm1540_vm2, %v1539_v58, %v1536_v18  ;;  %v1542_v1 = vsel %vm1540_vm2, 2, %v1537_v63  ;;  %v756_v18 = vmul.f32 %v755_v48, %v2419_v8 }
  0xf6   :  { %vm1545_vm3 = vcmp.gt.f32.partialorder %v1544_v10, %v1541_v6  ;;  %vm878_vm12 = vcmp.eq.s32.totalorder %v2218_v38, %v2537_v60 }
  0xf7   :  { %v747_v9 = vadd.f32 %v746_v7, %v745_v30  ;;  %v1546_v11 = vsel %vm1545_vm3, %v1544_v10, %v1541_v6  ;;  %v1547_v12 = vsel %vm1545_vm3, 3, %v1542_v1  ;;  %v1581_v10 = vld [vmem:[#allocation2 + $0x10] sm:$0x1f]  ;;  %v889_v30 = vmul.u32 5, %v2530_v17  ;;  %v1908_v6 = vld [vmem:[%s3244_s10 + $0x4] ss:$0 sm:$0xff] }
  0xf8   :  { %vm1550_vm4 = vcmp.gt.f32.partialorder %v1549_v27, %v1546_v11  ;;  %v2545_v1 = vperm.slane %v869_v52, 0  ;;  %vm993_vm13 = vcmp.eq.s32.totalorder %v2218_v38, %v1908_v6 }
  0xf9   :  { %1947 = vlog2.f32 %v747_v9  ;;  %v1551_v15 = vsel %vm1550_vm4, %v1549_v27, %v1546_v11  ;;  %v1552_v16 = vsel %vm1550_vm4, 4, %v1547_v12  ;;  %v3249_v11 = vmov 0.0  }
  0xfa   :  { %1554 = vst [vmem:[#allocation3 + $0x18] sm:$0x1f] %v1552_v16  ;;  %v1556_v40 = vadd.f32 %v1555_v4, %v1551_v15  ;;  %v2554_v12 = vsel %vm567_vm8, 1.0, %v3249_v11  ;;  %v2559_v15 = vsel %vm592_vm9, 1.0, %v3249_v11  ;;  %v2562_v16 = vsel %vm763_vm11, 1.0, %v3249_v11 }
  0xfb   :  { %3268 = vst [vmem:[#allocation14_spill] sm:$0xff] %v2554_v12 }
  0xfc   :  { %v1557_v21 = vperm.slane %v1556_v40, 0  ;;  %v1559_v5 = vperm.slane %v1556_v40, 1  ;;  %v1564_v50 = vperm.slane %v1556_v40, 2  ;;  %v1569_v33 = vperm.slane %v1556_v40, 3  ;;  %3269 = vst [vmem:[#allocation15_spill] sm:$0xff] %v2559_v15 }
  0xfd   :  { %v1574_v35 = vperm.slane %v1556_v40, 4  ;;  %3270 = vst [vmem:[#allocation16_spill] sm:$0xff] %v2562_v16 }
  0xfe   :  { %v1558_v26 = vadd.f32 %v1557_v21, %v2429_v29  ;;  %v1560_v47 = vadd.f32 %v1559_v5, %v2439_v36  ;;  %v1565_v55 = vadd.f32 %v1564_v50, %v2459_v28  ;;  %v1570_v49 = vadd.f32 %v1569_v33, %v2457_v59 }
  0xff   :  { %v1948_v34 = vpop.eup %1947  ;;  %v1575_v31 = vadd.f32 %v1574_v35, %v2475_v32 }
 0x100   :  { %v749_v22 = vmul.f32 0.6931472, %v1948_v34  ;;  %vm1561_vm5 = vcmp.gt.f32.partialorder %v1560_v47, %v1558_v26 }
 0x101   :  { %v1562_v19 = vsel %vm1561_vm5, %v1560_v47, %v1558_v26  ;;  %v1563_v23 = vsel %vm1561_vm5, 1, %v3251_v0 }
 0x102   :  { %v750_v46 = vadd.f32 %v749_v22, %v2455_v3  ;;  %vm1566_vm6 = vcmp.gt.f32.partialorder %v1565_v55, %v1562_v19  ;;  %v984_v3 = vsub.f32 1.0, %v2522_v14  ;;  %v875_v22 = vld [vmem:[%s3244_s10 + $0x3] sm:$0x1] }
 0x103   :  { %v1567_v53 = vsel %vm1566_vm6, %v1565_v55, %v1562_v19  ;;  %v1568_v54 = vsel %vm1566_vm6, 2, %v1563_v23  ;;  %v1910_v23 = vld [vmem:[%s3244_s10 + $0x5] ss:$0 sm:$0xff]  ;;  %v1004_v52 = vmul.u32 5, %v875_v22 }
 0x104   :  { %v751_v56 = vadd.f32 %v750_v46, %v2516_v51  ;;  %vm1571_vm7 = vcmp.gt.f32.partialorder %v1570_v49, %v1567_v53  ;;  %v2547_v7 = vperm.slane %v984_v3, 0  ;;  %vm1108_vm15 = vcmp.eq.s32.totalorder %v2218_v38, %v1910_v23 }
 0x105   :  { %v1572_v58 = vsel %vm1571_vm7, %v1570_v49, %v1567_v53  ;;  %v1573_v42 = vsel %vm1571_vm7, 3, %v1568_v54  ;;  %v2618_v60 = vsel %vm1108_vm15, 1.0, %v3249_v11 }
 0x106   :  { %v753_v61 = vmul.f32 %v1896_v37, %v751_v56  ;;  %vm1576_vm10 = vcmp.gt.f32.partialorder %v1575_v31, %v1572_v58  ;;  %3273 = vst [vmem:[#allocation19_spill] sm:$0xff] %v2618_v60 }
 0x107   :  { %v1577_v63 = vsel %vm1576_vm10, %v1575_v31, %v1572_v58  ;;  %v1578_v2 = vsel %vm1576_vm10, 4, %v1573_v42 }
 0x108   :  { %v2549_v27 = vadd.f32 %v756_v18, %v753_v61  ;;  %1580 = vst [vmem:[#allocation3 + $0x10] sm:$0x1f] %v1578_v2  ;;  %v1582_v9 = vadd.f32 %v1581_v10, %v1577_v63 }
 0x10a   :  { %v811_v4 = vrot.slane %v2549_v27, 1  ;;  %v812_v20 = vrot.slane %v2549_v27, 2  ;;  %v813_v40 = vrot.slane %v2549_v27, 3  ;;  %v814_v21 = vrot.slane %v2549_v27, 4 }
 0x10b   :  { %v815_v5 = vperm.slane %v2549_v27, 0  ;;  %v1583_v50 = vperm.slane %v1582_v9, 0  ;;  %v1585_v25 = vperm.slane %v1582_v9, 1  ;;  %v1590_v19 = vperm.slane %v1582_v9, 2 }
 0x10c   :  { %v816_v26 = vperm.slane %v811_v4, 0  ;;  %v817_v47 = vperm.slane %v812_v20, 0  ;;  %v818_v33 = vperm.slane %v813_v40, 0  ;;  %v819_v34 = vperm.slane %v814_v21, 0  ;;  %v990_v40 = vld [vmem:[%s3244_s10 + $0x4] sm:$0x1] }
 0x10d   :  { %v825_v55 = vadd.f32 %v815_v5, %v2357_v45  ;;  %v1584_v35 = vadd.f32 %v1583_v50, %v2429_v29  ;;  %v1586_v48 = vadd.f32 %v1585_v25, %v2439_v36  ;;  %v1595_v39 = vperm.slane %v1582_v9, 3 }
 0x10e   :  { %v826_v41 = vadd.f32 %v816_v26, %v2431_v13  ;;  %v827_v43 = vadd.f32 %v817_v47, %v2400_v57  ;;  %v828_v37 = vadd.f32 %v818_v33, %v2406_v62  ;;  %v829_v46 = vadd.f32 %v819_v34, %v2379_v24 }
 0x10f   :  { %v830_v49 = vsel %vm267_vm1, %v825_v55, -inf  ;;  %vm1587_vm14 = vcmp.gt.f32.partialorder %v1586_v48, %v1584_v35  ;;  %v1591_v56 = vadd.f32 %v1590_v19, %v2459_v28  ;;  %v1596_v18 = vadd.f32 %v1595_v39, %v2457_v59  ;;  %v1105_v19 = vld [vmem:[%s3244_s10 + $0x5] sm:$0x1] }
 0x110   :  { %v832_v53 = vsel %vm267_vm1, %v827_v43, -inf  ;;  %v833_v54 = vsel %vm267_vm1, %v828_v37, -inf  ;;  %v834_v3 = vsel %vm267_vm1, %v829_v46, -inf  ;;  %v1588_v58 = vsel %vm1587_vm14, %v1586_v48, %v1584_v35 }
 0x111   :  { %v835_v31 = vmax.f32 %v830_v49, %v834_v3  ;;  %v1589_v42 = vsel %vm1587_vm14, 1, %v3251_v0  ;;  %v831_v61 = vsel %vm267_vm1, %v826_v41, -inf  ;;  %vm1592_vm0 = vcmp.gt.f32.partialorder %v1591_v56, %v1588_v58 }
 0x112   :  { %v1600_v63 = vperm.slane %v1582_v9, 4  ;;  %v837_v10 = vmax.f32 %v832_v53, %v833_v54  ;;  %v1593_v4 = vsel %vm1592_vm0, %v1591_v56, %v1588_v58  ;;  %v1594_v20 = vsel %vm1592_vm0, 2, %v1589_v42 }
 0x113   :  { %v836_v2 = vmax.f32 %v835_v31, %v831_v61  ;;  %vm1597_vm2 = vcmp.gt.f32.partialorder %v1596_v18, %v1593_v4  ;;  %v2602_v5 = vsel %vm878_vm12, 1.0, %v3249_v11  ;;  %v2604_v50 = vadd.s32 %v889_v30, %v875_v22  ;;  %v1913_v30 = vld [vmem:[%s3244_s10 + $0x6] ss:$0 sm:$0xff]  ;;  %v2636_v31 = vld [vmem:[#allocation2 + $0x18] sm:$0x1f] }
 0x114   :  { %v1601_v21 = vadd.f32 %v1600_v63, %v2475_v32  ;;  %3271 = vst [vmem:[#allocation17_spill] sm:$0xff] %v2602_v5  ;;  %v1598_v25 = vsel %vm1597_vm2, %v1596_v18, %v1593_v4  ;;  %v1599_v26 = vsel %vm1597_vm2, 3, %v1594_v20  ;;  %v2611_v47 = vsel %vm993_vm13, 1.0, %v3249_v11  ;;  %v1220_v20 = vld [vmem:[%s3244_s10 + $0x6] sm:$0x1] }
 0x115   :  { %v2606_v9 = vmax.f32 %v836_v2, %v837_v10  ;;  %3272 = vst [vmem:[#allocation18_spill] sm:$0xff] %v2611_v47  ;;  %v2613_v33 = vadd.s32 %v1004_v52, %v990_v40  ;;  %v1119_v34 = vmul.u32 5, %v990_v40  ;;  %v1607_v52 = vld [vmem:[#allocation2 + $0x8] sm:$0x1f]  ;;  %v576_v53 = vmul.f32 %v2554_v12, %v2419_v8  ;;  %v2638_v8 = vld [vmem:[#allocation2 + $0x10] sm:$0x1f] }
 0x116   :  { %vm1602_vm3 = vcmp.gt.f32.partialorder %v1601_v21, %v1598_v25  ;;  %vm1223_vm4 = vcmp.eq.s32.totalorder %v2218_v38, %v1913_v30  ;;  %v595_v63 = vmul.f32 %v2559_v15, %v2516_v51  ;;  %v2648_v40 = vld [vmem:[#allocation2 + $0x8] sm:$0x1f]  ;;  %v766_v51 = vmul.f32 %v2562_v16, %v2636_v31 }
 0x117   :  { %v839_v22 = vsub.f32 %v825_v55, %v2606_v9  ;;  %v840_v35 = vsub.f32 %v826_v41, %v2606_v9  ;;  %v841_v6 = vsub.f32 %v827_v43, %v2606_v9  ;;  %v842_v48 = vsub.f32 %v828_v37, %v2606_v9  ;;  %3274 = vst [vmem:[#allocation20_spill] sm:$0xff] %v2648_v40 }
 0x118   :  { %v843_v23 = vsub.f32 %v829_v46, %v2606_v9  ;;  %v1603_v49 = vsel %vm1602_vm3, %v1601_v21, %v1598_v25  ;;  %v1604_v39 = vsel %vm1602_vm3, 4, %v1599_v26  ;;  %v2633_v43 = vadd.s32 %v1119_v34, %v1105_v19 }
 0x119   :  { %v844_v54 = vmul.f32 1.442695, %v839_v22  ;;  %v846_v55 = vmul.f32 1.442695, %v840_v35  ;;  %v848_v3 = vmul.f32 1.442695, %v841_v6  ;;  %v1608_v41 = vadd.f32 %v1607_v52, %v1603_v49 }
 0x11a   :  { %v850_v56 = vmul.f32 1.442695, %v842_v48  ;;  %1606 = vst [vmem:[#allocation3 + $0x20] sm:$0x1f] %v1604_v39  ;;  %v1234_v37 = vmul.u32 5, %v1105_v19  ;;  %v577_v18 = vsel %vm267_vm1, %v576_v53, 0.0  ;;  %v881_v22 = vmul.f32 %v2602_v5, %v2638_v8 }
 0x11b   :  { %1949 = vpow2.f32 %v844_v54  ;;  %v1609_v46 = vperm.slane %v1608_v41, 0  ;;  %v1611_v58 = vperm.slane %v1608_v41, 1  ;;  %v1616_v42 = vperm.slane %v1608_v41, 2  ;;  %v1104_v39 = vld [vmem:[#allocation2 + $0x20] sm:$0x1f] }
 0x11c   :  { %1951 = vpow2.f32 %v846_v55  ;;  %v852_v61 = vmul.f32 1.442695, %v843_v23  ;;  %v1621_v4 = vperm.slane %v1608_v41, 3  ;;  %v2653_v21 = vsel %vm1223_vm4, 1.0, %v3249_v11 }
 0x11d   :  { %1953 = vpow2.f32 %v848_v3  ;;  %v1610_v2 = vadd.f32 %v1609_v46, %v2429_v29  ;;  %v1612_v10 = vadd.f32 %v1611_v58, %v2439_v36  ;;  %3275 = vst [vmem:[#allocation21_spill] sm:$0xff] %v2653_v21  ;;  %v2655_v25 = vadd.s32 %v1234_v37, %v1220_v20 }
 0x11e   :  { %1955 = vpow2.f32 %v850_v56  ;;  %v1617_v26 = vadd.f32 %v1616_v42, %v2459_v28  ;;  %v1626_v34 = vperm.slane %v1608_v41, 4  ;;  %v578_v48 = vrot.slane %v577_v18, 4 }
 0x11f   :  { %vm1613_vm5 = vcmp.gt.f32.partialorder %v1612_v10, %v1610_v2  ;;  %1957 = vpow2.f32 %v852_v61  ;;  %v1622_v19 = vadd.f32 %v1621_v4, %v2457_v59  ;;  %v596_v23 = vsel %vm267_vm1, %v595_v63, 0.0 }
 0x120   :  { %v1614_v35 = vsel %vm1613_vm5, %v1612_v10, %v1610_v2  ;;  %v1615_v6 = vsel %vm1613_vm5, 1, %v3251_v0  ;;  %v996_v49 = vmul.f32 %v2611_v47, %v2648_v40  ;;  %v767_v3 = vsel %vm267_vm1, %v766_v51, 0.0  ;;  %v1219_v51 = vld [vmem:[#allocation2 + $0x28] sm:$0x1f] }
 0x121   :  { %v1950_v30 = vpop.eup %1949  ;;  %vm1618_vm6 = vcmp.gt.f32.partialorder %v1617_v26, %v1614_v35  ;;  %v1627_v37 = vadd.f32 %v1626_v34, %v2475_v32  ;;  %v882_v46 = vsel %vm267_vm1, %v881_v22, 0.0  ;;  %v1111_v2 = vmul.f32 %v2618_v60, %v1104_v39  ;;  %v1633_v34 = vld [vmem:[#allocation2 + $0x20] sm:$0x1f] }
 0x122   :  { %v1952_v52 = vpop.eup %1951  ;;  %v854_v53 = vsel %vm267_vm1, %v1950_v30, 0.0  ;;  %v1619_v54 = vsel %vm1618_vm6, %v1617_v26, %v1614_v35  ;;  %v1620_v55 = vsel %vm1618_vm6, 2, %v1615_v6  ;;  %v597_v4 = vrot.slane %v596_v23, 4  ;;  %v565_v39 = vld [vmem:[%s3244_s10] sm:$0x1] }
 0x123   :  { %v1954_v41 = vpop.eup %1953  ;;  %v855_v56 = vsel %vm267_vm1, %v1952_v52, 0.0  ;;  %vm1623_vm7 = vcmp.gt.f32.partialorder %v1622_v19, %v1619_v54  ;;  %v997_v20 = vsel %vm267_vm1, %v996_v49, 0.0  ;;  %v768_v52 = vrot.slane %v767_v3, 4 }
 0x124   :  { %v1956_v58 = vpop.eup %1955  ;;  %v856_v42 = vadd.f32 %v855_v56, %v854_v53  ;;  %v1624_v61 = vsel %vm1623_vm7, %v1622_v19, %v1619_v54  ;;  %v1625_v63 = vsel %vm1623_vm7, 3, %v1620_v55  ;;  %v857_v10 = vsel %vm267_vm1, %v1954_v41, 0.0 }
 0x125   :  { %vm1628_vm8 = vcmp.gt.f32.partialorder %v1627_v37, %v1624_v61  ;;  %v1958_v26 = vpop.eup %1957  ;;  %v859_v22 = vsel %vm267_vm1, %v1956_v58, 0.0  ;;  %v2679_v53 = vadd.f32 %v578_v48, %v577_v18  ;;  %v883_v54 = vrot.slane %v882_v46, 4 }
 0x126   :  { %v858_v35 = vadd.f32 %v857_v10, %v856_v42  ;;  %v1629_v6 = vsel %vm1628_vm8, %v1627_v37, %v1624_v61  ;;  %v1630_v30 = vsel %vm1628_vm8, 4, %v1625_v63  ;;  %v998_v49 = vrot.slane %v997_v20, 4  ;;  %v589_v63 = vld [vmem:[%s3244_s10 + $0x1] sm:$0x1] }
 0x127   :  { %1632 = vst [vmem:[#allocation3 + $0x28] sm:$0x1f] %v1630_v30  ;;  %v1634_v19 = vadd.f32 %v1633_v34, %v1629_v6  ;;  %v1112_v41 = vsel %vm267_vm1, %v1111_v2, 0.0  ;;  %v1226_v56 = vmul.f32 %v2653_v21, %v1219_v51  ;;  %v861_v37 = vsel %vm267_vm1, %v1958_v26, 0.0 }
 0x128   :  { %v860_v55 = vadd.f32 %v859_v22, %v858_v35  ;;  %v598_v6 = vadd.f32 %v597_v4, %v596_v23  ;;  %v603_v18 = vmul.u32 5, %v565_v39  ;;  %v774_v48 = vmul.u32 5, %v589_v63 }
 0x129   :  { %v1635_v42 = vperm.slane %v1634_v19, 0  ;;  %v1637_v61 = vperm.slane %v1634_v19, 1  ;;  %v1642_v58 = vperm.slane %v1634_v19, 2  ;;  %v1647_v2 = vperm.slane %v1634_v19, 3 }
 0x12a   :  { %v862_v10 = vadd.f32 %v861_v37, %v860_v55  ;;  %v769_v34 = vadd.f32 %v768_v52, %v767_v3  ;;  %v884_v51 = vadd.f32 %v883_v54, %v882_v46  ;;  %v999_v26 = vadd.f32 %v998_v49, %v997_v20 }
 0x12b   :  { %v1636_v35 = vadd.f32 %v1635_v42, %v2429_v29  ;;  %v1638_v30 = vadd.f32 %v1637_v61, %v2439_v36  ;;  %v1113_v22 = vrot.slane %v1112_v41, 4  ;;  %v1643_v11 = vadd.f32 %v1642_v58, %v2459_v28 }
 0x12c   :  { %1959 = vlog2.f32 %v862_v10  ;;  %v1652_v0 = vperm.slane %v1634_v19, 4  ;;  %v1227_v21 = vsel %vm267_vm1, %v1226_v56, 0.0  ;;  %v3276_v23 = vmov 0  }
 0x12d   :  { %vm1639_vm9 = vcmp.gt.f32.partialorder %v1638_v30, %v1636_v35  ;;  %v604_v39 = vadd.s32 %v603_v18, %v589_v63  ;;  %v775_v37 = vadd.s32 %v774_v48, %v2530_v17  ;;  %v1648_v42 = vadd.f32 %v1647_v2, %v2457_v59 }
 0x12e   :  { %v1640_v55 = vsel %vm1639_vm9, %v1638_v30, %v1636_v35  ;;  %v1641_v4 = vsel %vm1639_vm9, 1, %v3276_v23  ;;  %v599_v3 = vrot.slane %v598_v6, 2  ;;  %v770_v52 = vrot.slane %v769_v34, 2 }
 0x12f   :  { %vm1644_vm10 = vcmp.gt.f32.partialorder %v1643_v11, %v1640_v55  ;;  %v885_v54 = vrot.slane %v884_v51, 2  ;;  %v1000_v49 = vrot.slane %v999_v26, 2  ;;  %v1653_v19 = vadd.f32 %v1652_v0, %v2475_v32 }
 0x130   :  { %v1645_v46 = vsel %vm1644_vm10, %v1643_v11, %v1640_v55  ;;  %v1646_v20 = vsel %vm1644_vm10, 2, %v1641_v4  ;;  %v1114_v61 = vadd.f32 %v1113_v22, %v1112_v41  ;;  %v1228_v56 = vrot.slane %v1227_v21, 4  ;;  %v1897_v22 = vld [vmem:[%s3245_s11 + $0x2] ss:$0 sm:$0xff] }
 0x131   :  { %vm1649_vm11 = vcmp.gt.f32.partialorder %v1648_v42, %v1645_v46  ;;  %v2695_v63 = vperm.slane %v604_v39, 0  ;;  %v2697_v17 = vperm.slane %v775_v37, 0  ;;  %v2699_v48 = vadd.f32 %v770_v52, %v769_v34 }
 0x132   :  { %v1960_v58 = vpop.eup %1959  ;;  %v1650_v10 = vsel %vm1649_vm11, %v1648_v42, %v1645_v46  ;;  %v1651_v35 = vsel %vm1649_vm11, 3, %v1646_v20  ;;  %v2702_v11 = vperm.slane %v2604_v50, 0  ;;  %v2706_v0 = vperm.slane %v2613_v33, 0 }
 0x133   :  { %v864_v18 = vmul.f32 0.6931472, %v1960_v58  ;;  %vm1654_vm12 = vcmp.gt.f32.partialorder %v1653_v19, %v1650_v10  ;;  %v2709_v41 = vperm.slane %v2633_v43, 0  ;;  %v2711_v2 = vadd.f32 %v885_v54, %v884_v51 }
 0x134   :  { %v1656_v30 = vsel %vm1654_vm12, 4, %v1651_v35  ;;  %v2718_v50 = vperm.slane %v2655_v25, 0  ;;  %v2721_v4 = vadd.f32 %v1000_v49, %v999_v26  ;;  %v1115_v33 = vrot.slane %v1114_v61, 2  ;;  %v2756_v49 = vpop.permute.xlu2 %620 }
 0x135   :  { %v865_v34 = vadd.f32 %v864_v18, %v2606_v9  ;;  %1658 = vst [vmem:[#allocation3 + $0x8] sm:$0x1f] %v1656_v30  ;;  %v2723_v39 = vadd.f32 %v1228_v56, %v1227_v21  ;;  %vm606_vm13 = vcmp.eq.s32.totalorder %v2218_v38, %v2695_v63  ;;  %vm777_vm14 = vcmp.eq.s32.totalorder %v2218_v38, %v2697_v17 }
 0x136   :  { %3277 = vst [vmem:[#allocation22_spill] sm:$0xff] %v2721_v4  ;;  %v2730_v9 = vadd.f32 %v599_v3, %v598_v6  ;;  %vm892_vm15 = vcmp.eq.s32.totalorder %v2218_v38, %v2702_v11  ;;  %v871_v51 = vmul.f32 %v2545_v1, %v2549_v27  ;;  %vm1007_vm0 = vcmp.eq.s32.totalorder %v2218_v38, %v2706_v0  ;;  %v2816_v1 = vpop.permute.xlu0 %625 }
 0x137   :  { %v866_v43 = vadd.f32 %v865_v34, %v2636_v31  ;;  %vm1122_vm2 = vcmp.eq.s32.totalorder %v2218_v38, %v2709_v41  ;;  %v3278_v31 = vmov 0.0   ;;  %vm1237_vm3 = vcmp.eq.s32.totalorder %v2218_v38, %v2718_v50  ;;  %3279 = vst [vmem:[#allocation23_spill] sm:$0xff] %v2756_v49 }
 0x138   :  { %v1836_v6 = vsel %vm606_vm13, 1.0, %v3278_v31  ;;  %v1841_v37 = vsel %vm777_vm14, 1.0, %v3278_v31  ;;  %v2747_v3 = vadd.f32 %v1115_v33, %v1114_v61  ;;  %v1846_v27 = vsel %vm892_vm15, 1.0, %v3278_v31 }
 0x139   :  { %v868_v26 = vmul.f32 %v1897_v22, %v866_v43  ;;  %v1655_v46 = vsel %vm1654_vm12, %v1653_v19, %v1650_v10  ;;  %v1851_v20 = vsel %vm1007_vm0, 1.0, %v3278_v31  ;;  %v1856_v54 = vsel %vm1122_vm2, 1.0, %v3278_v31  ;;  %v1659_v22 = vld [vmem:[#allocation2 + $0x28] sm:$0x1f] }
 0x13a   :  { %v1861_v56 = vsel %vm1237_vm3, 1.0, %v3278_v31  ;;  %v2760_v58 = vmul.f32 %v1836_v6, %v2756_v49  ;;  %v2763_v61 = vmul.f32 %v1841_v37, %v2756_v49  ;;  %v2766_v35 = vadd.s32 8, %v2218_v38 }
 0x13b   :  { %v2751_v52 = vadd.f32 %v871_v51, %v868_v26  ;;  %v2773_v33 = vadd.f32 %v1659_v22, %v1655_v46  ;;  %v2776_v43 = vmul.f32 %v1846_v27, %v2756_v49  ;;  %v2779_v51 = vmul.f32 %v1851_v20, %v2756_v49 }
 0x13c   :  { %3280 = vst [vmem:[#allocation24_spill] sm:$0xff] %v2766_v35  ;;  %v2783_v25 = vmul.f32 %v1856_v54, %v2756_v49  ;;  %v2786_v55 = vmul.f32 %v1861_v56, %v2756_v49  ;;  %vm607_vm4 = vcmp.eq.s32.totalorder %v2766_v35, %v2695_v63  ;;  %vm778_vm5 = vcmp.eq.s32.totalorder %v2766_v35, %v2697_v17 }
 0x13d   :  { %v926_v18 = vrot.slane %v2751_v52, 1  ;;  %v927_v19 = vrot.slane %v2751_v52, 2  ;;  %v928_v10 = vrot.slane %v2751_v52, 3  ;;  %v929_v30 = vrot.slane %v2751_v52, 4 }
 0x13e   :  { %v930_v34 = vperm.slane %v2751_v52, 0  ;;  %vm893_vm6 = vcmp.eq.s32.totalorder %v2766_v35, %v2702_v11  ;;  %vm1008_vm7 = vcmp.eq.s32.totalorder %v2766_v35, %v2706_v0  ;;  %v2801_v54 = vadd.s32 16, %v2218_v38 }
 0x13f   :  { %v931_v26 = vperm.slane %v926_v18, 0  ;;  %v932_v6 = vperm.slane %v927_v19, 0  ;;  %v933_v37 = vperm.slane %v928_v10, 0  ;;  %v934_v42 = vperm.slane %v929_v30, 0 }
 0x140   :  { %v940_v21 = vadd.f32 %v930_v34, %v2357_v45  ;;  %v1837_v22 = vsel %vm607_vm4, 1.0, %v3278_v31  ;;  %vm1123_vm8 = vcmp.eq.s32.totalorder %v2766_v35, %v2709_v41  ;;  %vm1238_vm9 = vcmp.eq.s32.totalorder %v2766_v35, %v2718_v50 }
 0x141   :  { %v941_v27 = vadd.f32 %v931_v26, %v2431_v13  ;;  %v942_v46 = vadd.f32 %v932_v6, %v2400_v57  ;;  %v943_v20 = vadd.f32 %v933_v37, %v2406_v62  ;;  %v944_v18 = vadd.f32 %v934_v42, %v2379_v24 }
 0x142   :  { %v945_v56 = vsel %vm267_vm1, %v940_v21, -inf  ;;  %v1661_v26 = vperm.slane %v2773_v33, 0  ;;  %v1663_v6 = vperm.slane %v2773_v33, 1  ;;  %v1668_v37 = vperm.slane %v2773_v33, 2 }
 0x143   :  { %v947_v19 = vsel %vm267_vm1, %v942_v46, -inf  ;;  %v948_v10 = vsel %vm267_vm1, %v943_v20, -inf  ;;  %v949_v42 = vsel %vm267_vm1, %v944_v18, -inf  ;;  %v946_v34 = vsel %vm267_vm1, %v941_v27, -inf }
 0x144   :  { %v950_v30 = vmax.f32 %v945_v56, %v949_v42  ;;  %v952_v56 = vmax.f32 %v947_v19, %v948_v10  ;;  %v1842_v42 = vsel %vm778_vm5, 1.0, %v3278_v31  ;;  %v1847_v49 = vsel %vm893_vm6, 1.0, %v3278_v31 }
 0x145   :  { %v1662_v47 = vadd.f32 %v1661_v26, %v2429_v29  ;;  %v1664_v5 = vadd.f32 %v1663_v6, %v2439_v36  ;;  %v1673_v16 = vperm.slane %v2773_v33, 3  ;;  %v1852_v19 = vsel %vm1008_vm7, 1.0, %v3278_v31 }
 0x146   :  { %v951_v60 = vmax.f32 %v950_v30, %v946_v34  ;;  %v1857_v30 = vsel %vm1123_vm8, 1.0, %v3278_v31  ;;  %v1862_v29 = vsel %vm1238_vm9, 1.0, %v3278_v31  ;;  %v639_v36 = vmul.f32 %v1837_v22, %v2816_v1  ;;  %v2844_v34 = vpop.permute.xlu1 %1450 }
 0x147   :  { %3281 = vst [vmem:[#allocation25_spill] sm:$0xff] %v2844_v34  ;;  %vm1665_vm10 = vcmp.gt.f32.partialorder %v1664_v5, %v1662_v47  ;;  %v1669_v26 = vadd.f32 %v1668_v37, %v2459_v28  ;;  %v790_v6 = vmul.f32 %v1842_v42, %v2816_v1  ;;  %v1674_v14 = vadd.f32 %v1673_v16, %v2457_v59 }
 0x148   :  { %v2833_v10 = vmax.f32 %v951_v60, %v952_v56  ;;  %v1678_v60 = vperm.slane %v2773_v33, 4  ;;  %v1666_v22 = vsel %vm1665_vm10, %v1664_v5, %v1662_v47  ;;  %v1667_v34 = vsel %vm1665_vm10, 1, %v3276_v23 }
 0x149   :  { %vm1670_vm11 = vcmp.gt.f32.partialorder %v1669_v26, %v1666_v22  ;;  %vm608_vm14 = vcmp.eq.s32.totalorder %v2801_v54, %v2695_v63  ;;  %vm779_vm15 = vcmp.eq.s32.totalorder %v2801_v54, %v2697_v17  ;;  %vm894_vm0 = vcmp.eq.s32.totalorder %v2801_v54, %v2702_v11 }
 0x14a   :  { %v954_v56 = vsub.f32 %v940_v21, %v2833_v10  ;;  %v955_v15 = vsub.f32 %v941_v27, %v2833_v10  ;;  %v956_v12 = vsub.f32 %v942_v46, %v2833_v10  ;;  %v957_v35 = vsub.f32 %v943_v20, %v2833_v10 }
 0x14b   :  { %v958_v40 = vsub.f32 %v944_v18, %v2833_v10  ;;  %v1671_v4 = vsel %vm1670_vm11, %v1669_v26, %v1666_v22  ;;  %v1672_v21 = vsel %vm1670_vm11, 2, %v1667_v34  ;;  %v905_v27 = vmul.f32 %v1847_v49, %v2816_v1 }
 0x14c   :  { %v959_v28 = vmul.f32 1.442695, %v954_v56  ;;  %v961_v37 = vmul.f32 1.442695, %v955_v15  ;;  %v963_v33 = vmul.f32 1.442695, %v956_v12  ;;  %vm1675_vm12 = vcmp.gt.f32.partialorder %v1674_v14, %v1671_v4 }
 0x14d   :  { %v965_v42 = vmul.f32 1.442695, %v957_v35  ;;  %v1679_v46 = vadd.f32 %v1678_v60, %v2475_v32  ;;  %v1020_v20 = vmul.f32 %v1852_v19, %v2816_v1  ;;  %v967_v5 = vmul.f32 1.442695, %v958_v40 }
 0x14e   :  { %1961 = vpow2.f32 %v959_v28  ;;  %v1676_v47 = vsel %vm1675_vm12, %v1674_v14, %v1671_v4  ;;  %v1677_v18 = vsel %vm1675_vm12, 3, %v1672_v21  ;;  %v1135_v32 = vmul.f32 %v1857_v30, %v2816_v1  ;;  %v2877_v40 = vpop.permute.xlu1 %630 }
 0x14f   :  { %1963 = vpow2.f32 %v961_v37  ;;  %vm1680_vm13 = vcmp.gt.f32.partialorder %v1679_v46, %v1676_v47  ;;  %v1250_v15 = vmul.f32 %v1862_v29, %v2816_v1  ;;  %vm1009_vm2 = vcmp.eq.s32.totalorder %v2801_v54, %v2706_v0 }
 0x150   :  { %1965 = vpow2.f32 %v963_v33  ;;  %v2863_v59 = vsel %vm1680_vm13, %v1679_v46, %v1676_v47  ;;  %v1682_v12 = vsel %vm1680_vm13, 4, %v1677_v18  ;;  %vm1124_vm3 = vcmp.eq.s32.totalorder %v2801_v54, %v2709_v41 }
 0x151   :  { %1967 = vpow2.f32 %v965_v42  ;;  %1684 = vst [vmem:[#allocation3 + $0x30] sm:$0x1f] %v1682_v12  ;;  %v1838_v14 = vsel %vm608_vm14, 1.0, %v3278_v31  ;;  %v1843_v16 = vsel %vm779_vm15, 1.0, %v3278_v31  ;;  %vm1239_vm4 = vcmp.eq.s32.totalorder %v2801_v54, %v2718_v50 }
 0x152   :  { %1969 = vpow2.f32 %v967_v5  ;;  %v642_v49 = vadd.f32 %v639_v36, %v2760_v58  ;;  %v793_v35 = vadd.f32 %v790_v6, %v2763_v61  ;;  %v908_v19 = vadd.f32 %v905_v27, %v2776_v43 }
 0x153   :  { %v2883_v30 = vadd.s32 24, %v2218_v38  ;;  %v1848_v26 = vsel %vm894_vm0, 1.0, %v3278_v31  ;;  %v1853_v60 = vsel %vm1009_vm2, 1.0, %v3278_v31  ;;  %v1858_v56 = vsel %vm1124_vm3, 1.0, %v3278_v31 }
 0x154   :  { %v1962_v4 = vpop.eup %1961  ;;  %v1863_v58 = vsel %vm1239_vm4, 1.0, %v3278_v31  ;;  %v640_v61 = vmul.f32 %v1838_v14, %v2877_v40  ;;  %v791_v43 = vmul.f32 %v1843_v16, %v2877_v40  ;;  %v1023_v37 = vadd.f32 %v1020_v20, %v2779_v51 }
 0x155   :  { %v1964_v29 = vpop.eup %1963  ;;  %v969_v34 = vsel %vm267_vm1, %v1962_v4, 0.0  ;;  %v1138_v33 = vadd.f32 %v1135_v32, %v2783_v25  ;;  %v1253_v42 = vadd.f32 %v1250_v15, %v2786_v55  ;;  %v906_v27 = vmul.f32 %v1848_v26, %v2877_v40 }
 0x156   :  { %v1966_v22 = vpop.eup %1965  ;;  %v970_v28 = vsel %vm267_vm1, %v1964_v29, 0.0  ;;  %v1021_v46 = vmul.f32 %v1853_v60, %v2877_v40  ;;  %vm609_vm5 = vcmp.eq.s32.totalorder %v2883_v30, %v2695_v63  ;;  %v1136_v18 = vmul.f32 %v1858_v56, %v2877_v40  ;;  %v2913_v63 = vpop.permute.xlu2 %635 }
 0x157   :  { %v1968_v36 = vpop.eup %1967  ;;  %v971_v6 = vadd.f32 %v970_v28, %v969_v34  ;;  %v972_v21 = vsel %vm267_vm1, %v1966_v22, 0.0  ;;  %v1251_v12 = vmul.f32 %v1863_v58, %v2877_v40  ;;  %vm780_vm6 = vcmp.eq.s32.totalorder %v2883_v30, %v2697_v17 }
 0x158   :  { %v1970_v5 = vpop.eup %1969  ;;  %v974_v55 = vsel %vm267_vm1, %v1968_v36, 0.0  ;;  %v643_v25 = vadd.f32 %v642_v49, %v640_v61  ;;  %v794_v51 = vadd.f32 %v793_v35, %v791_v43  ;;  %vm895_vm7 = vcmp.eq.s32.totalorder %v2883_v30, %v2702_v11 }
 0x159   :  { %v973_v47 = vadd.f32 %v972_v21, %v971_v6  ;;  %v1839_v32 = vsel %vm609_vm5, 1.0, %v3278_v31  ;;  %vm1010_vm8 = vcmp.eq.s32.totalorder %v2883_v30, %v2706_v0  ;;  %vm1125_vm9 = vcmp.eq.s32.totalorder %v2883_v30, %v2709_v41 }
 0x15a   :  { %v976_v17 = vsel %vm267_vm1, %v1970_v5, 0.0  ;;  %v1844_v15 = vsel %vm780_vm6, 1.0, %v3278_v31  ;;  %v1849_v14 = vsel %vm895_vm7, 1.0, %v3278_v31  ;;  %vm1240_vm10 = vcmp.eq.s32.totalorder %v2883_v30, %v2718_v50 }
 0x15b   :  { %v975_v20 = vadd.f32 %v974_v55, %v973_v47  ;;  %vm644_vm11 = vcmask 1040384   ;;  %v1854_v16 = vsel %vm1010_vm8, 1.0, %v3278_v31  ;;  %v1859_v0 = vsel %vm1125_vm9, 1.0, %v3278_v31 }
 0x15c   :  { %v909_v4 = vadd.f32 %v908_v19, %v906_v27  ;;  %v1024_v49 = vadd.f32 %v1023_v37, %v1021_v46  ;;  %v1864_v41 = vsel %vm1240_vm10, 1.0, %v3278_v31  ;;  %v641_v35 = vmul.f32 %v1839_v32, %v2913_v63 }
 0x15d   :  { %v977_v11 = vadd.f32 %v976_v17, %v975_v20  ;;  %v1139_v29 = vadd.f32 %v1138_v33, %v1136_v18  ;;  %v792_v34 = vmul.f32 %v1844_v15, %v2913_v63  ;;  %v907_v26 = vmul.f32 %v1849_v14, %v2913_v63 }
 0x15e   :  { %v1254_v60 = vadd.f32 %v1253_v42, %v1251_v12  ;;  %v645_v50 = vsel %vm644_vm11, %v641_v35, 0.0  ;;  %v1022_v56 = vmul.f32 %v1854_v16, %v2913_v63  ;;  %v1137_v22 = vmul.f32 %v1859_v0, %v2913_v63 }
 0x15f   :  { %1971 = vlog2.f32 %v977_v11  ;;  %v646_v28 = vadd.f32 %v645_v50, %v643_v25  ;;  %v795_v19 = vsel %vm644_vm11, %v792_v34, 0.0  ;;  %v910_v58 = vsel %vm644_vm11, %v907_v26, 0.0 }
 0x160   :  { %v1252_v61 = vmul.f32 %v1864_v41, %v2913_v63  ;;  %v796_v43 = vadd.f32 %v795_v19, %v794_v51  ;;  %v911_v36 = vadd.f32 %v910_v58, %v909_v4  ;;  %v1025_v6 = vsel %vm644_vm11, %v1022_v56, 0.0  ;;  %v1898_v41 = vld [vmem:[%s3245_s11 + $0x3] ss:$0 sm:$0xff] }
 0x161   :  { %v1140_v37 = vsel %vm644_vm11, %v1137_v22, 0.0  ;;  %v647_v33 = vrot.slane %v646_v28, 4  ;;  %v1026_v42 = vadd.f32 %v1025_v6, %v1024_v49  ;;  %v1117_v46 = vrot.slane %v2747_v3, 1 }
 0x162   :  { %v1141_v21 = vadd.f32 %v1140_v37, %v1139_v29  ;;  %v1255_v27 = vsel %vm644_vm11, %v1252_v61, 0.0  ;;  %v797_v5 = vrot.slane %v796_v43, 4  ;;  %v912_v47 = vrot.slane %v911_v36, 4 }
 0x163   :  { %v1256_v18 = vadd.f32 %v1255_v27, %v1254_v60  ;;  %v3282_v55 = vrot.slane %v2723_v39, 2  ;;  %v648_v51 = vadd.f32 %v647_v33, %v646_v28  ;;  %v1027_v20 = vrot.slane %v1026_v42, 4 }
 0x164   :  { %v1142_v32 = vrot.slane %v1141_v21, 4  ;;  %v798_v15 = vadd.f32 %v797_v5, %v796_v43  ;;  %v913_v14 = vadd.f32 %v912_v47, %v911_v36  ;;  %v601_v16 = vrot.slane %v2730_v9, 1 }
 0x165   :  { %v1972_v12 = vpop.eup %1971  ;;  %v2939_v25 = vadd.f32 %v3282_v55, %v2723_v39  ;;  %v1257_v11 = vrot.slane %v1256_v18, 4  ;;  %v649_v0 = vrot.slane %v648_v51, 2  ;;  %v1028_v4 = vadd.f32 %v1027_v20, %v1026_v42 }
 0x166   :  { %v979_v17 = vmul.f32 0.6931472, %v1972_v12  ;;  %v1143_v49 = vadd.f32 %v1142_v32, %v1141_v21  ;;  %v799_v39 = vrot.slane %v798_v15, 2  ;;  %v914_v29 = vrot.slane %v913_v14, 2 }
 0x167   :  { %v1258_v34 = vadd.f32 %v1257_v11, %v1256_v18  ;;  %v650_v26 = vadd.f32 %v649_v0, %v648_v51  ;;  %v1029_v60 = vrot.slane %v1028_v4, 2  ;;  %v3283_v56 = vrot.slane %v2679_v53, 2 }
 0x168   :  { %v980_v35 = vadd.f32 %v979_v17, %v2833_v10  ;;  %v1144_v50 = vrot.slane %v1143_v49, 2  ;;  %v800_v19 = vadd.f32 %v799_v39, %v798_v15  ;;  %v915_v58 = vadd.f32 %v914_v29, %v913_v14 }
 0x169   :  { %v581_v22 = vadd.f32 %v3283_v56, %v2679_v53  ;;  %v1259_v61 = vrot.slane %v1258_v34, 2  ;;  %v602_v43 = vadd.f32 %v601_v16, %v2730_v9  ;;  %v651_v36 = vrot.slane %v650_v26, 1 }
 0x16a   :  { %v981_v28 = vadd.f32 %v980_v35, %v2638_v8  ;;  %v1030_v6 = vadd.f32 %v1029_v60, %v1028_v4  ;;  %v1145_v10 = vadd.f32 %v1144_v50, %v1143_v49  ;;  %v986_v33 = vmul.f32 %v2547_v7, %v2751_v52 }
 0x16b   :  { %v801_v42 = vrot.slane %v800_v19, 1  ;;  %v916_v21 = vrot.slane %v915_v58, 1  ;;  %v1232_v27 = vrot.slane %v2939_v25, 1  ;;  %v652_v5 = vadd.f32 %v651_v36, %v650_v26 }
 0x16c   :  { %v983_v37 = vmul.f32 %v1898_v41, %v981_v28  ;;  %v3284_v8 = vrot.slane %v2699_v48, 1  ;;  %v1031_v47 = vrot.slane %v1030_v6, 1  ;;  %v1260_v12 = vadd.f32 %v1259_v61, %v1258_v34  ;;  %v3286_v61 = vld [vmem:[#allocation22_spill] sm:$0xff] }
 0x16d   :  { %v802_v9 = vadd.f32 %v801_v42, %v800_v19  ;;  %v582_v55 = vrot.slane %v581_v22, 1  ;;  %v653_v51 = vadd.f32 %v652_v5, %v602_v43  ;;  %v917_v20 = vadd.f32 %v916_v21, %v915_v58  ;;  %v3288_v42 = vld [vmem:[#allocation13_spill] sm:$0xff] }
 0x16e   :  { %v773_v53 = vadd.f32 %v3284_v8, %v2699_v48  ;;  %v2957_v18 = vadd.f32 %v986_v33, %v983_v37  ;;  %v1146_v32 = vrot.slane %v1145_v10, 1  ;;  %v3285_v7 = vrot.slane %v2711_v2, 1 }
 0x16f   :  { %v1032_v0 = vadd.f32 %v1031_v47, %v1030_v6  ;;  %v583_v4 = vadd.f32 %v582_v55, %v581_v22  ;;  %v3287_v43 = vrot.slane %v3286_v61, 1 }
 0x170   :  { %v888_v52 = vadd.f32 %v3285_v7, %v2711_v2  ;;  %v1041_v17 = vrot.slane %v2957_v18, 1  ;;  %v1042_v15 = vrot.slane %v2957_v18, 2  ;;  %v1043_v14 = vrot.slane %v2957_v18, 3  ;;  %v2025_v2 = vld [vmem:[%s3245_s11 + $0x1] sm:$0x1] }
 0x171   :  { %v1044_v48 = vrot.slane %v2957_v18, 4  ;;  %v1045_v11 = vperm.slane %v2957_v18, 0  ;;  %v803_v16 = vadd.f32 %v802_v9, %v773_v53  ;;  %v654_v34 = vmul.f32 %v2025_v2, %v653_v51 }
 0x172   :  { %v1046_v49 = vperm.slane %v1041_v17, 0  ;;  %v1047_v41 = vperm.slane %v1042_v15, 0  ;;  %v1048_v35 = vperm.slane %v1043_v14, 0  ;;  %v918_v60 = vadd.f32 %v917_v20, %v888_v52  ;;  %v2997_v17 = vld [vmem:[%s3245_s11 + $0x5] sm:$0x1] }
 0x173   :  { %v1049_v39 = vperm.slane %v1044_v48, 0  ;;  %v1055_v29 = vadd.f32 %v1045_v11, %v2357_v45  ;;  %v804_v26 = vmul.f32 %v803_v16, %v2509_v44  ;;  %v655_v58 = vadd.f32 %v654_v34, %v583_v4  ;;  %v2983_v44 = vld [vmem:[%s3245_s11 + $0x4] sm:$0x1] }
 0x174   :  { %v1056_v50 = vadd.f32 %v1046_v49, %v2431_v13  ;;  %v1057_v56 = vadd.f32 %v1047_v41, %v2400_v57  ;;  %v1058_v22 = vadd.f32 %v1048_v35, %v2406_v62  ;;  %v1003_v36 = vadd.f32 %v3287_v43, %v3286_v61 }
 0x175   :  { %v1059_v28 = vadd.f32 %v1049_v39, %v2379_v24  ;;  %v1060_v19 = vsel %vm267_vm1, %v1055_v29, -inf  ;;  %v919_v21 = vmul.f32 %v918_v60, %v3288_v42  ;;  %v805_v53 = vadd.f32 %v804_v26, %v655_v58 }
 0x176   :  { %v1062_v6 = vsel %vm267_vm1, %v1057_v56, -inf  ;;  %v1063_v37 = vsel %vm267_vm1, %v1058_v22, -inf  ;;  %v1061_v5 = vsel %vm267_vm1, %v1056_v50, -inf  ;;  %v1033_v47 = vadd.f32 %v1032_v0, %v1003_v36 }
 0x177   :  { %v1064_v33 = vsel %vm267_vm1, %v1059_v28, -inf  ;;  %v1118_v9 = vadd.f32 %v1117_v46, %v2747_v3  ;;  %v1147_v55 = vadd.f32 %v1146_v32, %v1145_v10  ;;  %v1233_v51 = vadd.f32 %v1232_v27, %v2939_v25  ;;  %v3003_v3 = vld [vmem:[%s3245_s11 + $0x6] sm:$0x1] }
 0x178   :  { %v1065_v8 = vmax.f32 %v1060_v19, %v1064_v33  ;;  %v1261_v20 = vrot.slane %v1260_v12, 1  ;;  %v1067_v52 = vmax.f32 %v1062_v6, %v1063_v37  ;;  %v920_v15 = vadd.f32 %v919_v21, %v805_v53  ;;  %v1685_v21 = vld [vmem:[#allocation2 + $0x38] sm:$0x1f] }
 0x179   :  { %v1034_v14 = vmul.f32 %v1033_v47, %v2983_v44  ;;  %v1148_v48 = vadd.f32 %v1147_v55, %v1118_v9  ;;  %v1099_v47 = vsub.f32 1.0, %v2983_v44 }
 0x17a   :  { %v1066_v7 = vmax.f32 %v1065_v8, %v1061_v5  ;;  %v1262_v11 = vadd.f32 %v1261_v20, %v1260_v12  ;;  %v1686_v5 = vadd.f32 %v1685_v21, %v2863_v59  ;;  %v3289_v8 = vld [vmem:[#allocation25_spill] sm:$0xff] }
 0x17b   :  { %v1035_v46 = vadd.f32 %v1034_v14, %v920_v15  ;;  %v1149_v25 = vmul.f32 %v1148_v48, %v2997_v17  ;;  %v1899_v20 = vld [vmem:[%s3245_s11 + $0x4] ss:$0 sm:$0xff]  ;;  %v3290_v15 = vld [vmem:[#allocation20_spill] sm:$0xff] }
 0x17c   :  { %v1068_v16 = vmax.f32 %v1066_v7, %v1067_v52  ;;  %v1263_v10 = vadd.f32 %v1262_v11, %v1233_v51  ;;  %v3016_v53 = vadd.f32 %v1686_v5, %v3289_v8  ;;  %v1100_v7 = vperm.slane %v1099_v47, 0 }
 0x17d   :  { %v1150_v41 = vadd.f32 %v1149_v25, %v1035_v46 }
 0x17e   :  { %v1069_v27 = vsub.f32 %v1055_v29, %v1068_v16  ;;  %v1070_v32 = vsub.f32 %v1056_v50, %v1068_v16  ;;  %v1071_v0 = vsub.f32 %v1057_v56, %v1068_v16  ;;  %v1072_v4 = vsub.f32 %v1058_v22, %v1068_v16 }
 0x17f   :  { %v1073_v49 = vsub.f32 %v1059_v28, %v1068_v16  ;;  %v1264_v35 = vmul.f32 %v1263_v10, %v3003_v3  ;;  %v1689_v51 = vrot.slane %v3016_v53, 7  ;;  %v1101_v44 = vmul.f32 %v1100_v7, %v2957_v18 }
 0x180   :  { %v1074_v39 = vmul.f32 1.442695, %v1069_v27  ;;  %v1076_v12 = vmul.f32 1.442695, %v1070_v32  ;;  %v1078_v2 = vmul.f32 1.442695, %v1071_v0 }
 0x181   :  { %v1080_v34 = vmul.f32 1.442695, %v1072_v4  ;;  %v3007_v26 = vadd.f32 %v1264_v35, %v1150_v41  ;;  %v1082_v60 = vmul.f32 1.442695, %v1073_v49  ;;  %vm3025_vm12 = vcmp.gt.f32.partialorder %v3016_v53, %v1689_v51 }
 0x182   :  { %1973 = vpow2.f32 %v1074_v39  ;;  %v1692_v46 = vsel %vm3025_vm12, %v3016_v53, %v1689_v51 }
 0x183   :  { %1975 = vpow2.f32 %v1076_v12  ;;  %v1695_v0 = vrot.slane %v1692_v46, 7 }
 0x184   :  { %1977 = vpow2.f32 %v1078_v2 }
 0x185   :  { %1979 = vpow2.f32 %v1080_v34  ;;  %vm3046_vm13 = vcmp.gt.f32.partialorder %v3016_v53, %v1695_v0 }
 0x186   :  { %1981 = vpow2.f32 %v1082_v60 }
 0x188   :  { %v1974_v29 = vpop.eup %1973 }
 0x189   :  { %v1976_v50 = vpop.eup %1975  ;;  %v1084_v56 = vsel %vm267_vm1, %v1974_v29, 0.0 }
 0x18a   :  { %v1978_v22 = vpop.eup %1977  ;;  %v1085_v28 = vsel %vm267_vm1, %v1976_v50, 0.0 }
 0x18b   :  { %v1980_v19 = vpop.eup %1979  ;;  %v1086_v58 = vadd.f32 %v1085_v28, %v1084_v56  ;;  %v1087_v61 = vsel %vm267_vm1, %v1978_v22, 0.0 }
 0x18c   :  { %v1982_v43 = vpop.eup %1981  ;;  %v1089_v6 = vsel %vm267_vm1, %v1980_v19, 0.0  ;;  %v1693_v19 = vsel %vm3025_vm12, 1, %v3276_v23 }
 0x18d   :  { %v1088_v36 = vadd.f32 %v1087_v61, %v1086_v58  ;;  %v1091_v33 = vsel %vm267_vm1, %v1982_v43, 0.0 }
 0x18f   :  { %v1090_v37 = vadd.f32 %v1089_v6, %v1088_v36  ;;  %v1698_v36 = vsel %vm3046_vm13, %v3016_v53, %v1695_v0  ;;  %v1699_v6 = vrot.slane %v1693_v19, 7 }
 0x191   :  { %v1092_v42 = vadd.f32 %v1091_v33, %v1090_v37  ;;  %v1702_v33 = vrot.slane %v1698_v36, 7 }
 0x193   :  { %1983 = vlog2.f32 %v1092_v42  ;;  %vm1704_vm14 = vcmp.gt.f32.partialorder %v3016_v53, %v1702_v33 }
 0x199   :  { %v1984_v9 = vpop.eup %1983 }
 0x19a   :  { %v1094_v55 = vmul.f32 0.6931472, %v1984_v9  ;;  %v1700_v9 = vsel %vm3046_vm13, 2, %v1699_v6 }
 0x19c   :  { %v1095_v52 = vadd.f32 %v1094_v55, %v1068_v16 }
 0x19e   :  { %v1096_v14 = vadd.f32 %v1095_v52, %v3290_v15  ;;  %v1706_v52 = vrot.slane %v1700_v9, 7  ;;  %v1705_v15 = vsel %vm1704_vm14, %v3016_v53, %v1702_v33 }
 0x1a0   :  { %v1098_v48 = vmul.f32 %v1899_v20, %v1096_v14  ;;  %v1707_v59 = vsel %vm1704_vm14, 3, %v1706_v52 }
 0x1a2   :  { %v3030_v11 = vadd.f32 %v1101_v44, %v1098_v48  ;;  %v1709_v48 = vrot.slane %v1705_v15, 7  ;;  %v1712_v44 = vrot.slane %v1707_v59, 7 }
 0x1a4   :  { %v1156_v25 = vrot.slane %v3030_v11, 1  ;;  %v1157_v16 = vrot.slane %v3030_v11, 2  ;;  %v1158_v10 = vrot.slane %v3030_v11, 3  ;;  %v1159_v27 = vrot.slane %v3030_v11, 4 }
 0x1a5   :  { %v1160_v32 = vperm.slane %v3030_v11, 0  ;;  %vm1711_vm15 = vcmp.gt.f32.partialorder %v3016_v53, %v1709_v48 }
 0x1a6   :  { %v1161_v4 = vperm.slane %v1156_v25, 0  ;;  %v1162_v49 = vperm.slane %v1157_v16, 0  ;;  %v1163_v18 = vperm.slane %v1158_v10, 0  ;;  %v1164_v41 = vperm.slane %v1159_v27, 0 }
 0x1a7   :  { %v1170_v35 = vadd.f32 %v1160_v32, %v2357_v45  ;;  %v1713_v46 = vsel %vm1711_vm15, 4, %v1712_v44  ;;  %v1717_v32 = vld [vmem:[#allocation3 + $0x30] sm:$0x1f] }
 0x1a8   :  { %v1171_v39 = vadd.f32 %v1161_v4, %v2431_v13  ;;  %v1172_v12 = vadd.f32 %v1162_v49, %v2400_v57  ;;  %v1173_v2 = vadd.f32 %v1163_v18, %v2406_v62  ;;  %v1174_v34 = vadd.f32 %v1164_v41, %v2379_v24  ;;  %1714 = vst [vmem:[#allocation8 + $0x3] sm:$0x10] %v1713_v46 }
 0x1a9   :  { %v1175_v29 = vsel %vm267_vm1, %v1170_v35, -inf  ;;  %v1715_v25 = vperm.slane %v1713_v46, 4 }
 0x1aa   :  { %v1177_v50 = vsel %vm267_vm1, %v1172_v12, -inf  ;;  %v1178_v56 = vsel %vm267_vm1, %v1173_v2, -inf  ;;  %v1179_v22 = vsel %vm267_vm1, %v1174_v34, -inf  ;;  %v1176_v58 = vsel %vm267_vm1, %v1171_v39, -inf }
 0x1ab   :  { %v1180_v28 = vmax.f32 %v1175_v29, %v1179_v22  ;;  %v1182_v43 = vmax.f32 %v1177_v50, %v1178_v56  ;;  %vm1716_vm0 = vcmp.eq.s32.totalorder %v2218_v38, %v1715_v25 }
 0x1ac   :  { %v1718_v49 = vsel %vm1716_vm0, %v1717_v32, 0 }
 0x1ad   :  { %v1181_v61 = vmax.f32 %v1180_v28, %v1176_v58 }
 0x1af   :  { %v3061_v37 = vmax.f32 %v1181_v61, %v1182_v43  ;;  %v1214_v61 = vsub.f32 1.0, %v2997_v17  ;;  %v1728_v43 = vld [vmem:[#allocation3 + $0x8] sm:$0x1f] }
 0x1b1   :  { %v1184_v42 = vsub.f32 %v1170_v35, %v3061_v37  ;;  %v1185_v21 = vsub.f32 %v1171_v39, %v3061_v37  ;;  %v1186_v5 = vsub.f32 %v1172_v12, %v3061_v37  ;;  %v1187_v23 = vsub.f32 %v1173_v2, %v3061_v37 }
 0x1b2   :  { %v1188_v47 = vsub.f32 %v1174_v34, %v3061_v37  ;;  %v1719_v35 = vsel %vm267_vm1, %v1718_v49, 0 }
 0x1b3   :  { %v1189_v55 = vmul.f32 1.442695, %v1184_v42  ;;  %v1191_v51 = vmul.f32 1.442695, %v1185_v21  ;;  %v1193_v20 = vmul.f32 1.442695, %v1186_v5 }
 0x1b4   :  { %v1195_v7 = vmul.f32 1.442695, %v1187_v23  ;;  %v1197_v14 = vmul.f32 1.442695, %v1188_v47  ;;  %v1720_v39 = vrot.slane %v1719_v35, 4  ;;  %v1215_v23 = vperm.slane %v1214_v61, 0 }
 0x1b5   :  { %1985 = vpow2.f32 %v1189_v55  ;;  %v1912_v5 = vld [vmem:[%s3245_s11 + $0x5] ss:$0 sm:$0xff]  ;;  %v2026_v55 = vld [vmem:[#allocation2 + $0x20] sm:$0x1f] }
 0x1b6   :  { %1987 = vpow2.f32 %v1191_v51  ;;  %v1721_v60 = vadd.s32 %v1720_v39, %v1719_v35 }
 0x1b7   :  { %1989 = vpow2.f32 %v1193_v20 }
 0x1b8   :  { %1991 = vpow2.f32 %v1195_v7  ;;  %v1722_v56 = vrot.slane %v1721_v60, 2  ;;  %v1216_v7 = vmul.f32 %v1215_v23, %v3030_v11 }
 0x1b9   :  { %1993 = vpow2.f32 %v1197_v14 }
 0x1ba   :  { %v1723_v28 = vadd.s32 %v1722_v56, %v1721_v60 }
 0x1bb   :  { %v1986_v16 = vpop.eup %1985 }
 0x1bc   :  { %v1988_v10 = vpop.eup %1987  ;;  %v1199_v27 = vsel %vm267_vm1, %v1986_v16, 0.0  ;;  %v1724_v19 = vrot.slane %v1723_v28, 1 }
 0x1bd   :  { %v1990_v0 = vpop.eup %1989  ;;  %v1200_v4 = vsel %vm267_vm1, %v1988_v10, 0.0 }
 0x1be   :  { %v1992_v18 = vpop.eup %1991  ;;  %v1201_v41 = vadd.f32 %v1200_v4, %v1199_v27  ;;  %v1202_v53 = vsel %vm267_vm1, %v1990_v0, 0.0  ;;  %v1725_v58 = vadd.s32 %v1724_v19, %v1723_v28 }
 0x1bf   :  { %v1994_v12 = vpop.eup %1993  ;;  %v1204_v34 = vsel %vm267_vm1, %v1992_v18, 0.0 }
 0x1c0   :  { %v1203_v2 = vadd.f32 %v1202_v53, %v1201_v41  ;;  %v1206_v50 = vsel %vm267_vm1, %v1994_v12, 0.0  ;;  %1726 = vst [vmem:[#allocation8 + $0x6] sm:$0x1] %v1725_v58  ;;  %vm1727_vm2 = vcmp.eq.s32.totalorder %v2218_v38, %v1725_v58  ;;  %v1739_v41 = vld [vmem:[#allocation3 + $0x28] sm:$0x1f] }
 0x1c1   :  { %v1729_v6 = vsel %vm1727_vm2, %v1728_v43, 0 }
 0x1c2   :  { %v1205_v29 = vadd.f32 %v1204_v34, %v1203_v2  ;;  %v1730_v42 = vsel %vm267_vm1, %v1729_v6, 0 }
 0x1c3   :  { %v1731_v21 = vrot.slane %v1730_v42, 4 }
 0x1c4   :  { %v1207_v22 = vadd.f32 %v1206_v50, %v1205_v29 }
 0x1c5   :  { %v1732_v9 = vadd.s32 %v1731_v21, %v1730_v42 }
 0x1c6   :  { %1995 = vlog2.f32 %v1207_v22 }
 0x1c7   :  { %v1733_v51 = vrot.slane %v1732_v9, 2 }
 0x1c9   :  { %v1734_v52 = vadd.s32 %v1733_v51, %v1732_v9  ;;  %v1750_v51 = vld [vmem:[#allocation3 + $0x20] sm:$0x1f] }
 0x1cb   :  { %v1735_v14 = vrot.slane %v1734_v52, 1 }
 0x1cc   :  { %v1996_v36 = vpop.eup %1995 }
 0x1cd   :  { %v1209_v33 = vmul.f32 0.6931472, %v1996_v36  ;;  %v1736_v25 = vadd.s32 %v1735_v14, %v1734_v52 }
 0x1cf   :  { %v1210_v47 = vadd.f32 %v1209_v33, %v3061_v37  ;;  %1737 = vst [vmem:[#allocation8 + $0x5] sm:$0x1] %v1736_v25  ;;  %vm1738_vm3 = vcmp.eq.s32.totalorder %v2218_v38, %v1736_v25 }
 0x1d0   :  { %v1740_v35 = vsel %vm1738_vm3, %v1739_v41, 0 }
 0x1d1   :  { %v1211_v17 = vadd.f32 %v2026_v55, %v1210_v47  ;;  %v1741_v60 = vsel %vm267_vm1, %v1740_v35, 0 }
 0x1d2   :  { %v1742_v50 = vrot.slane %v1741_v60, 4 }
 0x1d3   :  { %v1213_v20 = vmul.f32 %v1912_v5, %v1211_v17 }
 0x1d4   :  { %v1743_v28 = vadd.s32 %v1742_v50, %v1741_v60  ;;  %v1329_v60 = vsub.f32 1.0, %v3003_v3 }
 0x1d5   :  { %v3088_v15 = vadd.f32 %v1216_v7, %v1213_v20 }
 0x1d6   :  { %v1744_v58 = vrot.slane %v1743_v28, 2 }
 0x1d7   :  { %v1271_v59 = vrot.slane %v3088_v15, 1  ;;  %v1272_v48 = vrot.slane %v3088_v15, 2  ;;  %v1273_v44 = vrot.slane %v3088_v15, 3  ;;  %v1274_v46 = vrot.slane %v3088_v15, 4 }
 0x1d8   :  { %v1275_v37 = vperm.slane %v3088_v15, 0  ;;  %v1745_v42 = vadd.s32 %v1744_v58, %v1743_v28  ;;  %v1915_v28 = vld [vmem:[%s3245_s11 + $0x6] ss:$0 sm:$0xff]  ;;  %v1330_v58 = vperm.slane %v1329_v60, 0 }
 0x1d9   :  { %v1276_v16 = vperm.slane %v1271_v59, 0  ;;  %v1277_v10 = vperm.slane %v1272_v48, 0  ;;  %v1278_v27 = vperm.slane %v1273_v44, 0  ;;  %v1279_v32 = vperm.slane %v1274_v46, 0 }
 0x1da   :  { %v1285_v11 = vadd.f32 %v1275_v37, %v2357_v45  ;;  %v1746_v9 = vrot.slane %v1745_v42, 1 }
 0x1db   :  { %v1286_v0 = vadd.f32 %v1276_v16, %v2431_v13  ;;  %v1287_v4 = vadd.f32 %v1277_v10, %v2400_v57  ;;  %v1288_v49 = vadd.f32 %v1278_v27, %v2406_v62  ;;  %v1289_v18 = vadd.f32 %v1279_v32, %v2379_v24 }
 0x1dc   :  { %v1290_v53 = vsel %vm267_vm1, %v1285_v11, -inf  ;;  %v1747_v17 = vadd.s32 %v1746_v9, %v1745_v42 }
 0x1dd   :  { %v1292_v39 = vsel %vm267_vm1, %v1287_v4, -inf  ;;  %v1293_v12 = vsel %vm267_vm1, %v1288_v49, -inf  ;;  %v1294_v2 = vsel %vm267_vm1, %v1289_v18, -inf  ;;  %v1291_v29 = vsel %vm267_vm1, %v1286_v0, -inf }
 0x1de   :  { %v1295_v34 = vmax.f32 %v1290_v53, %v1294_v2  ;;  %v1297_v22 = vmax.f32 %v1292_v39, %v1293_v12  ;;  %1748 = vst [vmem:[#allocation8 + $0x4] sm:$0x1] %v1747_v17  ;;  %vm1749_vm4 = vcmp.eq.s32.totalorder %v2218_v38, %v1747_v17  ;;  %v1761_v39 = vld [vmem:[#allocation3 + $0x10] sm:$0x1f] }
 0x1df   :  { %v1751_v20 = vsel %vm1749_vm4, %v1750_v51, 0 }
 0x1e0   :  { %v1296_v56 = vmax.f32 %v1295_v34, %v1291_v29  ;;  %v1752_v7 = vsel %vm267_vm1, %v1751_v20, 0 }
 0x1e1   :  { %v1753_v14 = vrot.slane %v1752_v7, 4 }
 0x1e2   :  { %v1298_v19 = vmax.f32 %v1296_v56, %v1297_v22 }
 0x1e3   :  { %v1754_v37 = vadd.s32 %v1753_v14, %v1752_v7 }
 0x1e4   :  { %v1299_v61 = vsub.f32 %v1285_v11, %v1298_v19  ;;  %v1300_v43 = vsub.f32 %v1286_v0, %v1298_v19  ;;  %v1301_v36 = vsub.f32 %v1287_v4, %v1298_v19  ;;  %v1302_v6 = vsub.f32 %v1288_v49, %v1298_v19 }
 0x1e5   :  { %v1303_v33 = vsub.f32 %v1289_v18, %v1298_v19  ;;  %v1755_v27 = vrot.slane %v1754_v37, 2 }
 0x1e6   :  { %v1304_v21 = vmul.f32 1.442695, %v1299_v61  ;;  %v1306_v5 = vmul.f32 1.442695, %v1300_v43  ;;  %v1308_v23 = vmul.f32 1.442695, %v1301_v36 }
 0x1e7   :  { %v1310_v47 = vmul.f32 1.442695, %v1302_v6  ;;  %v1312_v55 = vmul.f32 1.442695, %v1303_v33  ;;  %v1756_v4 = vadd.s32 %v1755_v27, %v1754_v37  ;;  %v2027_v36 = vld [vmem:[#allocation2 + $0x28] sm:$0x1f] }
 0x1e8   :  { %1997 = vpow2.f32 %v1304_v21  ;;  %v1331_v21 = vmul.f32 %v1330_v58, %v3088_v15 }
 0x1e9   :  { %1999 = vpow2.f32 %v1306_v5  ;;  %v1757_v41 = vrot.slane %v1756_v4, 1 }
 0x1ea   :  { %2001 = vpow2.f32 %v1308_v23 }
 0x1eb   :  { %2003 = vpow2.f32 %v1310_v47  ;;  %v1758_v53 = vadd.s32 %v1757_v41, %v1756_v4 }
 0x1ec   :  { %2005 = vpow2.f32 %v1312_v55  ;;  %v1772_v55 = vld [vmem:[#allocation3 + $0x18] sm:$0x1f] }
 0x1ed   :  { %1759 = vst [vmem:[#allocation8 + $0x3] sm:$0x1] %v1758_v53  ;;  %vm1760_vm5 = vcmp.eq.s32.totalorder %v2218_v38, %v1758_v53 }
 0x1ee   :  { %v1998_v52 = vpop.eup %1997  ;;  %v1762_v12 = vsel %vm1760_vm5, %v1761_v39, 0 }
 0x1ef   :  { %v2000_v59 = vpop.eup %1999  ;;  %v1314_v48 = vsel %vm267_vm1, %v1998_v52, 0.0  ;;  %v1763_v2 = vsel %vm267_vm1, %v1762_v12, 0 }
 0x1f0   :  { %v2002_v44 = vpop.eup %2001  ;;  %v1315_v46 = vsel %vm267_vm1, %v2000_v59, 0.0  ;;  %v1764_v34 = vrot.slane %v1763_v2, 4 }
 0x1f1   :  { %v2004_v25 = vpop.eup %2003  ;;  %v1316_v16 = vadd.f32 %v1315_v46, %v1314_v48  ;;  %v1317_v10 = vsel %vm267_vm1, %v2002_v44, 0.0 }
 0x1f2   :  { %v2006_v32 = vpop.eup %2005  ;;  %v1319_v0 = vsel %vm267_vm1, %v2004_v25, 0.0  ;;  %v1765_v50 = vadd.s32 %v1764_v34, %v1763_v2 }
 0x1f3   :  { %v1318_v11 = vadd.f32 %v1317_v10, %v1316_v16  ;;  %v1321_v18 = vsel %vm267_vm1, %v2006_v32, 0.0 }
 0x1f4   :  { %v1766_v22 = vrot.slane %v1765_v50, 2 }
 0x1f5   :  { %v1320_v49 = vadd.f32 %v1319_v0, %v1318_v11 }
 0x1f6   :  { %v1767_v43 = vadd.s32 %v1766_v22, %v1765_v50 }
 0x1f7   :  { %v1322_v35 = vadd.f32 %v1321_v18, %v1320_v49 }
 0x1f8   :  { %v1768_v33 = vrot.slane %v1767_v43, 1 }
 0x1f9   :  { %2007 = vlog2.f32 %v1322_v35 }
 0x1fa   :  { %v1769_v5 = vadd.s32 %v1768_v33, %v1767_v43 }
 0x1fc   :  { %1770 = vst [vmem:[#allocation8 + $0x2] sm:$0x1] %v1769_v5  ;;  %vm1771_vm6 = vcmp.eq.s32.totalorder %v2218_v38, %v1769_v5 }
 0x1fd   :  { %v1773_v51 = vsel %vm1771_vm6, %v1772_v55, 0 }
 0x1fe   :  { %v1774_v59 = vsel %vm267_vm1, %v1773_v51, 0 }
 0x1ff   :  { %v2008_v29 = vpop.eup %2007  ;;  %v1775_v25 = vrot.slane %v1774_v59, 4 }
 0x200   :  { %v1324_v56 = vmul.f32 0.6931472, %v2008_v29 }
 0x201   :  { %v1776_v11 = vadd.s32 %v1775_v25, %v1774_v59  ;;  %v1901_v59 = vld [vmem:[%s3246_s12] ss:$0 sm:$0xff]  ;;  %v3295_v25 = vld [vmem:[#allocation14_spill] sm:$0xff] }
 0x202   :  { %v1325_v61 = vadd.f32 %v1324_v56, %v1298_v19  ;;  %v1783_v56 = vld [vmem:[#allocation3] sm:$0x1f] }
 0x204   :  { %v1326_v6 = vadd.f32 %v2027_v36, %v1325_v61 }
 0x206   :  { %v1328_v42 = vmul.f32 %v1915_v28, %v1326_v6 }
 0x208   :  { %v3121_v23 = vadd.f32 %v1331_v21, %v1328_v42 }
 0x20a   :  { %v1386_v3 = vrot.slane %v3121_v23, 1  ;;  %v1387_v47 = vrot.slane %v3121_v23, 2  ;;  %v1388_v9 = vrot.slane %v3121_v23, 3  ;;  %v1389_v19 = vrot.slane %v3121_v23, 4 }
 0x20b   :  { %v1390_v17 = vperm.slane %v3121_v23, 0 }
 0x20c   :  { %v1391_v20 = vperm.slane %v1386_v3, 0  ;;  %v1392_v15 = vperm.slane %v1387_v47, 0  ;;  %v1393_v7 = vperm.slane %v1388_v9, 0  ;;  %v1394_v52 = vperm.slane %v1389_v19, 0 }
 0x20d   :  { %v1400_v14 = vadd.f32 %v1390_v17, %v2357_v45 }
 0x20e   :  { %v1401_v48 = vadd.f32 %v1391_v20, %v2431_v13  ;;  %v1402_v44 = vadd.f32 %v1392_v15, %v2400_v57  ;;  %v1403_v46 = vadd.f32 %v1393_v7, %v2406_v62  ;;  %v1404_v37 = vadd.f32 %v1394_v52, %v2379_v24  ;;  %v2028_v15 = vld [vmem:[%s3244_s10 + $0x6] sm:$0x1] }
 0x20f   :  { %v1405_v16 = vsel %vm267_vm1, %v1400_v14, -inf  ;;  %v1777_v57 = vrot.slane %v1776_v11, 2  ;;  %v1349_v7 = vmul.u32 5, %v2028_v15 }
 0x210   :  { %v1407_v10 = vsel %vm267_vm1, %v1402_v44, -inf  ;;  %v1408_v27 = vsel %vm267_vm1, %v1403_v46, -inf  ;;  %v1409_v32 = vsel %vm267_vm1, %v1404_v37, -inf  ;;  %v1406_v0 = vsel %vm267_vm1, %v1401_v48, -inf }
 0x211   :  { %v1410_v45 = vmax.f32 %v1405_v16, %v1409_v32  ;;  %v1412_v4 = vmax.f32 %v1407_v10, %v1408_v27  ;;  %v1778_v62 = vadd.s32 %v1777_v57, %v1776_v11  ;;  %v586_v16 = vmul.f32 %v1901_v59, %v3295_v25  ;;  %v3296_v10 = vld [vmem:[#allocation15_spill] sm:$0xff]  ;;  %v1905_v32 = vld [vmem:[%s3246_s12 + $0x2] ss:$0 sm:$0xff]  ;;  %v3297_v57 = vld [vmem:[#allocation16_spill] sm:$0xff] }
 0x212   :  { %v1917_v59 = vld [vmem:[%s3246_s12 + $0x7] ss:$0 sm:$0xff] }
 0x213   :  { %v1411_v13 = vmax.f32 %v1410_v45, %v1406_v0  ;;  %v1779_v39 = vrot.slane %v1778_v62, 1  ;;  %v3177_v45 = vld [vmem:[%s3245_s11 + $0x7] sm:$0x1] }
 0x214   :  { %v1444_v0 = vsub.f32 1.0, %v3177_v45 }
 0x215   :  { %v3140_v49 = vmax.f32 %v1411_v13, %v1412_v4  ;;  %v1780_v29 = vadd.s32 %v1779_v39, %v1778_v62  ;;  %v808_v62 = vmul.f32 %v1905_v32, %v3297_v57  ;;  %v3298_v39 = vld [vmem:[#allocation24_spill] sm:$0xff] }
 0x217   :  { %v1414_v24 = vsub.f32 %v1400_v14, %v3140_v49  ;;  %v1415_v18 = vsub.f32 %v1401_v48, %v3140_v49  ;;  %v1416_v41 = vsub.f32 %v1402_v44, %v3140_v49  ;;  %v1417_v35 = vsub.f32 %v1403_v46, %v3140_v49  ;;  %1781 = vst [vmem:[#allocation8 + $0x1] sm:$0x1] %v1780_v29  ;;  %v1903_v48 = vld [vmem:[%s3246_s12 + $0x1] ss:$0 sm:$0xff]  ;;  %v1335_v44 = vld [vmem:[%s3244_s10 + $0x7] sm:$0x1] }
 0x218   :  { %v1418_v53 = vsub.f32 %v1404_v37, %v3140_v49  ;;  %vm1782_vm7 = vcmp.eq.s32.totalorder %v2218_v38, %v1780_v29  ;;  %v1350_v37 = vadd.s32 %v1349_v7, %v1335_v44  ;;  %v658_v27 = vmul.f32 %v1903_v48, %v3296_v10  ;;  %v1334_v29 = vld [vmem:[#allocation2 + $0x38] sm:$0x1f] }
 0x219   :  { %v1419_v12 = vmul.f32 1.442695, %v1414_v24  ;;  %v1421_v2 = vmul.f32 1.442695, %v1415_v18  ;;  %v1423_v34 = vmul.f32 1.442695, %v1416_v41 }
 0x21a   :  { %v1425_v60 = vmul.f32 1.442695, %v1417_v35  ;;  %v1427_v50 = vmul.f32 1.442695, %v1418_v53  ;;  %v1784_v22 = vsel %vm1782_vm7, %v1783_v56, 0  ;;  %v1351_v11 = vperm.slane %v1350_v37, 0 }
 0x21b   :  { %2009 = vpow2.f32 %v1419_v12  ;;  %v1785_v28 = vsel %vm267_vm1, %v1784_v22, 0  ;;  %v659_v4 = vadd.f32 %v658_v27, %v586_v16  ;;  %v1907_v24 = vld [vmem:[%s3246_s12 + $0x3] ss:$0 sm:$0xff]  ;;  %v1918_v41 = vld [vmem:[%s3245_s11 + $0x7] ss:$0 sm:$0xff]  ;;  %v1445_v35 = vperm.slane %v1444_v0, 0 }
 0x21c   :  { %2011 = vpow2.f32 %v1421_v2  ;;  %v1786_v58 = vrot.slane %v1785_v28, 4  ;;  %vm1352_vm8 = vcmp.eq.s32.totalorder %v2218_v38, %v1351_v11  ;;  %vm1353_vm9 = vcmp.eq.s32.totalorder %v3298_v39, %v1351_v11  ;;  %v3299_v2 = vld [vmem:[#allocation17_spill] sm:$0xff] }
 0x21d   :  { %2013 = vpow2.f32 %v1423_v34  ;;  %v809_v12 = vadd.f32 %v808_v62, %v659_v4  ;;  %v923_v34 = vmul.f32 %v1907_v24, %v3299_v2  ;;  %v1866_v56 = vsel %vm1352_vm8, 1.0, %v3278_v31 }
 0x21e   :  { %2015 = vpow2.f32 %v1425_v60  ;;  %v1787_v43 = vadd.s32 %v1786_v58, %v1785_v28  ;;  %v1909_v60 = vld [vmem:[%s3246_s12 + $0x4] ss:$0 sm:$0xff]  ;;  %v1867_v22 = vsel %vm1353_vm9, 1.0, %v3278_v31  ;;  %vm1354_vm10 = vcmp.eq.s32.totalorder %v2801_v54, %v1351_v11 }
 0x21f   :  { %2017 = vpow2.f32 %v1427_v50  ;;  %v924_v58 = vadd.f32 %v923_v34, %v809_v12  ;;  %vm1355_vm12 = vcmp.eq.s32.totalorder %v2883_v30, %v1351_v11  ;;  %v1868_v54 = vsel %vm1354_vm10, 1.0, %v3278_v31 }
 0x220   :  { %v1788_v21 = vrot.slane %v1787_v43, 2 }
 0x221   :  { %v2010_v61 = vpop.eup %2009 }
 0x222   :  { %v2012_v36 = vpop.eup %2011  ;;  %v1429_v6 = vsel %vm267_vm1, %v2010_v61, 0.0  ;;  %v1789_v9 = vadd.s32 %v1788_v21, %v1787_v43  ;;  %v3300_v61 = vld [vmem:[#allocation18_spill] sm:$0xff] }
 0x223   :  { %v2014_v33 = vpop.eup %2013  ;;  %v1430_v42 = vsel %vm267_vm1, %v2012_v36, 0.0  ;;  %v1038_v43 = vmul.f32 %v1909_v60, %v3300_v61  ;;  %v1911_v36 = vld [vmem:[%s3246_s12 + $0x5] ss:$0 sm:$0xff] }
 0x224   :  { %v2016_v5 = vpop.eup %2015  ;;  %v1431_v3 = vadd.f32 %v1430_v42, %v1429_v6  ;;  %v1432_v47 = vsel %vm267_vm1, %v2014_v33, 0.0  ;;  %v1790_v51 = vrot.slane %v1789_v9, 1  ;;  %v1916_v6 = vld [vmem:[%s3244_s10 + $0x7] ss:$0 sm:$0xff]  ;;  %v3301_v42 = vld [vmem:[#allocation23_spill] sm:$0xff] }
 0x225   :  { %v2018_v19 = vpop.eup %2017  ;;  %v1434_v17 = vsel %vm267_vm1, %v2016_v5, 0.0  ;;  %v1364_v21 = vmul.f32 %v1866_v56, %v3301_v42  ;;  %vm1338_vm13 = vcmp.eq.s32.totalorder %v2218_v38, %v1916_v6 }
 0x226   :  { %v1433_v55 = vadd.f32 %v1432_v47, %v1431_v3  ;;  %v1436_v52 = vsel %vm267_vm1, %v2018_v19, 0.0  ;;  %v1791_v14 = vadd.s32 %v1790_v51, %v1789_v9  ;;  %v1869_v3 = vsel %vm1355_vm12, 1.0, %v3278_v31  ;;  %v3302_v9 = vld [vmem:[#allocation19_spill] sm:$0xff] }
 0x227   :  { %v1039_v47 = vadd.f32 %v1038_v43, %v924_v58  ;;  %v1153_v19 = vmul.f32 %v1911_v36, %v3302_v9  ;;  %v1865_v15 = vsel %vm1338_vm13, 1.0, %v3278_v31 }
 0x228   :  { %v1435_v20 = vadd.f32 %v1434_v17, %v1433_v55  ;;  %1792 = vst [vmem:[#allocation8] sm:$0x1] %v1791_v14  ;;  %v1914_v55 = vld [vmem:[%s3246_s12 + $0x6] ss:$0 sm:$0xff]  ;;  %v1341_v38 = vmul.f32 %v1865_v15, %v1334_v29  ;;  %s2118_s12 = smov [#allocation7]  }
 0x229   :  { %1814 = dma.vmem_to_hbm [thread:$0]  %s1810_s20, 128, %s1812_s1, [#allocation9]   ;;  %v1154_v7 = vadd.f32 %v1153_v19, %v1039_v47 }
 0x22a   :  { %v1437_v46 = vadd.f32 %v1436_v52, %v1435_v20  ;;  %v1367_v20 = vmul.f32 %v1869_v3, %v2913_v63  ;;  %v3303_v52 = vld [vmem:[#allocation21_spill] sm:$0xff]  ;;  %v1342_v63 = vsel %vm267_vm1, %v1341_v38, 0.0  ;;  %s1798_s21 = sshll.u32 %s2118_s12, 4  ;;  %s1799_s21 = int_to_ptr.vmem [resolvable:$true] %s1798_s21 }
 0x22b   :  { %v1268_v14 = vmul.f32 %v1914_v55, %v3303_v52  ;;  %v1343_v11 = vrot.slane %v1342_v63, 4 }
 0x22c   :  { %2019 = vlog2.f32 %v1437_v46  ;;  %v1370_v37 = vsel %vm644_vm11, %v1367_v20, 0.0 }
 0x22d   :  { %v1269_v25 = vadd.f32 %v1268_v14, %v1154_v7  ;;  %v1344_v62 = vadd.f32 %v1343_v11, %v1342_v63 }
 0x232   :  { %v2020_v13 = vpop.eup %2019 }
 0x233   :  { %v1439_v18 = vmul.f32 0.6931472, %v2020_v13 }
 0x235   :  { %v1440_v53 = vadd.f32 %v1439_v18, %v3140_v49  ;;  %v1446_v49 = vmul.f32 %v1445_v35, %v3121_v23  ;;  %v1365_v23 = vmul.f32 %v1867_v22, %v2816_v1  ;;  %v1366_v1 = vmul.f32 %v1868_v54, %v2877_v40 }
 0x236   :  { %v1383_v40 = vmul.f32 %v1917_v59, %v1865_v15 }
 0x237   :  { %v1441_v50 = vadd.f32 %v1440_v53, %v1334_v29  ;;  %v1368_v17 = vadd.f32 %v1365_v23, %v1364_v21 }
 0x238   :  { %v1384_v27 = vadd.f32 %v1383_v40, %v1269_v25 }
 0x239   :  { %v1443_v28 = vmul.f32 %v1918_v41, %v1441_v50  ;;  %v1369_v44 = vadd.f32 %v1368_v17, %v1366_v1  ;;  %v1345_v41 = vrot.slane %v1344_v62, 2 }
 0x23a   :  { %v1453_v4 = vmul.f32 %v3289_v8, %v1384_v27 }
 0x23b   :  { %v1447_v33 = vadd.f32 %v1446_v49, %v1443_v28  ;;  %v1371_v10 = vadd.f32 %v1370_v37, %v1369_v44  ;;  %v1346_v12 = vadd.f32 %v1345_v41, %v1344_v62 }
 0x23c   :  { %v1454_v18 = vsel %vm267_vm1, %v1453_v4, 0.0 }
 0x23d   :  { %v1462_v5 = vadd.f32 %v3289_v8, %v1447_v33  ;;  %v1372_v0 = vrot.slane %v1371_v10, 4  ;;  %v1455_v53 = vrot.slane %v1454_v18, 4  ;;  %v1347_v56 = vrot.slane %v1346_v12, 1 }
 0x23f   :  { %v1463_v30 = vsel %vm267_vm1, %v1462_v5, -inf  ;;  %v1373_v24 = vadd.f32 %v1372_v0, %v1371_v10  ;;  %v1456_v29 = vadd.f32 %v1455_v53, %v1454_v18  ;;  %v1348_v58 = vadd.f32 %v1347_v56, %v1346_v12 }
 0x240   :  { %v1464_v51 = vrot.slane %v1463_v30, 4 }
 0x241   :  { %v1374_v35 = vrot.slane %v1373_v24, 2  ;;  %v1457_v28 = vrot.slane %v1456_v29, 2 }
 0x242   :  { %v1465_v48 = vmax.f32 %v1463_v30, %v1464_v51 }
 0x243   :  { %v1375_v34 = vadd.f32 %v1374_v35, %v1373_v24  ;;  %v1458_v36 = vadd.f32 %v1457_v28, %v1456_v29 }
 0x244   :  { %v1466_v46 = vrot.slane %v1465_v48, 2 }
 0x245   :  { %v1376_v22 = vrot.slane %v1375_v34, 1  ;;  %v1459_v42 = vrot.slane %v1458_v36, 1 }
 0x246   :  { %v1467_v16 = vmax.f32 %v1465_v48, %v1466_v46 }
 0x247   :  { %v1377_v61 = vadd.f32 %v1376_v22, %v1375_v34  ;;  %v1460_v54 = vadd.f32 %v1459_v42, %v1458_v36 }
 0x248   :  { %v1468_v31 = vrot.slane %v1467_v16, 1 }
 0x249   :  { %v1378_v33 = vadd.f32 %v1377_v61, %v1348_v58 }
 0x24a   :  { %v1469_v32 = vmax.f32 %v1467_v16, %v1468_v31 }
 0x24b   :  { %v1379_v21 = vmul.f32 %v1378_v33, %v3177_v45 }
 0x24c   :  { %v1470_v13 = vsub.f32 %v1462_v5, %v1469_v32 }
 0x24d   :  { %v1380_v23 = vadd.f32 %v1379_v21, %v3007_v26 }
 0x24e   :  { %v1471_v57 = vmul.f32 1.442695, %v1470_v13 }
 0x24f   :  { %v1461_v47 = vadd.f32 %v1460_v54, %v1380_v23 }
 0x250   :  { %2021 = vpow2.f32 %v1471_v57 }
 0x256   :  { %v2022_v39 = vpop.eup %2021 }
 0x257   :  { %v1473_v2 = vsel %vm267_vm1, %v2022_v39, 0.0 }
 0x258   :  { %v1474_v60 = vrot.slane %v1473_v2, 4 }
 0x25a   :  { %v1475_v50 = vadd.f32 %v1474_v60, %v1473_v2 }
 0x25c   :  { %v1476_v8 = vrot.slane %v1475_v50, 2 }
 0x25e   :  { %v1477_v49 = vadd.f32 %v1476_v8, %v1475_v50 }
 0x260   :  { %v1478_v43 = vrot.slane %v1477_v49, 1 }
 0x262   :  { %v1479_v6 = vadd.f32 %v1478_v43, %v1477_v49 }
 0x264   :  { %2023 = vlog2.f32 %v1479_v6 }
 0x26a   :  { %v2024_v5 = vpop.eup %2023 }
 0x26b   :  { %v1481_v3 = vmul.f32 0.6931472, %v2024_v5 }
 0x26d   :  { %v1482_v9 = vadd.f32 %v1481_v3, %v1469_v32 }
 0x26f   :  { %v1483_v19 = vsub.f32 %v1461_v47, %v1482_v9 }
 0x271   :  { %1484 = vst [vmem:[#allocation7] sm:$0x1] %v1483_v19 }
 0x272   :  { %1803 = dma.vmem_to_hbm [thread:$0]  %s1799_s21, 16, %s1801_s2, [#allocation6]  }
 0x273   :  { %2103 = dma.done.wait [#allocation6], 16  }
 0x274   :  { %2104 = vsyncadd [#allocation6], 4294967280 }
 0x275   :  { %2105 = dma.done.wait [#allocation9], 128  }
 0x276   :  { %2106 = vsyncadd [#allocation9], 4294967168 }
 0x277   :  { %1823 = vsyncpa [#allocation5], 1 }
 0x278   :  { %1824 = vsyncpa [#allocation6], 1 }
 0x279   :  { %1825 = vsyncpa [#allocation9], 1 }

</bundles_post_ra>
